<compile_context>
chip_gen: v7x
topology: tpu7x:2x2x1
jax: 0.10.0
libtpu: 0.0.40
codegen_flags: <defaults>
</compile_context>

<pallas_src>
import functools

import jax
import jax.numpy as jnp
from jax import lax
from jax.experimental import pallas as pl
from jax.experimental.pallas import tpu as pltpu


# ----------------------------- Pallas kernel ---------------------------------

def seq2seq_kernel(src_ref, tgt_ref,
                   wih_e_ref, whh_e_hbm, b_e_ref,
                   wih_d_ref, whh_d_hbm, b_d_ref,
                   wfc_hbm, bfc_ref,
                   out_ref,
                   enc_g_ref, dec_g_ref, hdec_ref,
                   whh_e_ref, whh_d_ref, wfc_ref,
                   sem,
                   *, Bb, H, Ts, Tt, Vp):
    f32 = jnp.float32
    bf16 = jnp.bfloat16

    # ---- start weight DMAs; they overlap with the hoisted projections below ---
    cp_e = pltpu.make_async_copy(whh_e_hbm, whh_e_ref, sem.at[0])
    cp_d = pltpu.make_async_copy(whh_d_hbm, whh_d_ref, sem.at[1])
    cp_f = pltpu.make_async_copy(wfc_hbm, wfc_ref, sem.at[2])
    cp_e.start(); cp_d.start(); cp_f.start()

    # ---- hoisted input->hidden projections: one big MXU matmul per LSTM ------
    src2d = src_ref[...].reshape(Ts * Bb, -1).astype(bf16)      # (Ts*Bb, E)
    enc_gx = jnp.dot(src2d, wih_e_ref[...], preferred_element_type=f32)
    enc_g_ref[...] = (enc_gx + b_e_ref[...]).reshape(Ts, Bb, 4 * H)

    tgt2d = tgt_ref[...].reshape(Tt * Bb, -1).astype(bf16)      # (Tt*Bb, E)
    dec_gx = jnp.dot(tgt2d, wih_d_ref[...], preferred_element_type=f32)
    dec_g_ref[...] = (dec_gx + b_d_ref[...]).reshape(Tt, Bb, 4 * H)

    def gates_to_hc(gates, c):
        # PyTorch LSTM gate order: i, f, g, o (f32 gate math; see header TODO).
        i = jax.nn.sigmoid(gates[:, 0 * H:1 * H])
        f = jax.nn.sigmoid(gates[:, 1 * H:2 * H])
        g = jnp.tanh(gates[:, 2 * H:3 * H])
        o = jax.nn.sigmoid(gates[:, 3 * H:4 * H])
        c_new = f * c + i * g
        h_new = o * jnp.tanh(c_new)
        return h_new, c_new

    # ---- encoder recurrence: only h @ W_hh remains on the serial path --------
    cp_e.wait()                               # whh_enc needed from here on

    def enc_step(t, carry):
        h, c, h_bf = carry
        # Read whh_e_ref at the dot site (don't pin 32 vregs across the unroll).
        gates = enc_g_ref[t] + jnp.dot(h_bf, whh_e_ref[...],
                                       preferred_element_type=f32)
        h, c = gates_to_hc(gates, c)
        return h, c, h.astype(bf16)

    h0 = jnp.zeros((Bb, H), f32)
    c0 = jnp.zeros((Bb, H), f32)
    h, c, h_bf = lax.fori_loop(0, Ts, enc_step, (h0, c0, h0.astype(bf16)),
                               unroll=True)

    # ---- decoder recurrence: stash h_t, project all steps afterwards ---------
    cp_d.wait()                               # whh_dec needed from here on

    def dec_step(t, carry):
        h, c, h_bf = carry
        gates = dec_g_ref[t] + jnp.dot(h_bf, whh_d_ref[...],
                                       preferred_element_type=f32)
        h, c = gates_to_hc(gates, c)
        hdec_ref[t] = h                       # (Bb, H) f32, one native tile per step
        return h, c, h.astype(bf16)

    # NOTE: the returned carry is unused; the loop is kept alive by the hdec_ref
    # side effects (ref writes are tracked effects in Pallas) — do not "clean up"
    # this call into a dead expression.
    lax.fori_loop(0, Tt, dec_step, (h, c, h_bf), unroll=True)

    # ---- single fc matmul over all decoder steps + one lane-dense store ------
    cp_f.wait()                               # wfc needed from here on
    hs = hdec_ref[...].reshape(Tt * Bb, H).astype(bf16)
    logits = jnp.dot(hs, wfc_ref[...], preferred_element_type=f32) + bfc_ref[...]
    out_ref[...] = logits.reshape(Tt, Bb, Vp)


# ------------------------------ JAX wrapper -----------------------------------

def seq2seq_forward(params, src, tgt, n_out, block_b=8):
    """src, tgt: int32 (B, Ts) / (B, Tt). Returns logits (B, Tt, n_out)."""
    emb = params["embedding"]
    B, Ts = src.shape
    Tt = tgt.shape[1]
    E = emb.shape[1]
    H = params["whh_enc"].shape[0]
    Vp = params["wfc"].shape[1]                     # lane-padded output dim
    assert B % block_b == 0, (B, block_b)

    # Gather embeddings directly time-major (no separate transpose pass).
    src_tm = jnp.take(emb, src.T, axis=0)           # (Ts, B, E) f32
    tgt_tm = jnp.take(emb, tgt.T, axis=0)           # (Tt, B, E) f32

    kernel = functools.partial(seq2seq_kernel, Bb=block_b, H=H, Ts=Ts, Tt=Tt, Vp=Vp)

    grid_spec = pltpu.PrefetchScalarGridSpec(
        num_scalar_prefetch=0,
        grid=(B // block_b,),                       # batch blocks (parallel on v7x)
        in_specs=[
            pl.BlockSpec((Ts, block_b, E), lambda b: (0, b, 0)),    # src (time-major)
            pl.BlockSpec((Tt, block_b, E), lambda b: (0, b, 0)),    # tgt (time-major)
            pl.BlockSpec((E, 4 * H), lambda b: (0, 0)),             # wih_enc (needed first)
            pl.BlockSpec(memory_space=pl.ANY),                      # whh_enc (manual DMA)
            pl.BlockSpec((1, 4 * H), lambda b: (0, 0)),             # b_enc
            pl.BlockSpec((E, 4 * H), lambda b: (0, 0)),             # wih_dec
            pl.BlockSpec(memory_space=pl.ANY),                      # whh_dec (manual DMA)
            pl.BlockSpec((1, 4 * H), lambda b: (0, 0)),             # b_dec
            pl.BlockSpec(memory_space=pl.ANY),                      # wfc (manual DMA)
            pl.BlockSpec((1, Vp), lambda b: (0, 0)),                # bfc
        ],
        out_specs=pl.BlockSpec((Tt, block_b, Vp), lambda b: (0, b, 0)),
        scratch_shapes=[
            pltpu.VMEM((Ts, block_b, 4 * H), jnp.float32),   # encoder input-gate stash
            pltpu.VMEM((Tt, block_b, 4 * H), jnp.float32),   # decoder input-gate stash
            pltpu.VMEM((Tt, block_b, H), jnp.float32),       # decoder hidden states
            pltpu.VMEM((H, 4 * H), jnp.bfloat16),            # whh_enc landing buffer
            pltpu.VMEM((H, 4 * H), jnp.bfloat16),            # whh_dec landing buffer
            pltpu.VMEM((H, Vp), jnp.bfloat16),               # wfc landing buffer
            pltpu.SemaphoreType.DMA((3,)),
        ],
    )

    out_tm = pl.pallas_call(
        kernel,
        out_shape=jax.ShapeDtypeStruct((Tt, B, Vp), jnp.float32),
        grid_spec=grid_spec,
        compiler_params=pltpu.CompilerParams(dimension_semantics=("parallel",)),
    )(src_tm, tgt_tm,
      params["wih_enc"], params["whh_enc"], params["b_enc"],
      params["wih_dec"], params["whh_dec"], params["b_dec"],
      params["wfc"], params["bfc"])

    # back to batch_first, drop the padded vocab columns
    return jnp.transpose(out_tm, (1, 0, 2))[:, :, :n_out]


# ------------------------- deterministic parameters ---------------------------

def init_params(key, vocab_size, embed_size=64, hidden_size=128):
    V = vocab_size + 1
    Vp = ((V + 127) // 128) * 128                   # pad fc output dim to lane multiple
    s = 0.1
    keys = jax.random.split(key, 4)

    emb = s * jax.random.normal(keys[0], (V, embed_size), jnp.float32)
    emb = emb.at[0].set(0.0)                        # padding_idx=0

    def lstm(k, in_size):
        k0, k1, k2, k3 = jax.random.split(k, 4)
        w_ih = s * jax.random.normal(k0, (4 * hidden_size, in_size), jnp.float32)
        w_hh = s * jax.random.normal(k1, (4 * hidden_size, hidden_size), jnp.float32)
        b_ih = s * jax.random.normal(k2, (4 * hidden_size,), jnp.float32)
        b_hh = s * jax.random.normal(k3, (4 * hidden_size,), jnp.float32)
        # transposed so the kernel does x @ W_ih^T via (E,4H) layout; biases summed
        return w_ih.T, w_hh.T, (b_ih + b_hh).reshape(1, -1)

    ke, kd = jax.random.split(keys[1], 2)
    wih_e, whh_e, b_e = lstm(ke, embed_size)
    wih_d, whh_d, b_d = lstm(kd, embed_size)

    w_fc = s * jax.random.normal(keys[2], (V, hidden_size), jnp.float32)
    b_fc = s * jax.random.normal(keys[3], (V,), jnp.float32)
    wfc = w_fc.T                                    # (H, V)
    bfc = b_fc.reshape(1, -1)                       # (1, V)
    wfc_pad = jnp.zeros((hidden_size, Vp), jnp.float32).at[:, :V].set(wfc)
    bfc_pad = jnp.zeros((1, Vp), jnp.float32).at[:, :V].set(bfc)

    bf16 = jnp.bfloat16
    kparams = dict(embedding=emb,
                   wih_enc=wih_e.astype(bf16), whh_enc=whh_e.astype(bf16), b_enc=b_e,
                   wih_dec=wih_d.astype(bf16), whh_dec=whh_d.astype(bf16), b_dec=b_d,
                   wfc=wfc_pad.astype(bf16), bfc=bfc_pad)
    rparams = dict(embedding=emb,
                   wih_enc=wih_e, whh_enc=whh_e, b_enc=b_e,
                   wih_dec=wih_d, whh_dec=whh_d, b_dec=b_d,
                   wfc=wfc, bfc=bfc)
    return kparams, rparams


# ----------------------------- pure-JAX reference -----------------------------

def ref_forward(params, src, tgt):
    emb = params["embedding"]
    es = jnp.take(emb, src, axis=0)
    et = jnp.take(emb, tgt, axis=0)
    H = params["whh_enc"].shape[0]
    B = src.shape[0]

    def run_lstm(x_btE, h, c, wih, whh, b):
        def step(carry, xt):
            h, c = carry
            gates = xt @ wih + h @ whh + b
            i = jax.nn.sigmoid(gates[:, :H])
            f = jax.nn.sigmoid(gates[:, H:2 * H])
            g = jnp.tanh(gates[:, 2 * H:3 * H])
            o = jax.nn.sigmoid(gates[:, 3 * H:])
            c = f * c + i * g
            h = o * jnp.tanh(c)
            return (h, c), h
        (h, c), hs = lax.scan(step, (h, c), jnp.transpose(x_btE, (1, 0, 2)))
        return h, c, jnp.transpose(hs, (1, 0, 2))

    h0 = jnp.zeros((B, H), jnp.float32)
    c0 = jnp.zeros((B, H), jnp.float32)
    h, c, _ = run_lstm(es, h0, c0, params["wih_enc"], params["whh_enc"], params["b_enc"])
    _, _, hs = run_lstm(et, h, c, params["wih_dec"], params["whh_dec"], params["b_dec"])
    return hs @ params["wfc"] + params["bfc"]


# ----------------------------------- main --------------------------------------

if __name__ == "__main__":
    vocab_size = 32          # synthetic char vocab (module uses len(char2idx))
    embed_size = 64
    hidden_size = 128
    B, Ts, Tt = 16, 8, 8     # B=16 -> two batch blocks of 8 (2nd TensorCore on v7x)

    key = jax.random.PRNGKey(0)
    k_p, k_s, k_t = jax.random.split(key, 3)
    kparams, rparams = init_params(k_p, vocab_size, embed_size, hidden_size)

    src = jax.random.randint(k_s, (B, Ts), 0, vocab_size + 1, dtype=jnp.int32)
    tgt = jax.random.randint(k_t, (B, Tt), 0, vocab_size + 1, dtype=jnp.int32)

    out = jax.block_until_ready(seq2seq_forward(kparams, src, tgt, vocab_size + 1))
    ref = jax.block_until_ready(ref_forward(rparams, src, tgt))

    assert out.shape == (B, Tt, vocab_size + 1), out.shape
    # bf16 matmul operands (f32 accumulate) -> loosened tolerance vs the f32 reference
    max_diff = float(jnp.max(jnp.abs(out - ref)))
    assert jnp.allclose(out, ref, atol=2e-2, rtol=2e-2), \
        f"mismatch vs reference (max abs diff {max_diff})"

    print("KERNEL_OK")
</pallas_src>

<mosaic_0001>
module attributes {stable_mosaic.version = 11 : i64} {
  func.func @seq2seq_kernel(%arg0: i32, %arg1: memref<8x8x64xf32, #tpu.memory_space<vmem>>, %arg2: memref<8x8x64xf32, #tpu.memory_space<vmem>>, %arg3: memref<64x512xbf16, #tpu.memory_space<vmem>>, %arg4: memref<128x512xbf16, #tpu.memory_space<any>>, %arg5: memref<1x512xf32, #tpu.memory_space<vmem>>, %arg6: memref<64x512xbf16, #tpu.memory_space<vmem>>, %arg7: memref<128x512xbf16, #tpu.memory_space<any>>, %arg8: memref<1x512xf32, #tpu.memory_space<vmem>>, %arg9: memref<128x128xbf16, #tpu.memory_space<any>>, %arg10: memref<1x128xf32, #tpu.memory_space<vmem>>, %arg11: memref<8x8x128xf32, #tpu.memory_space<vmem>>, %arg12: memref<8x8x512xf32, #tpu.memory_space<vmem>>, %arg13: memref<8x8x512xf32, #tpu.memory_space<vmem>>, %arg14: memref<8x8x128xf32, #tpu.memory_space<vmem>>, %arg15: memref<128x512xbf16, #tpu.memory_space<vmem>>, %arg16: memref<128x512xbf16, #tpu.memory_space<vmem>>, %arg17: memref<128x128xbf16, #tpu.memory_space<vmem>>, %arg18: memref<3x!tpu.dma_semaphore, #tpu.memory_space<semaphore_mem>>) attributes {dimension_semantics = [#tpu.dimension_semantics<parallel>], iteration_bounds = array<i64: 2>, scalar_prefetch = 0 : i64, scratch_operands = 7 : i64, tpu.core_type = #tpu.core_type<tc>, window_params = [{transform_indices = @transform_0, window_bounds = array<i64: 8, 8, 64>}, {transform_indices = @transform_1, window_bounds = array<i64: 8, 8, 64>}, {pipeline_mode = #tpu.pipeline_mode<synchronous>, transform_indices = @transform_2, window_bounds = array<i64: 64, 512>}, {}, {pipeline_mode = #tpu.pipeline_mode<synchronous>, transform_indices = @transform_4, window_bounds = array<i64: 1, 512>}, {pipeline_mode = #tpu.pipeline_mode<synchronous>, transform_indices = @transform_5, window_bounds = array<i64: 64, 512>}, {}, {pipeline_mode = #tpu.pipeline_mode<synchronous>, transform_indices = @transform_7, window_bounds = array<i64: 1, 512>}, {}, {pipeline_mode = #tpu.pipeline_mode<synchronous>, transform_indices = @transform_9, window_bounds = array<i64: 1, 128>}, {transform_indices = @transform_10, window_bounds = array<i64: 8, 8, 128>}]} {
    %c0_i32 = arith.constant 0 : i32
    %0 = tpu.memref_slice %arg18[%c0_i32] : memref<3x!tpu.dma_semaphore, #tpu.memory_space<semaphore_mem>> -> memref<1x!tpu.dma_semaphore, #tpu.memory_space<semaphore_mem>>
    %1 = tpu.memref_squeeze %0 : memref<1x!tpu.dma_semaphore, #tpu.memory_space<semaphore_mem>> -> memref<!tpu.dma_semaphore, #tpu.memory_space<semaphore_mem>>
    tpu.enqueue_dma source(%arg4 : memref<128x512xbf16, #tpu.memory_space<any>>) target(%arg15 : memref<128x512xbf16, #tpu.memory_space<vmem>>) target_semaphore(%1 : memref<!tpu.dma_semaphore, #tpu.memory_space<semaphore_mem>>)
    %c1_i32 = arith.constant 1 : i32
    %2 = tpu.memref_slice %arg18[%c1_i32] : memref<3x!tpu.dma_semaphore, #tpu.memory_space<semaphore_mem>> -> memref<1x!tpu.dma_semaphore, #tpu.memory_space<semaphore_mem>>
    %3 = tpu.memref_squeeze %2 : memref<1x!tpu.dma_semaphore, #tpu.memory_space<semaphore_mem>> -> memref<!tpu.dma_semaphore, #tpu.memory_space<semaphore_mem>>
    tpu.enqueue_dma source(%arg7 : memref<128x512xbf16, #tpu.memory_space<any>>) target(%arg16 : memref<128x512xbf16, #tpu.memory_space<vmem>>) target_semaphore(%3 : memref<!tpu.dma_semaphore, #tpu.memory_space<semaphore_mem>>)
    %c2_i32 = arith.constant 2 : i32
    %4 = tpu.memref_slice %arg18[%c2_i32] : memref<3x!tpu.dma_semaphore, #tpu.memory_space<semaphore_mem>> -> memref<1x!tpu.dma_semaphore, #tpu.memory_space<semaphore_mem>>
    %5 = tpu.memref_squeeze %4 : memref<1x!tpu.dma_semaphore, #tpu.memory_space<semaphore_mem>> -> memref<!tpu.dma_semaphore, #tpu.memory_space<semaphore_mem>>
    tpu.enqueue_dma source(%arg9 : memref<128x128xbf16, #tpu.memory_space<any>>) target(%arg17 : memref<128x128xbf16, #tpu.memory_space<vmem>>) target_semaphore(%5 : memref<!tpu.dma_semaphore, #tpu.memory_space<semaphore_mem>>)
    %c0 = arith.constant 0 : index
    %c0_0 = arith.constant 0 : index
    %c0_1 = arith.constant 0 : index
    %6 = vector.load %arg1[%c0, %c0_0, %c0_1] : memref<8x8x64xf32, #tpu.memory_space<vmem>>, vector<8x8x64xf32>
    %7 = vector.shape_cast %6 : vector<8x8x64xf32> to vector<64x64xf32>
    %8 = arith.truncf %7 : vector<64x64xf32> to vector<64x64xbf16>
    %c0_2 = arith.constant 0 : index
    %c0_3 = arith.constant 0 : index
    %9 = vector.load %arg3[%c0_2, %c0_3] : memref<64x512xbf16, #tpu.memory_space<vmem>>, vector<64x512xbf16>
    %cst = arith.constant dense<0.000000e+00> : vector<64x512xf32>
    %10 = tpu.matmul %8, %9, %cst {dimension_numbers = #tpu.dot_dimension_numbers<[1], [0], [0], [1], [0, 0, 1, 1], [], []>} : vector<64x64xbf16>, vector<64x512xbf16>, vector<64x512xf32> -> vector<64x512xf32>
    %c0_4 = arith.constant 0 : index
    %c0_5 = arith.constant 0 : index
    %11 = vector.load %arg5[%c0_4, %c0_5] : memref<1x512xf32, #tpu.memory_space<vmem>>, vector<1x512xf32>
    %12 = vector.broadcast %11 : vector<1x512xf32> to vector<64x512xf32>
    %13 = arith.addf %10, %12 : vector<64x512xf32>
    %14 = vector.shape_cast %13 : vector<64x512xf32> to vector<8x8x512xf32>
    %c0_6 = arith.constant 0 : index
    %c0_7 = arith.constant 0 : index
    %c0_8 = arith.constant 0 : index
    %15 = vector.load %arg12[%c0_6, %c0_7, %c0_8] : memref<8x8x512xf32, #tpu.memory_space<vmem>>, vector<8x8x512xf32>
    tpu.vector_store %arg12[%c0_6, %c0_7, %c0_8], %14 {strides = array<i32>} : memref<8x8x512xf32, #tpu.memory_space<vmem>>, vector<8x8x512xf32>,
    %c0_9 = arith.constant 0 : index
    %c0_10 = arith.constant 0 : index
    %c0_11 = arith.constant 0 : index
    %16 = vector.load %arg2[%c0_9, %c0_10, %c0_11] : memref<8x8x64xf32, #tpu.memory_space<vmem>>, vector<8x8x64xf32>
    %17 = vector.shape_cast %16 : vector<8x8x64xf32> to vector<64x64xf32>
    %18 = arith.truncf %17 : vector<64x64xf32> to vector<64x64xbf16>
    %c0_12 = arith.constant 0 : index
    %c0_13 = arith.constant 0 : index
    %19 = vector.load %arg6[%c0_12, %c0_13] : memref<64x512xbf16, #tpu.memory_space<vmem>>, vector<64x512xbf16>
    %cst_14 = arith.constant dense<0.000000e+00> : vector<64x512xf32>
    %20 = tpu.matmul %18, %19, %cst_14 {dimension_numbers = #tpu.dot_dimension_numbers<[1], [0], [0], [1], [0, 0, 1, 1], [], []>} : vector<64x64xbf16>, vector<64x512xbf16>, vector<64x512xf32> -> vector<64x512xf32>
    %c0_15 = arith.constant 0 : index
    %c0_16 = arith.constant 0 : index
    %21 = vector.load %arg8[%c0_15, %c0_16] : memref<1x512xf32, #tpu.memory_space<vmem>>, vector<1x512xf32>
    %22 = vector.broadcast %21 : vector<1x512xf32> to vector<64x512xf32>
    %23 = arith.addf %20, %22 : vector<64x512xf32>
    %24 = vector.shape_cast %23 : vector<64x512xf32> to vector<8x8x512xf32>
    %c0_17 = arith.constant 0 : index
    %c0_18 = arith.constant 0 : index
    %c0_19 = arith.constant 0 : index
    %25 = vector.load %arg13[%c0_17, %c0_18, %c0_19] : memref<8x8x512xf32, #tpu.memory_space<vmem>>, vector<8x8x512xf32>
    tpu.vector_store %arg13[%c0_17, %c0_18, %c0_19], %24 {strides = array<i32>} : memref<8x8x512xf32, #tpu.memory_space<vmem>>, vector<8x8x512xf32>,
    %c0_i32_20 = arith.constant 0 : i32
    %26 = tpu.memref_slice %arg18[%c0_i32_20] : memref<3x!tpu.dma_semaphore, #tpu.memory_space<semaphore_mem>> -> memref<1x!tpu.dma_semaphore, #tpu.memory_space<semaphore_mem>>
    %27 = tpu.memref_squeeze %26 : memref<1x!tpu.dma_semaphore, #tpu.memory_space<semaphore_mem>> -> memref<!tpu.dma_semaphore, #tpu.memory_space<semaphore_mem>>
    tpu.wait_dma2 semaphore(%27 : memref<!tpu.dma_semaphore, #tpu.memory_space<semaphore_mem>>) src(%arg4 : memref<128x512xbf16, #tpu.memory_space<any>>) dst(%arg15 : memref<128x512xbf16, #tpu.memory_space<vmem>>)
    %cst_21 = arith.constant 0.000000e+00 : f32
    %28 = vector.broadcast %cst_21 : f32 to vector<8x128xf32>
    %cst_22 = arith.constant 0.000000e+00 : f32
    %29 = vector.broadcast %cst_22 : f32 to vector<8x128xf32>
    %30 = arith.truncf %28 : vector<8x128xf32> to vector<8x128xbf16>
    %c0_i32_23 = arith.constant 0 : i32
    %31 = arith.index_cast %c0_i32_23 : i32 to index
    %c0_24 = arith.constant 0 : index
    %c0_25 = arith.constant 0 : index
    %32 = vector.load %arg12[%31, %c0_24, %c0_25] : memref<8x8x512xf32, #tpu.memory_space<vmem>>, vector<1x8x512xf32>
    %33 = vector.shape_cast %32 : vector<1x8x512xf32> to vector<8x512xf32>
    %c0_26 = arith.constant 0 : index
    %c0_27 = arith.constant 0 : index
    %34 = vector.load %arg15[%c0_26, %c0_27] : memref<128x512xbf16, #tpu.memory_space<vmem>>, vector<128x512xbf16>
    %cst_28 = arith.constant dense<0.000000e+00> : vector<8x512xf32>
    %35 = tpu.matmul %30, %34, %cst_28 {dimension_numbers = #tpu.dot_dimension_numbers<[1], [0], [0], [1], [0, 0, 1, 1], [], []>} : vector<8x128xbf16>, vector<128x512xbf16>, vector<8x512xf32> -> vector<8x512xf32>
    %36 = arith.addf %33, %35 : vector<8x512xf32>
    %37 = vector.extract_strided_slice %36 {offsets = [0, 0], sizes = [8, 128], strides = [1, 1]} : vector<8x512xf32> to vector<8x128xf32>
    %38 = arith.negf %37 : vector<8x128xf32>
    %39 = math.exp %38 : vector<8x128xf32>
    %cst_29 = arith.constant 1.000000e+00 : f32
    %40 = vector.broadcast %cst_29 : f32 to vector<8x128xf32>
    %41 = arith.addf %40, %39 : vector<8x128xf32>
    %42 = arith.divf %40, %41 : vector<8x128xf32>
    %43 = vector.extract_strided_slice %36 {offsets = [0, 128], sizes = [8, 128], strides = [1, 1]} : vector<8x512xf32> to vector<8x128xf32>
    %44 = arith.negf %43 : vector<8x128xf32>
    %45 = math.exp %44 : vector<8x128xf32>
    %cst_30 = arith.constant 1.000000e+00 : f32
    %46 = vector.broadcast %cst_30 : f32 to vector<8x128xf32>
    %47 = arith.addf %46, %45 : vector<8x128xf32>
    %48 = arith.divf %46, %47 : vector<8x128xf32>
    %49 = vector.extract_strided_slice %36 {offsets = [0, 256], sizes = [8, 128], strides = [1, 1]} : vector<8x512xf32> to vector<8x128xf32>
    %50 = math.tanh %49 : vector<8x128xf32>
    %51 = vector.extract_strided_slice %36 {offsets = [0, 384], sizes = [8, 128], strides = [1, 1]} : vector<8x512xf32> to vector<8x128xf32>
    %52 = arith.negf %51 : vector<8x128xf32>
    %53 = math.exp %52 : vector<8x128xf32>
    %cst_31 = arith.constant 1.000000e+00 : f32
    %54 = vector.broadcast %cst_31 : f32 to vector<8x128xf32>
    %55 = arith.addf %54, %53 : vector<8x128xf32>
    %56 = arith.divf %54, %55 : vector<8x128xf32>
    %57 = arith.mulf %48, %29 : vector<8x128xf32>
    %58 = arith.mulf %42, %50 : vector<8x128xf32>
    %59 = arith.addf %57, %58 : vector<8x128xf32>
    %60 = math.tanh %59 : vector<8x128xf32>
    %61 = arith.mulf %56, %60 : vector<8x128xf32>
    %62 = arith.truncf %61 : vector<8x128xf32> to vector<8x128xbf16>
    %c1_i32_32 = arith.constant 1 : i32
    %63 = arith.index_cast %c1_i32_32 : i32 to index
    %c0_33 = arith.constant 0 : index
    %c0_34 = arith.constant 0 : index
    %64 = vector.load %arg12[%63, %c0_33, %c0_34] : memref<8x8x512xf32, #tpu.memory_space<vmem>>, vector<1x8x512xf32>
    %65 = vector.shape_cast %64 : vector<1x8x512xf32> to vector<8x512xf32>
    %c0_35 = arith.constant 0 : index
    %c0_36 = arith.constant 0 : index
    %66 = vector.load %arg15[%c0_35, %c0_36] : memref<128x512xbf16, #tpu.memory_space<vmem>>, vector<128x512xbf16>
    %cst_37 = arith.constant dense<0.000000e+00> : vector<8x512xf32>
    %67 = tpu.matmul %62, %66, %cst_37 {dimension_numbers = #tpu.dot_dimension_numbers<[1], [0], [0], [1], [0, 0, 1, 1], [], []>} : vector<8x128xbf16>, vector<128x512xbf16>, vector<8x512xf32> -> vector<8x512xf32>
    %68 = arith.addf %65, %67 : vector<8x512xf32>
    %69 = vector.extract_strided_slice %68 {offsets = [0, 0], sizes = [8, 128], strides = [1, 1]} : vector<8x512xf32> to vector<8x128xf32>
    %70 = arith.negf %69 : vector<8x128xf32>
    %71 = math.exp %70 : vector<8x128xf32>
    %cst_38 = arith.constant 1.000000e+00 : f32
    %72 = vector.broadcast %cst_38 : f32 to vector<8x128xf32>
    %73 = arith.addf %72, %71 : vector<8x128xf32>
    %74 = arith.divf %72, %73 : vector<8x128xf32>
    %75 = vector.extract_strided_slice %68 {offsets = [0, 128], sizes = [8, 128], strides = [1, 1]} : vector<8x512xf32> to vector<8x128xf32>
    %76 = arith.negf %75 : vector<8x128xf32>
    %77 = math.exp %76 : vector<8x128xf32>
    %cst_39 = arith.constant 1.000000e+00 : f32
    %78 = vector.broadcast %cst_39 : f32 to vector<8x128xf32>
    %79 = arith.addf %78, %77 : vector<8x128xf32>
    %80 = arith.divf %78, %79 : vector<8x128xf32>
    %81 = vector.extract_strided_slice %68 {offsets = [0, 256], sizes = [8, 128], strides = [1, 1]} : vector<8x512xf32> to vector<8x128xf32>
    %82 = math.tanh %81 : vector<8x128xf32>
    %83 = vector.extract_strided_slice %68 {offsets = [0, 384], sizes = [8, 128], strides = [1, 1]} : vector<8x512xf32> to vector<8x128xf32>
    %84 = arith.negf %83 : vector<8x128xf32>
    %85 = math.exp %84 : vector<8x128xf32>
    %cst_40 = arith.constant 1.000000e+00 : f32
    %86 = vector.broadcast %cst_40 : f32 to vector<8x128xf32>
    %87 = arith.addf %86, %85 : vector<8x128xf32>
    %88 = arith.divf %86, %87 : vector<8x128xf32>
    %89 = arith.mulf %80, %59 : vector<8x128xf32>
    %90 = arith.mulf %74, %82 : vector<8x128xf32>
    %91 = arith.addf %89, %90 : vector<8x128xf32>
    %92 = math.tanh %91 : vector<8x128xf32>
    %93 = arith.mulf %88, %92 : vector<8x128xf32>
    %94 = arith.truncf %93 : vector<8x128xf32> to vector<8x128xbf16>
    %c2_i32_41 = arith.constant 2 : i32
    %95 = arith.index_cast %c2_i32_41 : i32 to index
    %c0_42 = arith.constant 0 : index
    %c0_43 = arith.constant 0 : index
    %96 = vector.load %arg12[%95, %c0_42, %c0_43] : memref<8x8x512xf32, #tpu.memory_space<vmem>>, vector<1x8x512xf32>
    %97 = vector.shape_cast %96 : vector<1x8x512xf32> to vector<8x512xf32>
    %c0_44 = arith.constant 0 : index
    %c0_45 = arith.constant 0 : index
    %98 = vector.load %arg15[%c0_44, %c0_45] : memref<128x512xbf16, #tpu.memory_space<vmem>>, vector<128x512xbf16>
    %cst_46 = arith.constant dense<0.000000e+00> : vector<8x512xf32>
    %99 = tpu.matmul %94, %98, %cst_46 {dimension_numbers = #tpu.dot_dimension_numbers<[1], [0], [0], [1], [0, 0, 1, 1], [], []>} : vector<8x128xbf16>, vector<128x512xbf16>, vector<8x512xf32> -> vector<8x512xf32>
    %100 = arith.addf %97, %99 : vector<8x512xf32>
    %101 = vector.extract_strided_slice %100 {offsets = [0, 0], sizes = [8, 128], strides = [1, 1]} : vector<8x512xf32> to vector<8x128xf32>
    %102 = arith.negf %101 : vector<8x128xf32>
    %103 = math.exp %102 : vector<8x128xf32>
    %cst_47 = arith.constant 1.000000e+00 : f32
    %104 = vector.broadcast %cst_47 : f32 to vector<8x128xf32>
    %105 = arith.addf %104, %103 : vector<8x128xf32>
    %106 = arith.divf %104, %105 : vector<8x128xf32>
    %107 = vector.extract_strided_slice %100 {offsets = [0, 128], sizes = [8, 128], strides = [1, 1]} : vector<8x512xf32> to vector<8x128xf32>
    %108 = arith.negf %107 : vector<8x128xf32>
    %109 = math.exp %108 : vector<8x128xf32>
    %cst_48 = arith.constant 1.000000e+00 : f32
    %110 = vector.broadcast %cst_48 : f32 to vector<8x128xf32>
    %111 = arith.addf %110, %109 : vector<8x128xf32>
    %112 = arith.divf %110, %111 : vector<8x128xf32>
    %113 = vector.extract_strided_slice %100 {offsets = [0, 256], sizes = [8, 128], strides = [1, 1]} : vector<8x512xf32> to vector<8x128xf32>
    %114 = math.tanh %113 : vector<8x128xf32>
    %115 = vector.extract_strided_slice %100 {offsets = [0, 384], sizes = [8, 128], strides = [1, 1]} : vector<8x512xf32> to vector<8x128xf32>
    %116 = arith.negf %115 : vector<8x128xf32>
    %117 = math.exp %116 : vector<8x128xf32>
    %cst_49 = arith.constant 1.000000e+00 : f32
    %118 = vector.broadcast %cst_49 : f32 to vector<8x128xf32>
    %119 = arith.addf %118, %117 : vector<8x128xf32>
    %120 = arith.divf %118, %119 : vector<8x128xf32>
    %121 = arith.mulf %112, %91 : vector<8x128xf32>
    %122 = arith.mulf %106, %114 : vector<8x128xf32>
    %123 = arith.addf %121, %122 : vector<8x128xf32>
    %124 = math.tanh %123 : vector<8x128xf32>
    %125 = arith.mulf %120, %124 : vector<8x128xf32>
    %126 = arith.truncf %125 : vector<8x128xf32> to vector<8x128xbf16>
    %c3_i32 = arith.constant 3 : i32
    %127 = arith.index_cast %c3_i32 : i32 to index
    %c0_50 = arith.constant 0 : index
    %c0_51 = arith.constant 0 : index
    %128 = vector.load %arg12[%127, %c0_50, %c0_51] : memref<8x8x512xf32, #tpu.memory_space<vmem>>, vector<1x8x512xf32>
    %129 = vector.shape_cast %128 : vector<1x8x512xf32> to vector<8x512xf32>
    %c0_52 = arith.constant 0 : index
    %c0_53 = arith.constant 0 : index
    %130 = vector.load %arg15[%c0_52, %c0_53] : memref<128x512xbf16, #tpu.memory_space<vmem>>, vector<128x512xbf16>
    %cst_54 = arith.constant dense<0.000000e+00> : vector<8x512xf32>
    %131 = tpu.matmul %126, %130, %cst_54 {dimension_numbers = #tpu.dot_dimension_numbers<[1], [0], [0], [1], [0, 0, 1, 1], [], []>} : vector<8x128xbf16>, vector<128x512xbf16>, vector<8x512xf32> -> vector<8x512xf32>
    %132 = arith.addf %129, %131 : vector<8x512xf32>
    %133 = vector.extract_strided_slice %132 {offsets = [0, 0], sizes = [8, 128], strides = [1, 1]} : vector<8x512xf32> to vector<8x128xf32>
    %134 = arith.negf %133 : vector<8x128xf32>
    %135 = math.exp %134 : vector<8x128xf32>
    %cst_55 = arith.constant 1.000000e+00 : f32
    %136 = vector.broadcast %cst_55 : f32 to vector<8x128xf32>
    %137 = arith.addf %136, %135 : vector<8x128xf32>
    %138 = arith.divf %136, %137 : vector<8x128xf32>
    %139 = vector.extract_strided_slice %132 {offsets = [0, 128], sizes = [8, 128], strides = [1, 1]} : vector<8x512xf32> to vector<8x128xf32>
    %140 = arith.negf %139 : vector<8x128xf32>
    %141 = math.exp %140 : vector<8x128xf32>
    %cst_56 = arith.constant 1.000000e+00 : f32
    %142 = vector.broadcast %cst_56 : f32 to vector<8x128xf32>
    %143 = arith.addf %142, %141 : vector<8x128xf32>
    %144 = arith.divf %142, %143 : vector<8x128xf32>
    %145 = vector.extract_strided_slice %132 {offsets = [0, 256], sizes = [8, 128], strides = [1, 1]} : vector<8x512xf32> to vector<8x128xf32>
    %146 = math.tanh %145 : vector<8x128xf32>
    %147 = vector.extract_strided_slice %132 {offsets = [0, 384], sizes = [8, 128], strides = [1, 1]} : vector<8x512xf32> to vector<8x128xf32>
    %148 = arith.negf %147 : vector<8x128xf32>
    %149 = math.exp %148 : vector<8x128xf32>
    %cst_57 = arith.constant 1.000000e+00 : f32
    %150 = vector.broadcast %cst_57 : f32 to vector<8x128xf32>
    %151 = arith.addf %150, %149 : vector<8x128xf32>
    %152 = arith.divf %150, %151 : vector<8x128xf32>
    %153 = arith.mulf %144, %123 : vector<8x128xf32>
    %154 = arith.mulf %138, %146 : vector<8x128xf32>
    %155 = arith.addf %153, %154 : vector<8x128xf32>
    %156 = math.tanh %155 : vector<8x128xf32>
    %157 = arith.mulf %152, %156 : vector<8x128xf32>
    %158 = arith.truncf %157 : vector<8x128xf32> to vector<8x128xbf16>
    %c4_i32 = arith.constant 4 : i32
    %159 = arith.index_cast %c4_i32 : i32 to index
    %c0_58 = arith.constant 0 : index
    %c0_59 = arith.constant 0 : index
    %160 = vector.load %arg12[%159, %c0_58, %c0_59] : memref<8x8x512xf32, #tpu.memory_space<vmem>>, vector<1x8x512xf32>
    %161 = vector.shape_cast %160 : vector<1x8x512xf32> to vector<8x512xf32>
    %c0_60 = arith.constant 0 : index
    %c0_61 = arith.constant 0 : index
    %162 = vector.load %arg15[%c0_60, %c0_61] : memref<128x512xbf16, #tpu.memory_space<vmem>>, vector<128x512xbf16>
    %cst_62 = arith.constant dense<0.000000e+00> : vector<8x512xf32>
    %163 = tpu.matmul %158, %162, %cst_62 {dimension_numbers = #tpu.dot_dimension_numbers<[1], [0], [0], [1], [0, 0, 1, 1], [], []>} : vector<8x128xbf16>, vector<128x512xbf16>, vector<8x512xf32> -> vector<8x512xf32>
    %164 = arith.addf %161, %163 : vector<8x512xf32>
    %165 = vector.extract_strided_slice %164 {offsets = [0, 0], sizes = [8, 128], strides = [1, 1]} : vector<8x512xf32> to vector<8x128xf32>
    %166 = arith.negf %165 : vector<8x128xf32>
    %167 = math.exp %166 : vector<8x128xf32>
    %cst_63 = arith.constant 1.000000e+00 : f32
    %168 = vector.broadcast %cst_63 : f32 to vector<8x128xf32>
    %169 = arith.addf %168, %167 : vector<8x128xf32>
    %170 = arith.divf %168, %169 : vector<8x128xf32>
    %171 = vector.extract_strided_slice %164 {offsets = [0, 128], sizes = [8, 128], strides = [1, 1]} : vector<8x512xf32> to vector<8x128xf32>
    %172 = arith.negf %171 : vector<8x128xf32>
    %173 = math.exp %172 : vector<8x128xf32>
    %cst_64 = arith.constant 1.000000e+00 : f32
    %174 = vector.broadcast %cst_64 : f32 to vector<8x128xf32>
    %175 = arith.addf %174, %173 : vector<8x128xf32>
    %176 = arith.divf %174, %175 : vector<8x128xf32>
    %177 = vector.extract_strided_slice %164 {offsets = [0, 256], sizes = [8, 128], strides = [1, 1]} : vector<8x512xf32> to vector<8x128xf32>
    %178 = math.tanh %177 : vector<8x128xf32>
    %179 = vector.extract_strided_slice %164 {offsets = [0, 384], sizes = [8, 128], strides = [1, 1]} : vector<8x512xf32> to vector<8x128xf32>
    %180 = arith.negf %179 : vector<8x128xf32>
    %181 = math.exp %180 : vector<8x128xf32>
    %cst_65 = arith.constant 1.000000e+00 : f32
    %182 = vector.broadcast %cst_65 : f32 to vector<8x128xf32>
    %183 = arith.addf %182, %181 : vector<8x128xf32>
    %184 = arith.divf %182, %183 : vector<8x128xf32>
    %185 = arith.mulf %176, %155 : vector<8x128xf32>
    %186 = arith.mulf %170, %178 : vector<8x128xf32>
    %187 = arith.addf %185, %186 : vector<8x128xf32>
    %188 = math.tanh %187 : vector<8x128xf32>
    %189 = arith.mulf %184, %188 : vector<8x128xf32>
    %190 = arith.truncf %189 : vector<8x128xf32> to vector<8x128xbf16>
    %c5_i32 = arith.constant 5 : i32
    %191 = arith.index_cast %c5_i32 : i32 to index
    %c0_66 = arith.constant 0 : index
    %c0_67 = arith.constant 0 : index
    %192 = vector.load %arg12[%191, %c0_66, %c0_67] : memref<8x8x512xf32, #tpu.memory_space<vmem>>, vector<1x8x512xf32>
    %193 = vector.shape_cast %192 : vector<1x8x512xf32> to vector<8x512xf32>
    %c0_68 = arith.constant 0 : index
    %c0_69 = arith.constant 0 : index
    %194 = vector.load %arg15[%c0_68, %c0_69] : memref<128x512xbf16, #tpu.memory_space<vmem>>, vector<128x512xbf16>
    %cst_70 = arith.constant dense<0.000000e+00> : vector<8x512xf32>
    %195 = tpu.matmul %190, %194, %cst_70 {dimension_numbers = #tpu.dot_dimension_numbers<[1], [0], [0], [1], [0, 0, 1, 1], [], []>} : vector<8x128xbf16>, vector<128x512xbf16>, vector<8x512xf32> -> vector<8x512xf32>
    %196 = arith.addf %193, %195 : vector<8x512xf32>
    %197 = vector.extract_strided_slice %196 {offsets = [0, 0], sizes = [8, 128], strides = [1, 1]} : vector<8x512xf32> to vector<8x128xf32>
    %198 = arith.negf %197 : vector<8x128xf32>
    %199 = math.exp %198 : vector<8x128xf32>
    %cst_71 = arith.constant 1.000000e+00 : f32
    %200 = vector.broadcast %cst_71 : f32 to vector<8x128xf32>
    %201 = arith.addf %200, %199 : vector<8x128xf32>
    %202 = arith.divf %200, %201 : vector<8x128xf32>
    %203 = vector.extract_strided_slice %196 {offsets = [0, 128], sizes = [8, 128], strides = [1, 1]} : vector<8x512xf32> to vector<8x128xf32>
    %204 = arith.negf %203 : vector<8x128xf32>
    %205 = math.exp %204 : vector<8x128xf32>
    %cst_72 = arith.constant 1.000000e+00 : f32
    %206 = vector.broadcast %cst_72 : f32 to vector<8x128xf32>
    %207 = arith.addf %206, %205 : vector<8x128xf32>
    %208 = arith.divf %206, %207 : vector<8x128xf32>
    %209 = vector.extract_strided_slice %196 {offsets = [0, 256], sizes = [8, 128], strides = [1, 1]} : vector<8x512xf32> to vector<8x128xf32>
    %210 = math.tanh %209 : vector<8x128xf32>
    %211 = vector.extract_strided_slice %196 {offsets = [0, 384], sizes = [8, 128], strides = [1, 1]} : vector<8x512xf32> to vector<8x128xf32>
    %212 = arith.negf %211 : vector<8x128xf32>
    %213 = math.exp %212 : vector<8x128xf32>
    %cst_73 = arith.constant 1.000000e+00 : f32
    %214 = vector.broadcast %cst_73 : f32 to vector<8x128xf32>
    %215 = arith.addf %214, %213 : vector<8x128xf32>
    %216 = arith.divf %214, %215 : vector<8x128xf32>
    %217 = arith.mulf %208, %187 : vector<8x128xf32>
    %218 = arith.mulf %202, %210 : vector<8x128xf32>
    %219 = arith.addf %217, %218 : vector<8x128xf32>
    %220 = math.tanh %219 : vector<8x128xf32>
    %221 = arith.mulf %216, %220 : vector<8x128xf32>
    %222 = arith.truncf %221 : vector<8x128xf32> to vector<8x128xbf16>
    %c6_i32 = arith.constant 6 : i32
    %223 = arith.index_cast %c6_i32 : i32 to index
    %c0_74 = arith.constant 0 : index
    %c0_75 = arith.constant 0 : index
    %224 = vector.load %arg12[%223, %c0_74, %c0_75] : memref<8x8x512xf32, #tpu.memory_space<vmem>>, vector<1x8x512xf32>
    %225 = vector.shape_cast %224 : vector<1x8x512xf32> to vector<8x512xf32>
    %c0_76 = arith.constant 0 : index
    %c0_77 = arith.constant 0 : index
    %226 = vector.load %arg15[%c0_76, %c0_77] : memref<128x512xbf16, #tpu.memory_space<vmem>>, vector<128x512xbf16>
    %cst_78 = arith.constant dense<0.000000e+00> : vector<8x512xf32>
    %227 = tpu.matmul %222, %226, %cst_78 {dimension_numbers = #tpu.dot_dimension_numbers<[1], [0], [0], [1], [0, 0, 1, 1], [], []>} : vector<8x128xbf16>, vector<128x512xbf16>, vector<8x512xf32> -> vector<8x512xf32>
    %228 = arith.addf %225, %227 : vector<8x512xf32>
    %229 = vector.extract_strided_slice %228 {offsets = [0, 0], sizes = [8, 128], strides = [1, 1]} : vector<8x512xf32> to vector<8x128xf32>
    %230 = arith.negf %229 : vector<8x128xf32>
    %231 = math.exp %230 : vector<8x128xf32>
    %cst_79 = arith.constant 1.000000e+00 : f32
    %232 = vector.broadcast %cst_79 : f32 to vector<8x128xf32>
    %233 = arith.addf %232, %231 : vector<8x128xf32>
    %234 = arith.divf %232, %233 : vector<8x128xf32>
    %235 = vector.extract_strided_slice %228 {offsets = [0, 128], sizes = [8, 128], strides = [1, 1]} : vector<8x512xf32> to vector<8x128xf32>
    %236 = arith.negf %235 : vector<8x128xf32>
    %237 = math.exp %236 : vector<8x128xf32>
    %cst_80 = arith.constant 1.000000e+00 : f32
    %238 = vector.broadcast %cst_80 : f32 to vector<8x128xf32>
    %239 = arith.addf %238, %237 : vector<8x128xf32>
    %240 = arith.divf %238, %239 : vector<8x128xf32>
    %241 = vector.extract_strided_slice %228 {offsets = [0, 256], sizes = [8, 128], strides = [1, 1]} : vector<8x512xf32> to vector<8x128xf32>
    %242 = math.tanh %241 : vector<8x128xf32>
    %243 = vector.extract_strided_slice %228 {offsets = [0, 384], sizes = [8, 128], strides = [1, 1]} : vector<8x512xf32> to vector<8x128xf32>
    %244 = arith.negf %243 : vector<8x128xf32>
    %245 = math.exp %244 : vector<8x128xf32>
    %cst_81 = arith.constant 1.000000e+00 : f32
    %246 = vector.broadcast %cst_81 : f32 to vector<8x128xf32>
    %247 = arith.addf %246, %245 : vector<8x128xf32>
    %248 = arith.divf %246, %247 : vector<8x128xf32>
    %249 = arith.mulf %240, %219 : vector<8x128xf32>
    %250 = arith.mulf %234, %242 : vector<8x128xf32>
    %251 = arith.addf %249, %250 : vector<8x128xf32>
    %252 = math.tanh %251 : vector<8x128xf32>
    %253 = arith.mulf %248, %252 : vector<8x128xf32>
    %254 = arith.truncf %253 : vector<8x128xf32> to vector<8x128xbf16>
    %c7_i32 = arith.constant 7 : i32
    %255 = arith.index_cast %c7_i32 : i32 to index
    %c0_82 = arith.constant 0 : index
    %c0_83 = arith.constant 0 : index
    %256 = vector.load %arg12[%255, %c0_82, %c0_83] : memref<8x8x512xf32, #tpu.memory_space<vmem>>, vector<1x8x512xf32>
    %257 = vector.shape_cast %256 : vector<1x8x512xf32> to vector<8x512xf32>
    %c0_84 = arith.constant 0 : index
    %c0_85 = arith.constant 0 : index
    %258 = vector.load %arg15[%c0_84, %c0_85] : memref<128x512xbf16, #tpu.memory_space<vmem>>, vector<128x512xbf16>
    %cst_86 = arith.constant dense<0.000000e+00> : vector<8x512xf32>
    %259 = tpu.matmul %254, %258, %cst_86 {dimension_numbers = #tpu.dot_dimension_numbers<[1], [0], [0], [1], [0, 0, 1, 1], [], []>} : vector<8x128xbf16>, vector<128x512xbf16>, vector<8x512xf32> -> vector<8x512xf32>
    %260 = arith.addf %257, %259 : vector<8x512xf32>
    %261 = vector.extract_strided_slice %260 {offsets = [0, 0], sizes = [8, 128], strides = [1, 1]} : vector<8x512xf32> to vector<8x128xf32>
    %262 = arith.negf %261 : vector<8x128xf32>
    %263 = math.exp %262 : vector<8x128xf32>
    %cst_87 = arith.constant 1.000000e+00 : f32
    %264 = vector.broadcast %cst_87 : f32 to vector<8x128xf32>
    %265 = arith.addf %264, %263 : vector<8x128xf32>
    %266 = arith.divf %264, %265 : vector<8x128xf32>
    %267 = vector.extract_strided_slice %260 {offsets = [0, 128], sizes = [8, 128], strides = [1, 1]} : vector<8x512xf32> to vector<8x128xf32>
    %268 = arith.negf %267 : vector<8x128xf32>
    %269 = math.exp %268 : vector<8x128xf32>
    %cst_88 = arith.constant 1.000000e+00 : f32
    %270 = vector.broadcast %cst_88 : f32 to vector<8x128xf32>
    %271 = arith.addf %270, %269 : vector<8x128xf32>
    %272 = arith.divf %270, %271 : vector<8x128xf32>
    %273 = vector.extract_strided_slice %260 {offsets = [0, 256], sizes = [8, 128], strides = [1, 1]} : vector<8x512xf32> to vector<8x128xf32>
    %274 = math.tanh %273 : vector<8x128xf32>
    %275 = vector.extract_strided_slice %260 {offsets = [0, 384], sizes = [8, 128], strides = [1, 1]} : vector<8x512xf32> to vector<8x128xf32>
    %276 = arith.negf %275 : vector<8x128xf32>
    %277 = math.exp %276 : vector<8x128xf32>
    %cst_89 = arith.constant 1.000000e+00 : f32
    %278 = vector.broadcast %cst_89 : f32 to vector<8x128xf32>
    %279 = arith.addf %278, %277 : vector<8x128xf32>
    %280 = arith.divf %278, %279 : vector<8x128xf32>
    %281 = arith.mulf %272, %251 : vector<8x128xf32>
    %282 = arith.mulf %266, %274 : vector<8x128xf32>
    %283 = arith.addf %281, %282 : vector<8x128xf32>
    %284 = math.tanh %283 : vector<8x128xf32>
    %285 = arith.mulf %280, %284 : vector<8x128xf32>
    %286 = arith.truncf %285 : vector<8x128xf32> to vector<8x128xbf16>
    %c8_i32 = arith.constant 8 : i32
    %c1_i32_90 = arith.constant 1 : i32
    %287 = tpu.memref_slice %arg18[%c1_i32_90] : memref<3x!tpu.dma_semaphore, #tpu.memory_space<semaphore_mem>> -> memref<1x!tpu.dma_semaphore, #tpu.memory_space<semaphore_mem>>
    %288 = tpu.memref_squeeze %287 : memref<1x!tpu.dma_semaphore, #tpu.memory_space<semaphore_mem>> -> memref<!tpu.dma_semaphore, #tpu.memory_space<semaphore_mem>>
    tpu.wait_dma2 semaphore(%288 : memref<!tpu.dma_semaphore, #tpu.memory_space<semaphore_mem>>) src(%arg7 : memref<128x512xbf16, #tpu.memory_space<any>>) dst(%arg16 : memref<128x512xbf16, #tpu.memory_space<vmem>>)
    %c0_i32_91 = arith.constant 0 : i32
    %289 = arith.index_cast %c0_i32_91 : i32 to index
    %c0_92 = arith.constant 0 : index
    %c0_93 = arith.constant 0 : index
    %290 = vector.load %arg13[%289, %c0_92, %c0_93] : memref<8x8x512xf32, #tpu.memory_space<vmem>>, vector<1x8x512xf32>
    %291 = vector.shape_cast %290 : vector<1x8x512xf32> to vector<8x512xf32>
    %c0_94 = arith.constant 0 : index
    %c0_95 = arith.constant 0 : index
    %292 = vector.load %arg16[%c0_94, %c0_95] : memref<128x512xbf16, #tpu.memory_space<vmem>>, vector<128x512xbf16>
    %cst_96 = arith.constant dense<0.000000e+00> : vector<8x512xf32>
    %293 = tpu.matmul %286, %292, %cst_96 {dimension_numbers = #tpu.dot_dimension_numbers<[1], [0], [0], [1], [0, 0, 1, 1], [], []>} : vector<8x128xbf16>, vector<128x512xbf16>, vector<8x512xf32> -> vector<8x512xf32>
    %294 = arith.addf %291, %293 : vector<8x512xf32>
    %295 = vector.extract_strided_slice %294 {offsets = [0, 0], sizes = [8, 128], strides = [1, 1]} : vector<8x512xf32> to vector<8x128xf32>
    %296 = arith.negf %295 : vector<8x128xf32>
    %297 = math.exp %296 : vector<8x128xf32>
    %cst_97 = arith.constant 1.000000e+00 : f32
    %298 = vector.broadcast %cst_97 : f32 to vector<8x128xf32>
    %299 = arith.addf %298, %297 : vector<8x128xf32>
    %300 = arith.divf %298, %299 : vector<8x128xf32>
    %301 = vector.extract_strided_slice %294 {offsets = [0, 128], sizes = [8, 128], strides = [1, 1]} : vector<8x512xf32> to vector<8x128xf32>
    %302 = arith.negf %301 : vector<8x128xf32>
    %303 = math.exp %302 : vector<8x128xf32>
    %cst_98 = arith.constant 1.000000e+00 : f32
    %304 = vector.broadcast %cst_98 : f32 to vector<8x128xf32>
    %305 = arith.addf %304, %303 : vector<8x128xf32>
    %306 = arith.divf %304, %305 : vector<8x128xf32>
    %307 = vector.extract_strided_slice %294 {offsets = [0, 256], sizes = [8, 128], strides = [1, 1]} : vector<8x512xf32> to vector<8x128xf32>
    %308 = math.tanh %307 : vector<8x128xf32>
    %309 = vector.extract_strided_slice %294 {offsets = [0, 384], sizes = [8, 128], strides = [1, 1]} : vector<8x512xf32> to vector<8x128xf32>
    %310 = arith.negf %309 : vector<8x128xf32>
    %311 = math.exp %310 : vector<8x128xf32>
    %cst_99 = arith.constant 1.000000e+00 : f32
    %312 = vector.broadcast %cst_99 : f32 to vector<8x128xf32>
    %313 = arith.addf %312, %311 : vector<8x128xf32>
    %314 = arith.divf %312, %313 : vector<8x128xf32>
    %315 = arith.mulf %306, %283 : vector<8x128xf32>
    %316 = arith.mulf %300, %308 : vector<8x128xf32>
    %317 = arith.addf %315, %316 : vector<8x128xf32>
    %318 = math.tanh %317 : vector<8x128xf32>
    %319 = arith.mulf %314, %318 : vector<8x128xf32>
    %320 = arith.index_cast %c0_i32_91 : i32 to index
    %c0_100 = arith.constant 0 : index
    %c0_101 = arith.constant 0 : index
    %321 = vector.load %arg14[%320, %c0_100, %c0_101] : memref<8x8x128xf32, #tpu.memory_space<vmem>>, vector<1x8x128xf32>
    %322 = vector.shape_cast %321 : vector<1x8x128xf32> to vector<8x128xf32>
    %323 = vector.shape_cast %319 : vector<8x128xf32> to vector<1x8x128xf32>
    tpu.vector_store %arg14[%320, %c0_100, %c0_101], %323 {strides = array<i32>} : memref<8x8x128xf32, #tpu.memory_space<vmem>>, vector<1x8x128xf32>,
    %324 = arith.truncf %319 : vector<8x128xf32> to vector<8x128xbf16>
    %c1_i32_102 = arith.constant 1 : i32
    %325 = arith.index_cast %c1_i32_102 : i32 to index
    %c0_103 = arith.constant 0 : index
    %c0_104 = arith.constant 0 : index
    %326 = vector.load %arg13[%325, %c0_103, %c0_104] : memref<8x8x512xf32, #tpu.memory_space<vmem>>, vector<1x8x512xf32>
    %327 = vector.shape_cast %326 : vector<1x8x512xf32> to vector<8x512xf32>
    %c0_105 = arith.constant 0 : index
    %c0_106 = arith.constant 0 : index
    %328 = vector.load %arg16[%c0_105, %c0_106] : memref<128x512xbf16, #tpu.memory_space<vmem>>, vector<128x512xbf16>
    %cst_107 = arith.constant dense<0.000000e+00> : vector<8x512xf32>
    %329 = tpu.matmul %324, %328, %cst_107 {dimension_numbers = #tpu.dot_dimension_numbers<[1], [0], [0], [1], [0, 0, 1, 1], [], []>} : vector<8x128xbf16>, vector<128x512xbf16>, vector<8x512xf32> -> vector<8x512xf32>
    %330 = arith.addf %327, %329 : vector<8x512xf32>
    %331 = vector.extract_strided_slice %330 {offsets = [0, 0], sizes = [8, 128], strides = [1, 1]} : vector<8x512xf32> to vector<8x128xf32>
    %332 = arith.negf %331 : vector<8x128xf32>
    %333 = math.exp %332 : vector<8x128xf32>
    %cst_108 = arith.constant 1.000000e+00 : f32
    %334 = vector.broadcast %cst_108 : f32 to vector<8x128xf32>
    %335 = arith.addf %334, %333 : vector<8x128xf32>
    %336 = arith.divf %334, %335 : vector<8x128xf32>
    %337 = vector.extract_strided_slice %330 {offsets = [0, 128], sizes = [8, 128], strides = [1, 1]} : vector<8x512xf32> to vector<8x128xf32>
    %338 = arith.negf %337 : vector<8x128xf32>
    %339 = math.exp %338 : vector<8x128xf32>
    %cst_109 = arith.constant 1.000000e+00 : f32
    %340 = vector.broadcast %cst_109 : f32 to vector<8x128xf32>
    %341 = arith.addf %340, %339 : vector<8x128xf32>
    %342 = arith.divf %340, %341 : vector<8x128xf32>
    %343 = vector.extract_strided_slice %330 {offsets = [0, 256], sizes = [8, 128], strides = [1, 1]} : vector<8x512xf32> to vector<8x128xf32>
    %344 = math.tanh %343 : vector<8x128xf32>
    %345 = vector.extract_strided_slice %330 {offsets = [0, 384], sizes = [8, 128], strides = [1, 1]} : vector<8x512xf32> to vector<8x128xf32>
    %346 = arith.negf %345 : vector<8x128xf32>
    %347 = math.exp %346 : vector<8x128xf32>
    %cst_110 = arith.constant 1.000000e+00 : f32
    %348 = vector.broadcast %cst_110 : f32 to vector<8x128xf32>
    %349 = arith.addf %348, %347 : vector<8x128xf32>
    %350 = arith.divf %348, %349 : vector<8x128xf32>
    %351 = arith.mulf %342, %317 : vector<8x128xf32>
    %352 = arith.mulf %336, %344 : vector<8x128xf32>
    %353 = arith.addf %351, %352 : vector<8x128xf32>
    %354 = math.tanh %353 : vector<8x128xf32>
    %355 = arith.mulf %350, %354 : vector<8x128xf32>
    %356 = arith.index_cast %c1_i32_102 : i32 to index
    %c0_111 = arith.constant 0 : index
    %c0_112 = arith.constant 0 : index
    %357 = vector.load %arg14[%356, %c0_111, %c0_112] : memref<8x8x128xf32, #tpu.memory_space<vmem>>, vector<1x8x128xf32>
    %358 = vector.shape_cast %357 : vector<1x8x128xf32> to vector<8x128xf32>
    %359 = vector.shape_cast %355 : vector<8x128xf32> to vector<1x8x128xf32>
    tpu.vector_store %arg14[%356, %c0_111, %c0_112], %359 {strides = array<i32>} : memref<8x8x128xf32, #tpu.memory_space<vmem>>, vector<1x8x128xf32>,
    %360 = arith.truncf %355 : vector<8x128xf32> to vector<8x128xbf16>
    %c2_i32_113 = arith.constant 2 : i32
    %361 = arith.index_cast %c2_i32_113 : i32 to index
    %c0_114 = arith.constant 0 : index
    %c0_115 = arith.constant 0 : index
    %362 = vector.load %arg13[%361, %c0_114, %c0_115] : memref<8x8x512xf32, #tpu.memory_space<vmem>>, vector<1x8x512xf32>
    %363 = vector.shape_cast %362 : vector<1x8x512xf32> to vector<8x512xf32>
    %c0_116 = arith.constant 0 : index
    %c0_117 = arith.constant 0 : index
    %364 = vector.load %arg16[%c0_116, %c0_117] : memref<128x512xbf16, #tpu.memory_space<vmem>>, vector<128x512xbf16>
    %cst_118 = arith.constant dense<0.000000e+00> : vector<8x512xf32>
    %365 = tpu.matmul %360, %364, %cst_118 {dimension_numbers = #tpu.dot_dimension_numbers<[1], [0], [0], [1], [0, 0, 1, 1], [], []>} : vector<8x128xbf16>, vector<128x512xbf16>, vector<8x512xf32> -> vector<8x512xf32>
    %366 = arith.addf %363, %365 : vector<8x512xf32>
    %367 = vector.extract_strided_slice %366 {offsets = [0, 0], sizes = [8, 128], strides = [1, 1]} : vector<8x512xf32> to vector<8x128xf32>
    %368 = arith.negf %367 : vector<8x128xf32>
    %369 = math.exp %368 : vector<8x128xf32>
    %cst_119 = arith.constant 1.000000e+00 : f32
    %370 = vector.broadcast %cst_119 : f32 to vector<8x128xf32>
    %371 = arith.addf %370, %369 : vector<8x128xf32>
    %372 = arith.divf %370, %371 : vector<8x128xf32>
    %373 = vector.extract_strided_slice %366 {offsets = [0, 128], sizes = [8, 128], strides = [1, 1]} : vector<8x512xf32> to vector<8x128xf32>
    %374 = arith.negf %373 : vector<8x128xf32>
    %375 = math.exp %374 : vector<8x128xf32>
    %cst_120 = arith.constant 1.000000e+00 : f32
    %376 = vector.broadcast %cst_120 : f32 to vector<8x128xf32>
    %377 = arith.addf %376, %375 : vector<8x128xf32>
    %378 = arith.divf %376, %377 : vector<8x128xf32>
    %379 = vector.extract_strided_slice %366 {offsets = [0, 256], sizes = [8, 128], strides = [1, 1]} : vector<8x512xf32> to vector<8x128xf32>
    %380 = math.tanh %379 : vector<8x128xf32>
    %381 = vector.extract_strided_slice %366 {offsets = [0, 384], sizes = [8, 128], strides = [1, 1]} : vector<8x512xf32> to vector<8x128xf32>
    %382 = arith.negf %381 : vector<8x128xf32>
    %383 = math.exp %382 : vector<8x128xf32>
    %cst_121 = arith.constant 1.000000e+00 : f32
    %384 = vector.broadcast %cst_121 : f32 to vector<8x128xf32>
    %385 = arith.addf %384, %383 : vector<8x128xf32>
    %386 = arith.divf %384, %385 : vector<8x128xf32>
    %387 = arith.mulf %378, %353 : vector<8x128xf32>
    %388 = arith.mulf %372, %380 : vector<8x128xf32>
    %389 = arith.addf %387, %388 : vector<8x128xf32>
    %390 = math.tanh %389 : vector<8x128xf32>
    %391 = arith.mulf %386, %390 : vector<8x128xf32>
    %392 = arith.index_cast %c2_i32_113 : i32 to index
    %c0_122 = arith.constant 0 : index
    %c0_123 = arith.constant 0 : index
    %393 = vector.load %arg14[%392, %c0_122, %c0_123] : memref<8x8x128xf32, #tpu.memory_space<vmem>>, vector<1x8x128xf32>
    %394 = vector.shape_cast %393 : vector<1x8x128xf32> to vector<8x128xf32>
    %395 = vector.shape_cast %391 : vector<8x128xf32> to vector<1x8x128xf32>
    tpu.vector_store %arg14[%392, %c0_122, %c0_123], %395 {strides = array<i32>} : memref<8x8x128xf32, #tpu.memory_space<vmem>>, vector<1x8x128xf32>,
    %396 = arith.truncf %391 : vector<8x128xf32> to vector<8x128xbf16>
    %c3_i32_124 = arith.constant 3 : i32
    %397 = arith.index_cast %c3_i32_124 : i32 to index
    %c0_125 = arith.constant 0 : index
    %c0_126 = arith.constant 0 : index
    %398 = vector.load %arg13[%397, %c0_125, %c0_126] : memref<8x8x512xf32, #tpu.memory_space<vmem>>, vector<1x8x512xf32>
    %399 = vector.shape_cast %398 : vector<1x8x512xf32> to vector<8x512xf32>
    %c0_127 = arith.constant 0 : index
    %c0_128 = arith.constant 0 : index
    %400 = vector.load %arg16[%c0_127, %c0_128] : memref<128x512xbf16, #tpu.memory_space<vmem>>, vector<128x512xbf16>
    %cst_129 = arith.constant dense<0.000000e+00> : vector<8x512xf32>
    %401 = tpu.matmul %396, %400, %cst_129 {dimension_numbers = #tpu.dot_dimension_numbers<[1], [0], [0], [1], [0, 0, 1, 1], [], []>} : vector<8x128xbf16>, vector<128x512xbf16>, vector<8x512xf32> -> vector<8x512xf32>
    %402 = arith.addf %399, %401 : vector<8x512xf32>
    %403 = vector.extract_strided_slice %402 {offsets = [0, 0], sizes = [8, 128], strides = [1, 1]} : vector<8x512xf32> to vector<8x128xf32>
    %404 = arith.negf %403 : vector<8x128xf32>
    %405 = math.exp %404 : vector<8x128xf32>
    %cst_130 = arith.constant 1.000000e+00 : f32
    %406 = vector.broadcast %cst_130 : f32 to vector<8x128xf32>
    %407 = arith.addf %406, %405 : vector<8x128xf32>
    %408 = arith.divf %406, %407 : vector<8x128xf32>
    %409 = vector.extract_strided_slice %402 {offsets = [0, 128], sizes = [8, 128], strides = [1, 1]} : vector<8x512xf32> to vector<8x128xf32>
    %410 = arith.negf %409 : vector<8x128xf32>
    %411 = math.exp %410 : vector<8x128xf32>
    %cst_131 = arith.constant 1.000000e+00 : f32
    %412 = vector.broadcast %cst_131 : f32 to vector<8x128xf32>
    %413 = arith.addf %412, %411 : vector<8x128xf32>
    %414 = arith.divf %412, %413 : vector<8x128xf32>
    %415 = vector.extract_strided_slice %402 {offsets = [0, 256], sizes = [8, 128], strides = [1, 1]} : vector<8x512xf32> to vector<8x128xf32>
    %416 = math.tanh %415 : vector<8x128xf32>
    %417 = vector.extract_strided_slice %402 {offsets = [0, 384], sizes = [8, 128], strides = [1, 1]} : vector<8x512xf32> to vector<8x128xf32>
    %418 = arith.negf %417 : vector<8x128xf32>
    %419 = math.exp %418 : vector<8x128xf32>
    %cst_132 = arith.constant 1.000000e+00 : f32
    %420 = vector.broadcast %cst_132 : f32 to vector<8x128xf32>
    %421 = arith.addf %420, %419 : vector<8x128xf32>
    %422 = arith.divf %420, %421 : vector<8x128xf32>
    %423 = arith.mulf %414, %389 : vector<8x128xf32>
    %424 = arith.mulf %408, %416 : vector<8x128xf32>
    %425 = arith.addf %423, %424 : vector<8x128xf32>
    %426 = math.tanh %425 : vector<8x128xf32>
    %427 = arith.mulf %422, %426 : vector<8x128xf32>
    %428 = arith.index_cast %c3_i32_124 : i32 to index
    %c0_133 = arith.constant 0 : index
    %c0_134 = arith.constant 0 : index
    %429 = vector.load %arg14[%428, %c0_133, %c0_134] : memref<8x8x128xf32, #tpu.memory_space<vmem>>, vector<1x8x128xf32>
    %430 = vector.shape_cast %429 : vector<1x8x128xf32> to vector<8x128xf32>
    %431 = vector.shape_cast %427 : vector<8x128xf32> to vector<1x8x128xf32>
    tpu.vector_store %arg14[%428, %c0_133, %c0_134], %431 {strides = array<i32>} : memref<8x8x128xf32, #tpu.memory_space<vmem>>, vector<1x8x128xf32>,
    %432 = arith.truncf %427 : vector<8x128xf32> to vector<8x128xbf16>
    %c4_i32_135 = arith.constant 4 : i32
    %433 = arith.index_cast %c4_i32_135 : i32 to index
    %c0_136 = arith.constant 0 : index
    %c0_137 = arith.constant 0 : index
    %434 = vector.load %arg13[%433, %c0_136, %c0_137] : memref<8x8x512xf32, #tpu.memory_space<vmem>>, vector<1x8x512xf32>
    %435 = vector.shape_cast %434 : vector<1x8x512xf32> to vector<8x512xf32>
    %c0_138 = arith.constant 0 : index
    %c0_139 = arith.constant 0 : index
    %436 = vector.load %arg16[%c0_138, %c0_139] : memref<128x512xbf16, #tpu.memory_space<vmem>>, vector<128x512xbf16>
    %cst_140 = arith.constant dense<0.000000e+00> : vector<8x512xf32>
    %437 = tpu.matmul %432, %436, %cst_140 {dimension_numbers = #tpu.dot_dimension_numbers<[1], [0], [0], [1], [0, 0, 1, 1], [], []>} : vector<8x128xbf16>, vector<128x512xbf16>, vector<8x512xf32> -> vector<8x512xf32>
    %438 = arith.addf %435, %437 : vector<8x512xf32>
    %439 = vector.extract_strided_slice %438 {offsets = [0, 0], sizes = [8, 128], strides = [1, 1]} : vector<8x512xf32> to vector<8x128xf32>
    %440 = arith.negf %439 : vector<8x128xf32>
    %441 = math.exp %440 : vector<8x128xf32>
    %cst_141 = arith.constant 1.000000e+00 : f32
    %442 = vector.broadcast %cst_141 : f32 to vector<8x128xf32>
    %443 = arith.addf %442, %441 : vector<8x128xf32>
    %444 = arith.divf %442, %443 : vector<8x128xf32>
    %445 = vector.extract_strided_slice %438 {offsets = [0, 128], sizes = [8, 128], strides = [1, 1]} : vector<8x512xf32> to vector<8x128xf32>
    %446 = arith.negf %445 : vector<8x128xf32>
    %447 = math.exp %446 : vector<8x128xf32>
    %cst_142 = arith.constant 1.000000e+00 : f32
    %448 = vector.broadcast %cst_142 : f32 to vector<8x128xf32>
    %449 = arith.addf %448, %447 : vector<8x128xf32>
    %450 = arith.divf %448, %449 : vector<8x128xf32>
    %451 = vector.extract_strided_slice %438 {offsets = [0, 256], sizes = [8, 128], strides = [1, 1]} : vector<8x512xf32> to vector<8x128xf32>
    %452 = math.tanh %451 : vector<8x128xf32>
    %453 = vector.extract_strided_slice %438 {offsets = [0, 384], sizes = [8, 128], strides = [1, 1]} : vector<8x512xf32> to vector<8x128xf32>
    %454 = arith.negf %453 : vector<8x128xf32>
    %455 = math.exp %454 : vector<8x128xf32>
    %cst_143 = arith.constant 1.000000e+00 : f32
    %456 = vector.broadcast %cst_143 : f32 to vector<8x128xf32>
    %457 = arith.addf %456, %455 : vector<8x128xf32>
    %458 = arith.divf %456, %457 : vector<8x128xf32>
    %459 = arith.mulf %450, %425 : vector<8x128xf32>
    %460 = arith.mulf %444, %452 : vector<8x128xf32>
    %461 = arith.addf %459, %460 : vector<8x128xf32>
    %462 = math.tanh %461 : vector<8x128xf32>
    %463 = arith.mulf %458, %462 : vector<8x128xf32>
    %464 = arith.index_cast %c4_i32_135 : i32 to index
    %c0_144 = arith.constant 0 : index
    %c0_145 = arith.constant 0 : index
    %465 = vector.load %arg14[%464, %c0_144, %c0_145] : memref<8x8x128xf32, #tpu.memory_space<vmem>>, vector<1x8x128xf32>
    %466 = vector.shape_cast %465 : vector<1x8x128xf32> to vector<8x128xf32>
    %467 = vector.shape_cast %463 : vector<8x128xf32> to vector<1x8x128xf32>
    tpu.vector_store %arg14[%464, %c0_144, %c0_145], %467 {strides = array<i32>} : memref<8x8x128xf32, #tpu.memory_space<vmem>>, vector<1x8x128xf32>,
    %468 = arith.truncf %463 : vector<8x128xf32> to vector<8x128xbf16>
    %c5_i32_146 = arith.constant 5 : i32
    %469 = arith.index_cast %c5_i32_146 : i32 to index
    %c0_147 = arith.constant 0 : index
    %c0_148 = arith.constant 0 : index
    %470 = vector.load %arg13[%469, %c0_147, %c0_148] : memref<8x8x512xf32, #tpu.memory_space<vmem>>, vector<1x8x512xf32>
    %471 = vector.shape_cast %470 : vector<1x8x512xf32> to vector<8x512xf32>
    %c0_149 = arith.constant 0 : index
    %c0_150 = arith.constant 0 : index
    %472 = vector.load %arg16[%c0_149, %c0_150] : memref<128x512xbf16, #tpu.memory_space<vmem>>, vector<128x512xbf16>
    %cst_151 = arith.constant dense<0.000000e+00> : vector<8x512xf32>
    %473 = tpu.matmul %468, %472, %cst_151 {dimension_numbers = #tpu.dot_dimension_numbers<[1], [0], [0], [1], [0, 0, 1, 1], [], []>} : vector<8x128xbf16>, vector<128x512xbf16>, vector<8x512xf32> -> vector<8x512xf32>
    %474 = arith.addf %471, %473 : vector<8x512xf32>
    %475 = vector.extract_strided_slice %474 {offsets = [0, 0], sizes = [8, 128], strides = [1, 1]} : vector<8x512xf32> to vector<8x128xf32>
    %476 = arith.negf %475 : vector<8x128xf32>
    %477 = math.exp %476 : vector<8x128xf32>
    %cst_152 = arith.constant 1.000000e+00 : f32
    %478 = vector.broadcast %cst_152 : f32 to vector<8x128xf32>
    %479 = arith.addf %478, %477 : vector<8x128xf32>
    %480 = arith.divf %478, %479 : vector<8x128xf32>
    %481 = vector.extract_strided_slice %474 {offsets = [0, 128], sizes = [8, 128], strides = [1, 1]} : vector<8x512xf32> to vector<8x128xf32>
    %482 = arith.negf %481 : vector<8x128xf32>
    %483 = math.exp %482 : vector<8x128xf32>
    %cst_153 = arith.constant 1.000000e+00 : f32
    %484 = vector.broadcast %cst_153 : f32 to vector<8x128xf32>
    %485 = arith.addf %484, %483 : vector<8x128xf32>
    %486 = arith.divf %484, %485 : vector<8x128xf32>
    %487 = vector.extract_strided_slice %474 {offsets = [0, 256], sizes = [8, 128], strides = [1, 1]} : vector<8x512xf32> to vector<8x128xf32>
    %488 = math.tanh %487 : vector<8x128xf32>
    %489 = vector.extract_strided_slice %474 {offsets = [0, 384], sizes = [8, 128], strides = [1, 1]} : vector<8x512xf32> to vector<8x128xf32>
    %490 = arith.negf %489 : vector<8x128xf32>
    %491 = math.exp %490 : vector<8x128xf32>
    %cst_154 = arith.constant 1.000000e+00 : f32
    %492 = vector.broadcast %cst_154 : f32 to vector<8x128xf32>
    %493 = arith.addf %492, %491 : vector<8x128xf32>
    %494 = arith.divf %492, %493 : vector<8x128xf32>
    %495 = arith.mulf %486, %461 : vector<8x128xf32>
    %496 = arith.mulf %480, %488 : vector<8x128xf32>
    %497 = arith.addf %495, %496 : vector<8x128xf32>
    %498 = math.tanh %497 : vector<8x128xf32>
    %499 = arith.mulf %494, %498 : vector<8x128xf32>
    %500 = arith.index_cast %c5_i32_146 : i32 to index
    %c0_155 = arith.constant 0 : index
    %c0_156 = arith.constant 0 : index
    %501 = vector.load %arg14[%500, %c0_155, %c0_156] : memref<8x8x128xf32, #tpu.memory_space<vmem>>, vector<1x8x128xf32>
    %502 = vector.shape_cast %501 : vector<1x8x128xf32> to vector<8x128xf32>
    %503 = vector.shape_cast %499 : vector<8x128xf32> to vector<1x8x128xf32>
    tpu.vector_store %arg14[%500, %c0_155, %c0_156], %503 {strides = array<i32>} : memref<8x8x128xf32, #tpu.memory_space<vmem>>, vector<1x8x128xf32>,
    %504 = arith.truncf %499 : vector<8x128xf32> to vector<8x128xbf16>
    %c6_i32_157 = arith.constant 6 : i32
    %505 = arith.index_cast %c6_i32_157 : i32 to index
    %c0_158 = arith.constant 0 : index
    %c0_159 = arith.constant 0 : index
    %506 = vector.load %arg13[%505, %c0_158, %c0_159] : memref<8x8x512xf32, #tpu.memory_space<vmem>>, vector<1x8x512xf32>
    %507 = vector.shape_cast %506 : vector<1x8x512xf32> to vector<8x512xf32>
    %c0_160 = arith.constant 0 : index
    %c0_161 = arith.constant 0 : index
    %508 = vector.load %arg16[%c0_160, %c0_161] : memref<128x512xbf16, #tpu.memory_space<vmem>>, vector<128x512xbf16>
    %cst_162 = arith.constant dense<0.000000e+00> : vector<8x512xf32>
    %509 = tpu.matmul %504, %508, %cst_162 {dimension_numbers = #tpu.dot_dimension_numbers<[1], [0], [0], [1], [0, 0, 1, 1], [], []>} : vector<8x128xbf16>, vector<128x512xbf16>, vector<8x512xf32> -> vector<8x512xf32>
    %510 = arith.addf %507, %509 : vector<8x512xf32>
    %511 = vector.extract_strided_slice %510 {offsets = [0, 0], sizes = [8, 128], strides = [1, 1]} : vector<8x512xf32> to vector<8x128xf32>
    %512 = arith.negf %511 : vector<8x128xf32>
    %513 = math.exp %512 : vector<8x128xf32>
    %cst_163 = arith.constant 1.000000e+00 : f32
    %514 = vector.broadcast %cst_163 : f32 to vector<8x128xf32>
    %515 = arith.addf %514, %513 : vector<8x128xf32>
    %516 = arith.divf %514, %515 : vector<8x128xf32>
    %517 = vector.extract_strided_slice %510 {offsets = [0, 128], sizes = [8, 128], strides = [1, 1]} : vector<8x512xf32> to vector<8x128xf32>
    %518 = arith.negf %517 : vector<8x128xf32>
    %519 = math.exp %518 : vector<8x128xf32>
    %cst_164 = arith.constant 1.000000e+00 : f32
    %520 = vector.broadcast %cst_164 : f32 to vector<8x128xf32>
    %521 = arith.addf %520, %519 : vector<8x128xf32>
    %522 = arith.divf %520, %521 : vector<8x128xf32>
    %523 = vector.extract_strided_slice %510 {offsets = [0, 256], sizes = [8, 128], strides = [1, 1]} : vector<8x512xf32> to vector<8x128xf32>
    %524 = math.tanh %523 : vector<8x128xf32>
    %525 = vector.extract_strided_slice %510 {offsets = [0, 384], sizes = [8, 128], strides = [1, 1]} : vector<8x512xf32> to vector<8x128xf32>
    %526 = arith.negf %525 : vector<8x128xf32>
    %527 = math.exp %526 : vector<8x128xf32>
    %cst_165 = arith.constant 1.000000e+00 : f32
    %528 = vector.broadcast %cst_165 : f32 to vector<8x128xf32>
    %529 = arith.addf %528, %527 : vector<8x128xf32>
    %530 = arith.divf %528, %529 : vector<8x128xf32>
    %531 = arith.mulf %522, %497 : vector<8x128xf32>
    %532 = arith.mulf %516, %524 : vector<8x128xf32>
    %533 = arith.addf %531, %532 : vector<8x128xf32>
    %534 = math.tanh %533 : vector<8x128xf32>
    %535 = arith.mulf %530, %534 : vector<8x128xf32>
    %536 = arith.index_cast %c6_i32_157 : i32 to index
    %c0_166 = arith.constant 0 : index
    %c0_167 = arith.constant 0 : index
    %537 = vector.load %arg14[%536, %c0_166, %c0_167] : memref<8x8x128xf32, #tpu.memory_space<vmem>>, vector<1x8x128xf32>
    %538 = vector.shape_cast %537 : vector<1x8x128xf32> to vector<8x128xf32>
    %539 = vector.shape_cast %535 : vector<8x128xf32> to vector<1x8x128xf32>
    tpu.vector_store %arg14[%536, %c0_166, %c0_167], %539 {strides = array<i32>} : memref<8x8x128xf32, #tpu.memory_space<vmem>>, vector<1x8x128xf32>,
    %540 = arith.truncf %535 : vector<8x128xf32> to vector<8x128xbf16>
    %c7_i32_168 = arith.constant 7 : i32
    %541 = arith.index_cast %c7_i32_168 : i32 to index
    %c0_169 = arith.constant 0 : index
    %c0_170 = arith.constant 0 : index
    %542 = vector.load %arg13[%541, %c0_169, %c0_170] : memref<8x8x512xf32, #tpu.memory_space<vmem>>, vector<1x8x512xf32>
    %543 = vector.shape_cast %542 : vector<1x8x512xf32> to vector<8x512xf32>
    %c0_171 = arith.constant 0 : index
    %c0_172 = arith.constant 0 : index
    %544 = vector.load %arg16[%c0_171, %c0_172] : memref<128x512xbf16, #tpu.memory_space<vmem>>, vector<128x512xbf16>
    %cst_173 = arith.constant dense<0.000000e+00> : vector<8x512xf32>
    %545 = tpu.matmul %540, %544, %cst_173 {dimension_numbers = #tpu.dot_dimension_numbers<[1], [0], [0], [1], [0, 0, 1, 1], [], []>} : vector<8x128xbf16>, vector<128x512xbf16>, vector<8x512xf32> -> vector<8x512xf32>
    %546 = arith.addf %543, %545 : vector<8x512xf32>
    %547 = vector.extract_strided_slice %546 {offsets = [0, 0], sizes = [8, 128], strides = [1, 1]} : vector<8x512xf32> to vector<8x128xf32>
    %548 = arith.negf %547 : vector<8x128xf32>
    %549 = math.exp %548 : vector<8x128xf32>
    %cst_174 = arith.constant 1.000000e+00 : f32
    %550 = vector.broadcast %cst_174 : f32 to vector<8x128xf32>
    %551 = arith.addf %550, %549 : vector<8x128xf32>
    %552 = arith.divf %550, %551 : vector<8x128xf32>
    %553 = vector.extract_strided_slice %546 {offsets = [0, 128], sizes = [8, 128], strides = [1, 1]} : vector<8x512xf32> to vector<8x128xf32>
    %554 = arith.negf %553 : vector<8x128xf32>
    %555 = math.exp %554 : vector<8x128xf32>
    %cst_175 = arith.constant 1.000000e+00 : f32
    %556 = vector.broadcast %cst_175 : f32 to vector<8x128xf32>
    %557 = arith.addf %556, %555 : vector<8x128xf32>
    %558 = arith.divf %556, %557 : vector<8x128xf32>
    %559 = vector.extract_strided_slice %546 {offsets = [0, 256], sizes = [8, 128], strides = [1, 1]} : vector<8x512xf32> to vector<8x128xf32>
    %560 = math.tanh %559 : vector<8x128xf32>
    %561 = vector.extract_strided_slice %546 {offsets = [0, 384], sizes = [8, 128], strides = [1, 1]} : vector<8x512xf32> to vector<8x128xf32>
    %562 = arith.negf %561 : vector<8x128xf32>
    %563 = math.exp %562 : vector<8x128xf32>
    %cst_176 = arith.constant 1.000000e+00 : f32
    %564 = vector.broadcast %cst_176 : f32 to vector<8x128xf32>
    %565 = arith.addf %564, %563 : vector<8x128xf32>
    %566 = arith.divf %564, %565 : vector<8x128xf32>
    %567 = arith.mulf %558, %533 : vector<8x128xf32>
    %568 = arith.mulf %552, %560 : vector<8x128xf32>
    %569 = arith.addf %567, %568 : vector<8x128xf32>
    %570 = math.tanh %569 : vector<8x128xf32>
    %571 = arith.mulf %566, %570 : vector<8x128xf32>
    %572 = arith.index_cast %c7_i32_168 : i32 to index
    %c0_177 = arith.constant 0 : index
    %c0_178 = arith.constant 0 : index
    %573 = vector.load %arg14[%572, %c0_177, %c0_178] : memref<8x8x128xf32, #tpu.memory_space<vmem>>, vector<1x8x128xf32>
    %574 = vector.shape_cast %573 : vector<1x8x128xf32> to vector<8x128xf32>
    %575 = vector.shape_cast %571 : vector<8x128xf32> to vector<1x8x128xf32>
    tpu.vector_store %arg14[%572, %c0_177, %c0_178], %575 {strides = array<i32>} : memref<8x8x128xf32, #tpu.memory_space<vmem>>, vector<1x8x128xf32>,
    %576 = arith.truncf %571 : vector<8x128xf32> to vector<8x128xbf16>
    %c8_i32_179 = arith.constant 8 : i32
    %c2_i32_180 = arith.constant 2 : i32
    %577 = tpu.memref_slice %arg18[%c2_i32_180] : memref<3x!tpu.dma_semaphore, #tpu.memory_space<semaphore_mem>> -> memref<1x!tpu.dma_semaphore, #tpu.memory_space<semaphore_mem>>
    %578 = tpu.memref_squeeze %577 : memref<1x!tpu.dma_semaphore, #tpu.memory_space<semaphore_mem>> -> memref<!tpu.dma_semaphore, #tpu.memory_space<semaphore_mem>>
    tpu.wait_dma2 semaphore(%578 : memref<!tpu.dma_semaphore, #tpu.memory_space<semaphore_mem>>) src(%arg9 : memref<128x128xbf16, #tpu.memory_space<any>>) dst(%arg17 : memref<128x128xbf16, #tpu.memory_space<vmem>>)
    %c0_181 = arith.constant 0 : index
    %c0_182 = arith.constant 0 : index
    %c0_183 = arith.constant 0 : index
    %579 = vector.load %arg14[%c0_181, %c0_182, %c0_183] : memref<8x8x128xf32, #tpu.memory_space<vmem>>, vector<8x8x128xf32>
    %580 = vector.shape_cast %579 : vector<8x8x128xf32> to vector<64x128xf32>
    %581 = arith.truncf %580 : vector<64x128xf32> to vector<64x128xbf16>
    %c0_184 = arith.constant 0 : index
    %c0_185 = arith.constant 0 : index
    %582 = vector.load %arg17[%c0_184, %c0_185] : memref<128x128xbf16, #tpu.memory_space<vmem>>, vector<128x128xbf16>
    %cst_186 = arith.constant dense<0.000000e+00> : vector<64x128xf32>
    %583 = tpu.matmul %581, %582, %cst_186 {dimension_numbers = #tpu.dot_dimension_numbers<[1], [0], [0], [1], [0, 0, 1, 1], [], []>} : vector<64x128xbf16>, vector<128x128xbf16>, vector<64x128xf32> -> vector<64x128xf32>
    %c0_187 = arith.constant 0 : index
    %c0_188 = arith.constant 0 : index
    %584 = vector.load %arg10[%c0_187, %c0_188] : memref<1x128xf32, #tpu.memory_space<vmem>>, vector<1x128xf32>
    %585 = vector.broadcast %584 : vector<1x128xf32> to vector<64x128xf32>
    %586 = arith.addf %583, %585 : vector<64x128xf32>
    %587 = vector.shape_cast %586 : vector<64x128xf32> to vector<8x8x128xf32>
    %c0_189 = arith.constant 0 : index
    %c0_190 = arith.constant 0 : index
    %c0_191 = arith.constant 0 : index
    %588 = vector.load %arg11[%c0_189, %c0_190, %c0_191] : memref<8x8x128xf32, #tpu.memory_space<vmem>>, vector<8x8x128xf32>
    tpu.vector_store %arg11[%c0_189, %c0_190, %c0_191], %587 {strides = array<i32>} : memref<8x8x128xf32, #tpu.memory_space<vmem>>, vector<8x8x128xf32>,
    return
  }
  func.func @transform_0(%arg0: i32) -> (i32, i32, i32) {
    %c0_i32 = arith.constant 0 : i32
    %c0_i32_0 = arith.constant 0 : i32
    %c0_i32_1 = arith.constant 0 : i32
    return %c0_i32, %arg0, %c0_i32_0 : i32, i32, i32
  }
  func.func @transform_1(%arg0: i32) -> (i32, i32, i32) {
    %c0_i32 = arith.constant 0 : i32
    %c0_i32_0 = arith.constant 0 : i32
    %c0_i32_1 = arith.constant 0 : i32
    return %c0_i32, %arg0, %c0_i32_0 : i32, i32, i32
  }
  func.func @transform_2(%arg0: i32) -> (i32, i32) {
    %c0_i32 = arith.constant 0 : i32
    %c0_i32_0 = arith.constant 0 : i32
    %c0_i32_1 = arith.constant 0 : i32
    return %c0_i32, %c0_i32_0 : i32, i32
  }
  func.func @transform_4(%arg0: i32) -> (i32, i32) {
    %c0_i32 = arith.constant 0 : i32
    %c0_i32_0 = arith.constant 0 : i32
    %c0_i32_1 = arith.constant 0 : i32
    return %c0_i32, %c0_i32_0 : i32, i32
  }
  func.func @transform_5(%arg0: i32) -> (i32, i32) {
    %c0_i32 = arith.constant 0 : i32
    %c0_i32_0 = arith.constant 0 : i32
    %c0_i32_1 = arith.constant 0 : i32
    return %c0_i32, %c0_i32_0 : i32, i32
  }
  func.func @transform_7(%arg0: i32) -> (i32, i32) {
    %c0_i32 = arith.constant 0 : i32
    %c0_i32_0 = arith.constant 0 : i32
    %c0_i32_1 = arith.constant 0 : i32
    return %c0_i32, %c0_i32_0 : i32, i32
  }
  func.func @transform_9(%arg0: i32) -> (i32, i32) {
    %c0_i32 = arith.constant 0 : i32
    %c0_i32_0 = arith.constant 0 : i32
    %c0_i32_1 = arith.constant 0 : i32
    return %c0_i32, %c0_i32_0 : i32, i32
  }
  func.func @transform_10(%arg0: i32) -> (i32, i32, i32) {
    %c0_i32 = arith.constant 0 : i32
    %c0_i32_0 = arith.constant 0 : i32
    %c0_i32_1 = arith.constant 0 : i32
    return %c0_i32, %arg0, %c0_i32_0 : i32, i32, i32
  }
}

</mosaic_0001>

<bundles_post_ra>
// kernel: tpu_custom_call.1
= control target key start
LH: loop header
LB: loop body
LE: loop exit
PB: predicated region body
PF: predicated region fallthrough
CT: control target
= control target key end

     0   :  { %s5826_s0 = inlined_call_operand.hbm [shape: f32[8,16,64], index: 0, kind: input, shape index: {}]   ;;  %s5827_s1 = inlined_call_operand.hbm [shape: f32[8,16,64], index: 1, kind: input, shape index: {}]   ;;  %s5828_s2 = inlined_call_operand.hbm [shape: bf16[64,512], index: 2, kind: input, shape index: {}]   ;;  %s5829_s3 = inlined_call_operand.hbm [shape: bf16[128,512], index: 3, kind: input, shape index: {}]   ;;  %s5830_s4 = inlined_call_operand.vmem [shape: f32[1,512], index: 4, kind: input, shape index: {}]   ;;  %s5831_s5 = inlined_call_operand.hbm [shape: bf16[64,512], index: 5, kind: input, shape index: {}]   ;;  %s5832_s6 = inlined_call_operand.hbm [shape: bf16[128,512], index: 6, kind: input, shape index: {}]   ;;  %s5833_s7 = inlined_call_operand.vmem [shape: f32[1,512], index: 7, kind: input, shape index: {}]   ;;  %s5834_s8 = inlined_call_operand.hbm [shape: bf16[128,128], index: 8, kind: input, shape index: {}]   ;;  %s5835_s9 = inlined_call_operand.vmem [shape: f32[1,128], index: 9, kind: input, shape index: {}]   ;;  %s5836_s10 = inlined_call_operand.hbm [shape: f32[8,16,128], index: 10, kind: output, shape index: {}]  }
   0x1   :  { %5852 = sst [smem:[#allocation89_spill]] %s5826_s0 }
   0x2   :  { %5853 = sst [smem:[#allocation90_spill]] %s5827_s1 }
   0x3   :  { %5854 = sst [smem:[#allocation91_spill]] %s5828_s2 }
   0x4   :  { %5855 = sst [smem:[#allocation92_spill]] %s5831_s5 }
   0x5   :  { %5856 = sst [smem:[#allocation93_spill]] %s5836_s10 }
   0x6   :  { %15 = vsyncpa [#allocation10], 0 }
   0x7   :  { %17 = vsyncpa [#allocation10 + $0x1], 0 }
   0x8   :  { %18 = vsyncpa [#allocation13], 0 }
   0x9   :  { %20 = vsyncpa [#allocation13 + $0x1], 0 }
   0xa   :  { %21 = vsyncpa [#allocation16], 0 }
   0xb   :  { %22 = vsyncpa [#allocation11], 0 }
   0xc   :  { %24 = vsyncpa [#allocation11 + $0x1], 0  ;;  %s4373_s13 = smov 0   ;;  %s4375_s14 = smov 0  }
   0xd   :  { %s4377_s15 = smov 0   ;;  %s4379_s16 = smov 0  }
   0xe LB: > { %5857 = sst [smem:[#allocation34_spill]] %s4280_s13  ;;  %s4394_s17 = sadd.s32 4294967295, %s4292_s16   ;;  %s4292_s16 = sphi %s4379_s16, %s5989_s16   ;;  %s4288_s15 = sphi %s4377_s15, %s5992_s15   ;;  %s4284_s14 = sphi %s4375_s14, %s5991_s14   ;;  %s4280_s13 = sphi %s4373_s13, %s5990_s13  }
   0xf   : > { %5858 = sst [smem:[#allocation35_spill]] %s4284_s14  ;;  %s3504_s18 = sadd.s32 4294967294, %s4292_s16  }
  0x10   : > { %5859 = sst [smem:[#allocation36_spill]] %s4288_s15  ;;  %s4398_s19 = sadd.s32 1, %s4292_s16  }
  0x11   : > { %5860 = sst [smem:[#allocation37_spill]] %s4398_s19  ;;  %s37_s20 = sadd.s32 1, %s4288_s15 }
  0x12   : > { %s34_s21 = ssub.s32 %s4292_s16, %s4398_s19  ;;  %p44_p0 = scmp.ne.s32.totalorder %s4288_s15, %s4284_s14 }
  0x13   : > { %p35_p1 = scmp.eq.s32.totalorder %s34_s21, 0  ;;  %p45_p2 = scmp.eq.s32.totalorder %s4292_s16, 0 }
  0x14   : > { %p50_p3 = scmp.ne.s32.totalorder %s4284_s14, %s4280_s13  ;;  %p5840_p4 = scmp.eq.s32.totalorder %s4394_s17, 0 }
  0x15   : > { %s4410_s22 = scalar_select %p35_p1, %s4288_s15, %s37_s20  }
  0x16   : > { %p4412_p5 = por %p45_p2, %p44_p0  ;;  %p4418_p6 = por %p5840_p4, %p50_p3 }
  0x17   : > { %5861 = sst [smem:[#allocation38_spill]] %s4410_s22  ;;  %p205_p7 = scmp.eq.s32.totalorder %s4394_s17, 1 }
  0x18   : > { %s5862_s23 = scalar_select %p4412_p5, 1, 0 }
  0x19   : > { %s5863_s24 = scalar_select %p4418_p6, 1, 0 }
  0x1a   : > { %p211_p8 = scmp.eq.s32.totalorder %s3504_s18, 1  ;;  %p3505_p9 = scmp.ge.s32.totalorder %s4292_s16, 1 }
  0x1b   : > { %p218_p10 = scmp.lt.s32.totalorder %s4292_s16, 3  ;;  %p4425_p11 = por %p205_p7, %p44_p0 }
  0x1c   : > { %p4429_p12 = por %p211_p8, %p50_p3  ;;  %s4294_s28 = smov [#allocation14]  }
  0x1d   : > { %s5864_s25 = scalar_select %p4425_p11, 1, 0 }
  0x1e   : > { %s5865_s26 = scalar_select %p4429_p12, 1, 0 }
  0x1f   : > { %p4433_p13 = pnand %p3505_p9, %p218_p10  ;;  %s230_s29 = sshll.u32 %s4294_s28, 4  ;;  %s231_s29 = int_to_ptr.vmem [resolvable:$true] %s230_s29 }
  0x20   : > { %5866 = sst [smem:[#allocation39_spill]] %s5865_s26  ;;  %s4295_s11 = smov [#allocation15]  }
  0x21   : > { %s5867_s27 = scalar_select %p4433_p13, 1, 0 }
  0x22   : > { %p3685_p1 = pneg %p4433_p13  ;;  %s246_s12 = sshll.u32 %s4295_s11, 4  ;;  %s247_s12 = int_to_ptr.vmem [resolvable:$true] %s246_s12 }
  0x23   : > { %s5869_s2 = sld [smem:[#allocation91_spill]] }
  0x24   : > { %p4441_p2 = pnand %p3685_p1, %p5840_p4 }
  0x26   : > { %p4072_p8 = pneg %p4441_p2 }
  0x29   : > { %s4070_s21 = scalar_lea.hbm %s5869_s2, 2048 }
  0x2a   : > { %p4071_p7 = scmp.ne.s32.totalorder %s5869_s2, %s4070_s21  ;;  %p4077_p1 = scmp.lt.u32.totalorder %s4070_s21, %s5869_s2 }
  0x2c   : > { %p4073_p9 = pnand %p4072_p8, %p4071_p7 }
  0x2e   : > { %p4074_p10 = pneg %p4073_p9 }
  0x30   : > { %p4079_p0 = pnand %p4077_p1, %p4074_p10 }
  0x32   : > { %4082 = shalt.err (!%p4079_p0)
}
  0x33   : > { %s4083_s11 = scalar_lea.vmem %s231_s29, 2048  ;;  %p4091_p11 = scmp.lt.s32.totalorder %s231_s29, %s231_s29 }
  0x34   : > { %p4084_p4 = scmp.ne.s32.totalorder %s231_s29, %s4083_s11  ;;  %p4092_p6 = scmp.lt.s32.totalorder %s4083_s11, %s4083_s11 }
  0x36   : > { %p4086_p3 = pnand %p4084_p4, %p4072_p8  ;;  %p4093_p13 = por %p4092_p6, %p4091_p11 }
  0x38   : > { %p4087_p12 = pneg %p4086_p3 }
  0x3a   : > { %p4094_p5 = pnand %p4093_p13, %p4087_p12 }
  0x3c   : > { %4097 = shalt.err (!%p4094_p5)
}
  0x3d   : > { %s4296_s19 = smov 256   ;;  %s4297_s22 = smov 16  }
  0x3e   : > { %3688 = dma.hbm_to_vmem [thread:$0]  (!%p4441_p2), %s5869_s2, 2048, %s231_s29, [#allocation13], %s4296_s19, %s4296_s19, %s4297_s22  }
  0x3f   : > { %p5870_p4 = scmp.ne.s32.totalorder %s5862_s23, 0  ;;  %p5871_p0 = scmp.lt.s32.totalorder %s4292_s16, 2 }
  0x40   : > { %s5873_s5 = sld [smem:[#allocation92_spill]] }
  0x41   : > { %p4475_p3 = pnand %p5871_p0, %p5870_p4 }
  0x43   : > { %s5872_s20 = scalar_select %p4475_p3, 1, 0 }
  0x46   : > { %s4098_s11 = scalar_lea.hbm %s5873_s5, 2048 }
  0x47   : > { %p4099_p5 = scmp.ne.s32.totalorder %s5873_s5, %s4098_s11  ;;  %p4105_p12 = scmp.lt.u32.totalorder %s4098_s11, %s5873_s5 }
  0x49   : > { %p4101_p6 = pnand %p4099_p5, %p4072_p8 }
  0x4b   : > { %p4102_p11 = pneg %p4101_p6 }
  0x4d   : > { %p4107_p13 = pnand %p4105_p12, %p4102_p11 }
  0x4f   : > { %4110 = shalt.err (!%p4107_p13)
}
  0x50   : > { %s4111_s26 = scalar_lea.vmem %s247_s12, 2048  ;;  %p4119_p1 = scmp.lt.s32.totalorder %s247_s12, %s247_s12 }
  0x51   : > { %p4112_p7 = scmp.ne.s32.totalorder %s247_s12, %s4111_s26  ;;  %p4120_p4 = scmp.lt.s32.totalorder %s4111_s26, %s4111_s26 }
  0x53   : > { %p4114_p9 = pnand %p4112_p7, %p4072_p8  ;;  %p4121_p0 = por %p4120_p4, %p4119_p1 }
  0x55   : > { %p4115_p10 = pneg %p4114_p9 }
  0x57   : > { %p4122_p3 = pnand %p4121_p0, %p4115_p10 }
  0x59   : > { %4125 = shalt.err (!%p4122_p3)
}
  0x5a   : > { %3691 = dma.hbm_to_vmem [thread:$0]  (!%p4441_p2), %s5873_s5, 2048, %s247_s12, [#allocation16], %s4296_s19, %s4296_s19, %s4297_s22  }
  0x5b   : > { %s266_s18 = sand.u32 1, %s4288_s15   ;;  %s5847_s28 = sshll.u32 %s4292_s16, 7 }
  0x5c   : > { %s4502_s21 = sshll.u32 %s266_s18, 6  ;;  %s5874_s0 = sld [smem:[#allocation89_spill]] }
  0x5d   : > { %s270_s23 = scalar_lea.vmem [#allocation9], %s4502_s21  ;;  %s4515_s12 = scalar_lea.sflag [#allocation10], %s266_s18 }
  0x5e   : > { %s276_s26 = sshll.u32 %s270_s23, 4  ;;  %p5875_p8 = scmp.ne.s32.totalorder %s5872_s20, 0  ;;  %s4513_s26 = int_to_ptr.vmem [resolvable:$true] %s276_s26 }
  0x60   : > { %p4128_p3 = pneg %p5875_p8 }
  0x62   : > { %s4510_s30 = scalar_lea.hbm %s5874_s0, %s5847_s28  ;;  %s4131_s11 = scalar_lea.hbm %s5874_s0, 2048 }
  0x63   : > { %s4126_s22 = scalar_lea.hbm %s4510_s30, 1024  ;;  %p4132_p11 = scmp.lt.u32.totalorder %s4510_s30, %s5874_s0 }
  0x64   : > { %p4127_p2 = scmp.ne.s32.totalorder %s4510_s30, %s4126_s22  ;;  %p4133_p12 = scmp.lt.u32.totalorder %s4131_s11, %s4126_s22 }
  0x65   : > { %p4135_p7 = scmp.lt.u32.totalorder %s4126_s22, %s4510_s30 }
  0x66   : > { %p4129_p5 = pnand %p4128_p3, %p4127_p2  ;;  %p4134_p13 = por %p4133_p12, %p4132_p11 }
  0x68   : > { %p4130_p6 = pneg %p4129_p5  ;;  %p4136_p9 = por %p4135_p7, %p4134_p13 }
  0x6a   : > { %p4137_p10 = pnand %p4136_p9, %p4130_p6 }
  0x6c   : > { %4140 = shalt.err (!%p4137_p10)
}
  0x6d   : > { %s4141_s18 = scalar_lea.vmem %s4513_s26, 1024  ;;  %s4298_s23 = smov [#allocation9]  }
  0x6e   : > { %p4142_p1 = scmp.ne.s32.totalorder %s4513_s26, %s4141_s18  ;;  %s4146_s10 = sshll.u32 %s4298_s23, 4  ;;  %s4147_s10 = int_to_ptr.vmem [resolvable:$false] %s4146_s10 }
  0x6f   : > { %s4148_s28 = scalar_lea.vmem %s4147_s10, 2048  ;;  %p4149_p2 = scmp.lt.s32.totalorder %s4513_s26, %s4147_s10 }
  0x70   : > { %p4144_p4 = pnand %p4142_p1, %p4128_p3  ;;  %p4150_p5 = scmp.lt.s32.totalorder %s4148_s28, %s4141_s18 }
  0x72   : > { %p4145_p0 = pneg %p4144_p4  ;;  %p4151_p11 = por %p4150_p5, %p4149_p2 }
  0x74   : > { %p4152_p12 = pnand %p4151_p11, %p4145_p0 }
  0x76   : > { %4155 = shalt.err (!%p4152_p12)
}
  0x77   : > { %s4299_s22 = smov 128   ;;  %s4300_s13 = smov 8  }
  0x78   : > { %3695 = dma.hbm_to_vmem [thread:$0]  (!%p5875_p8), %s4510_s30, 1024, %s4513_s26, %s4515_s12, %s4296_s19, %s4299_s22, %s4300_s13  }
  0x79   : > { %s5876_s11 = sshll.u32 %s4292_s16, 7  ;;  %s5877_s1 = sld [smem:[#allocation90_spill]] }
  0x7a   : > { %s290_s10 = scalar_lea.vmem [#allocation12], %s4502_s21  ;;  %s286_s0 = sand.u32 1, %s4292_s16  }
  0x7b   : > { %s296_s28 = sshll.u32 %s290_s10, 4  ;;  %s4557_s2 = scalar_lea.sflag [#allocation13], %s286_s0  ;;  %s4554_s28 = int_to_ptr.vmem [resolvable:$true] %s296_s28 }
  0x7f   : > { %s4551_s23 = scalar_lea.hbm %s5877_s1, %s5876_s11  ;;  %s4161_s12 = scalar_lea.hbm %s5877_s1, 2048 }
  0x80   : > { %s4156_s5 = scalar_lea.hbm %s4551_s23, 1024  ;;  %p4162_p9 = scmp.lt.u32.totalorder %s4551_s23, %s5877_s1 }
  0x81   : > { %p4157_p6 = scmp.ne.s32.totalorder %s4551_s23, %s4156_s5  ;;  %p4163_p10 = scmp.lt.u32.totalorder %s4161_s12, %s4156_s5 }
  0x82   : > { %p4165_p4 = scmp.lt.u32.totalorder %s4156_s5, %s4551_s23 }
  0x83   : > { %p4159_p13 = pnand %p4157_p6, %p4128_p3  ;;  %p4164_p1 = por %p4163_p10, %p4162_p9 }
  0x85   : > { %p4160_p7 = pneg %p4159_p13  ;;  %p4166_p0 = por %p4165_p4, %p4164_p1 }
  0x87   : > { %p4167_p2 = pnand %p4166_p0, %p4160_p7 }
  0x89   : > { %4170 = shalt.err (!%p4167_p2)
}
  0x8a   : > { %s4171_s0 = scalar_lea.vmem %s4554_s28, 1024  ;;  %s4301_s21 = smov [#allocation12]  }
  0x8b   : > { %p4172_p5 = scmp.ne.s32.totalorder %s4554_s28, %s4171_s0  ;;  %s4176_s18 = sshll.u32 %s4301_s21, 4  ;;  %s4177_s18 = int_to_ptr.vmem [resolvable:$false] %s4176_s18 }
  0x8c   : > { %s4178_s10 = scalar_lea.vmem %s4177_s18, 2048  ;;  %p4179_p6 = scmp.lt.s32.totalorder %s4554_s28, %s4177_s18 }
  0x8d   : > { %p4174_p11 = pnand %p4172_p5, %p4128_p3  ;;  %p4180_p13 = scmp.lt.s32.totalorder %s4178_s10, %s4171_s0 }
  0x8f   : > { %p4175_p12 = pneg %p4174_p11  ;;  %p4181_p9 = por %p4180_p13, %p4179_p6 }
  0x91   : > { %p4182_p10 = pnand %p4181_p9, %p4175_p12 }
  0x93   : > { %4185 = shalt.err (!%p4182_p10)
}
  0x94   : > { %3698 = dma.hbm_to_vmem [thread:$0]  (!%p5875_p8), %s4551_s23, 1024, %s4554_s28, %s4557_s2, %s4296_s19, %s4299_s22, %s4300_s13  }
  0x95   : > { %p5878_p3 = scmp.ne.s32.totalorder %s5867_s27, 0 }
  0x97   : > { %308 = sbr.rel (%p5878_p3) target bundleno = 5000 (0x1388), region = 48 }
  0x9e   : > { %s4589_s5 = sand.u32 1, %s4284_s14   ;;  %p5879_p7 = scmp.ne.s32.totalorder %s5863_s24, 0 }
  0x9f   : > { %s4592_s30 = sshll.u32 %s4589_s5, 6  ;;  %s311_s20 = scalar_lea.sflag [#allocation10], %s4589_s5 }
  0xa0   : > { %s4596_s26 = scalar_lea.vmem [#allocation9], %s4592_s30 }
  0xa1   : > { %4253 = dma.done.wait (%p5879_p7), %s311_s20, 1024  }
  0xa2   : > { %4255 = vsyncadd (%p5879_p7), %s311_s20, 4294966272  ;;  %s319_s2 = sand.u32 1, %s4394_s17   ;;  %s4604_s19 = scalar_lea.vmem [#allocation12], %s4592_s30 }
  0xa3   : > { %s320_s27 = scalar_lea.sflag [#allocation13], %s319_s2 }
  0xa4   : > { %4257 = dma.done.wait (%p5879_p7), %s320_s27, 1024  }
  0xa5   : > { %4259 = vsyncadd (%p5879_p7), %s320_s27, 4294966272  ;;  %p5880_p8 = scmp.eq.s32.totalorder %s4394_s17, 0 }
  0xa7   : > { %4261 = dma.done.wait (%p5880_p8), [#allocation13], 2048   ;;  %p5881_p1 = pmov %p5880_p8 }
  0xa9   : > { %4263 = vsyncadd (%p5881_p1), [#allocation13], 4294965248  ;;  %p5882_p4 = pmov %p5881_p1 }
  0xaa   : > { %p5883_p0 = pmov %p5881_p1 }
  0xab   : > { %4265 = dma.done.wait (%p5882_p4), [#allocation16], 2048  }
  0xac   : > { %4267 = vsyncadd (%p5883_p0), [#allocation16], 4294965248  ;;  %s372_s22 = sld [smem:[#allocation0]]   ;;  %s4302_s13 = smov [#allocation5]   ;;  %v5850_v0 = vmov 0   ;;  %vm580_vm0 = vcmask 523264  }
  0xad   : > { %s380_s23 = sshll.u32 %s4302_s13, 4  ;;  %645 = vmatprep.mubr.bf16.mxu1 %v5850_v0  ;;  %625 = vmatprep.mubr.bf16.mxu0 %v5850_v0  ;;  %s4304_s24 = smov 512   ;;  %s381_s23 = int_to_ptr.vmem [resolvable:$true] %s380_s23 }
  0xae   : > { %384 = sst [smem:[#allocation19]] %s4304_s24  ;;  %s4305_s28 = smov 4  }
  0xaf   : > { %386 = sst [smem:[#allocation19 + $0x1]] %s4304_s24  ;;  %s4306_s12 = smov 64  }
  0xb0   : > { %388 = sst [smem:[#allocation19 + $0x2]] %s4305_s28  ;;  %s4307_s29 = smov 128  }
  0xb1   : > { %390 = sst [smem:[#allocation19 + $0x3]] %s4306_s12  ;;  %s4308_s21 = smov 2  }
  0xb2   : > { %s3519_s11 = sshll.u32 %s372_s22, 26  ;;  %392 = sst [smem:[#allocation19 + $0x4]] %s4307_s29 }
  0xb3   : > { %s3520_s0 = sadd.s32 134217728, %s3519_s11  ;;  %394 = sst [smem:[#allocation19 + $0x5]] %s4308_s21 }
  0xb4   : > { %398 = sst [smem:[#allocation19 + $0x7]] %s4306_s12  ;;  %s4309_s18 = smov 256  }
  0xb5   : > { %396 = sst [smem:[#allocation19 + $0x6]] %s4309_s18  ;;  %s4310_s10 = smov [#allocation8]  }
  0xb6   : > { %400 = sst [smem:[#allocation19 + $0x8]] %s4305_s28  ;;  %s4311_s20 = smov [#allocation18]  }
  0xb7   : > { %402 = dma.general %s5829_s3, 4096, %s381_s23, %s4310_s10, %s4311_s20, [#allocation19], %s3520_s0, 0  }
  0xb8   : > { %419 = sst [smem:[#allocation21]] %s4304_s24  ;;  %s4312_s22 = smov [#allocation6]  }
  0xb9   : > { %421 = sst [smem:[#allocation21 + $0x1]] %s4304_s24  ;;  %s415_s13 = sshll.u32 %s4312_s22, 4  ;;  %s416_s13 = int_to_ptr.vmem [resolvable:$true] %s415_s13 }
  0xba   : > { %423 = sst [smem:[#allocation21 + $0x2]] %s4305_s28  ;;  %s4313_s11 = smov [#allocation8 + $0x1]  }
  0xbb   : > { %425 = sst [smem:[#allocation21 + $0x3]] %s4306_s12  ;;  %s4314_s1 = smov [#allocation20]  }
  0xbc   : > { %427 = sst [smem:[#allocation21 + $0x4]] %s4307_s29 }
  0xbd   : > { %429 = sst [smem:[#allocation21 + $0x5]] %s4308_s21 }
  0xbe   : > { %431 = sst [smem:[#allocation21 + $0x6]] %s4309_s18 }
  0xbf   : > { %433 = sst [smem:[#allocation21 + $0x7]] %s4306_s12 }
  0xc0   : > { %435 = sst [smem:[#allocation21 + $0x8]] %s4305_s28 }
  0xc1   : > { %437 = dma.general %s5832_s6, 4096, %s416_s13, %s4313_s11, %s4314_s1, [#allocation21], %s3520_s0, 0  }
  0xc2   : > { %v3762_v1 = vld [vmem:[#allocation14 + $0x4] ss:$16 sps:$4 sm:$0xff]   ;;  %v3764_v2 = vld [vmem:[#allocation14] ss:$16 sps:$4 sm:$0xff]   ;;  %v455_v10 = vld [vmem:[%s4596_s26 + $0x28] sm:$0xff]  ;;  %s4315_s1 = smov [#allocation7]  }
  0xc3   : > { %3663 = vmatprep.subr.bf16.mxu1 %v3762_v1  ;;  %v3765_v3 = vld [vmem:[#allocation14 + $0x24] ss:$16 sps:$4 sm:$0xff]   ;;  %593 = vmatprep.subr.bf16.mxu0 %v3762_v1  ;;  %v3767_v4 = vld [vmem:[#allocation14 + $0x20] ss:$16 sps:$4 sm:$0xff]   ;;  %v3776_v11 = vld [vmem:[#allocation14 + $0xc] ss:$16 sps:$4 sm:$0xff]  }
  0xc4   : > { %3667 = vmatpush1.bf16.msra.mxu1 %v3764_v2  ;;  %594 = vmatpush1.bf16.msra.mxu0 %v3764_v2  ;;  %v3768_v5 = vld [vmem:[#allocation14 + $0x44] ss:$16 sps:$4 sm:$0xff]   ;;  %v3770_v6 = vld [vmem:[#allocation14 + $0x40] ss:$16 sps:$4 sm:$0xff]   ;;  %v451_v13 = vld [vmem:[%s4596_s26 + $0x8] sm:$0xff]  ;;  %s446_s14 = sshll.u32 %s4315_s1, 4  ;;  %s447_s14 = int_to_ptr.vmem [resolvable:$true] %s446_s14 }
  0xc5   : > { %3664 = vmatprep.subr.bf16.mxu1 %v3765_v3  ;;  %595 = vmatprep.subr.bf16.mxu0 %v3765_v3  ;;  %v3771_v7 = vld [vmem:[#allocation14 + $0x64] ss:$16 sps:$4 sm:$0xff]   ;;  %v3773_v8 = vld [vmem:[#allocation14 + $0x60] ss:$16 sps:$4 sm:$0xff]   ;;  %v3774_v15 = vld [vmem:[#allocation14 + $0x8] ss:$16 sps:$4 sm:$0xff]  }
  0xc6   : > { %v454_v9 = vld [vmem:[%s4596_s26 + $0x20] sm:$0xff]  ;;  %v3779_v16 = vld [vmem:[#allocation14 + $0x2c] ss:$16 sps:$4 sm:$0xff]   ;;  %v3777_v19 = vld [vmem:[#allocation14 + $0x28] ss:$16 sps:$4 sm:$0xff]  }
  0xc7   : > { %v450_v12 = vld [vmem:[%s4596_s26] sm:$0xff]  ;;  %v4634_v14 = vpack.c.bf16 %v455_v10, %v454_v9  ;;  %v456_v20 = vld [vmem:[%s4596_s26 + $0x30] sm:$0xff]  ;;  %v457_v22 = vld [vmem:[%s4596_s26 + $0x38] sm:$0xff] }
  0xc8   : > { %3668 = vmatpush1.bf16.msra.mxu1 %v3767_v4  ;;  %596 = vmatpush1.bf16.msra.mxu0 %v3767_v4  ;;  %v458_v17 = vpack.c.bf16 %v451_v13, %v450_v12  ;;  %v3792_v18 = vld [vmem:[#allocation15] ss:$16 sps:$4 sm:$0xff]   ;;  %v3794_v21 = vld [vmem:[#allocation15 + $0x4] ss:$16 sps:$4 sm:$0xff]   ;;  %v3782_v23 = vld [vmem:[#allocation14 + $0x4c] ss:$16 sps:$4 sm:$0xff]   ;;  %v4645_v28 = vpack.c.bf16 %v457_v22, %v456_v20 }
  0xc9   : > { %3665 = vmatprep.subr.bf16.mxu1 %v3768_v5  ;;  %597 = vmatprep.subr.bf16.mxu0 %v3768_v5  ;;  %v452_v24 = vld [vmem:[%s4596_s26 + $0x10] sm:$0xff]  ;;  %v453_v26 = vld [vmem:[%s4596_s26 + $0x18] sm:$0xff]  ;;  %v771_v38 = vld [vmem:[%s4604_s19] sm:$0xff] }
  0xca   : > { %v3800_v25 = vld [vmem:[#allocation15 + $0x24] ss:$16 sps:$4 sm:$0xff]   ;;  %v3798_v27 = vld [vmem:[#allocation15 + $0x20] ss:$16 sps:$4 sm:$0xff]   ;;  %v3780_v29 = vld [vmem:[#allocation14 + $0x48] ss:$16 sps:$4 sm:$0xff]   ;;  %v459_v31 = vpack.c.bf16 %v453_v26, %v452_v24 }
  0xcb   : > { %v3785_v30 = vld [vmem:[#allocation14 + $0x6c] ss:$16 sps:$4 sm:$0xff]   ;;  %v3803_v32 = vld [vmem:[#allocation15 + $0x44] ss:$16 sps:$4 sm:$0xff]   ;;  %v3801_v33 = vld [vmem:[#allocation15 + $0x40] ss:$16 sps:$4 sm:$0xff]  }
  0xcc   : > { %3669 = vmatpush1.bf16.msra.mxu1 %v3770_v6  ;;  %598 = vmatpush1.bf16.msra.mxu0 %v3770_v6  ;;  %v3809_v34 = vld [vmem:[#allocation15 + $0x64] ss:$16 sps:$4 sm:$0xff]   ;;  %v3783_v35 = vld [vmem:[#allocation14 + $0x68] ss:$16 sps:$4 sm:$0xff]   ;;  %v3788_v36 = vld [vmem:[#allocation15 + $0xc] ss:$16 sps:$4 sm:$0xff]  }
  0xcd   : > { %3666 = vmatprep.subr.bf16.mxu1 %v3771_v7  ;;  %599 = vmatprep.subr.bf16.mxu0 %v3771_v7  ;;  %v3807_v37 = vld [vmem:[#allocation15 + $0x60] ss:$16 sps:$4 sm:$0xff]   ;;  %v772_v39 = vld [vmem:[%s4604_s19 + $0x8] sm:$0xff]  ;;  %v774_v46 = vld [vmem:[%s4604_s19 + $0x18] sm:$0xff] }
  0xce   : > { %v3786_v40 = vld [vmem:[#allocation15 + $0x8] ss:$16 sps:$4 sm:$0xff]   ;;  %v3791_v41 = vld [vmem:[#allocation15 + $0x2c] ss:$16 sps:$4 sm:$0xff]   ;;  %v779_v42 = vpack.c.bf16 %v772_v39, %v771_v38  ;;  %v773_v45 = vld [vmem:[%s4604_s19 + $0x10] sm:$0xff] }
  0xcf   : > { %v3789_v43 = vld [vmem:[#allocation15 + $0x28] ss:$16 sps:$4 sm:$0xff]   ;;  %v3797_v44 = vld [vmem:[#allocation15 + $0x4c] ss:$16 sps:$4 sm:$0xff]   ;;  %v780_v49 = vpack.c.bf16 %v774_v46, %v773_v45  ;;  %v775_v51 = vld [vmem:[%s4604_s19 + $0x20] sm:$0xff] }
  0xd0   : > { %3670 = vmatpush1.bf16.msra.mxu1 %v3773_v8  ;;  %600 = vmatpush1.bf16.msra.mxu0 %v3773_v8  ;;  %v3795_v47 = vld [vmem:[#allocation15 + $0x48] ss:$16 sps:$4 sm:$0xff]   ;;  %v3806_v48 = vld [vmem:[#allocation15 + $0x6c] ss:$16 sps:$4 sm:$0xff]   ;;  %v777_v54 = vld [vmem:[%s4604_s19 + $0x30] sm:$0xff] }
  0xd1   : > { %666 = vmatprep.subr.bf16.mxu1 %v3776_v11  ;;  %913 = vmatprep.subr.bf16.mxu0 %v3794_v21  ;;  %v3804_v50 = vld [vmem:[#allocation15 + $0x68] ss:$16 sps:$4 sm:$0xff]  }
  0xd2   : > { %v776_v52 = vld [vmem:[%s4604_s19 + $0x28] sm:$0xff]  ;;  %v778_v55 = vld [vmem:[%s4604_s19 + $0x38] sm:$0xff]  ;;  %s4186_s19 = scalar_lea.hbm %s5834_s8, 1024 }
  0xd3   : > { %3541 = vmatmul.mubr.msk.bf16.vlgmr.msra.gmra.mrb[0].mxu1 %vm580_vm0, %v4634_v14  ;;  %3539 = vmatmul.mubr.msk.bf16.vlgmr.msra.gmra.mrb[0].mxu0 %vm580_vm0, %v458_v17  ;;  %v781_v53 = vpack.c.bf16 %v776_v52, %v775_v51  ;;  %v782_v56 = vpack.c.bf16 %v778_v55, %v777_v54  ;;  %p4187_p2 = scmp.ne.s32.totalorder %s5834_s8, %s4186_s19  ;;  %p4190_p5 = scmp.lt.u32.totalorder %s4186_s19, %s5834_s8 }
  0xd4   : > { %667 = vmatpush1.bf16.msra.mxu1 %v3774_v15  ;;  %655 = vmatprep.mubr.bf16.mxu1 %v5850_v0 }
  0xd5   : > { %668 = vmatprep.subr.bf16.mxu1 %v3779_v16  ;;  %914 = vmatpush1.bf16.msra.mxu0 %v3792_v18  ;;  %p4192_p11 = pnand %p4190_p5, %p4187_p2 }
  0xd6   : > { %635 = vmatprep.mubr.bf16.mxu0 %v5850_v0  ;;  %915 = vmatprep.subr.bf16.mxu0 %v3800_v25 }
  0xd8   : > { %669 = vmatpush1.bf16.msra.mxu1 %v3777_v19 }
  0xd9   : > { %670 = vmatprep.subr.bf16.mxu1 %v3782_v23  ;;  %916 = vmatpush1.bf16.msra.mxu0 %v3798_v27 }
  0xda   : > { %917 = vmatprep.subr.bf16.mxu0 %v3803_v32 }
  0xdb   : > { %3542 = vmatmul.mubr.msk.bf16.gmra.mrb[4].mxu1 %vm580_vm0, %v4645_v28  ;;  %3540 = vmatmul.mubr.msk.bf16.gmra.mrb[4].mxu0 %vm580_vm0, %v459_v31 }
  0xdc   : > { %671 = vmatpush1.bf16.msra.mxu1 %v3780_v29  ;;  %698 = vmatprep.mubr.bf16.mxu1 %v5850_v0 }
  0xdd   : > { %672 = vmatprep.subr.bf16.mxu1 %v3785_v30  ;;  %918 = vmatpush1.bf16.msra.mxu0 %v3801_v33 }
  0xde   : > { %945 = vmatprep.mubr.bf16.mxu0 %v5850_v0  ;;  %919 = vmatprep.subr.bf16.mxu0 %v3809_v34 }
  0xe0   : > { %673 = vmatpush1.bf16.msra.mxu1 %v3783_v35 }
  0xe1   : > { %986 = vmatprep.subr.bf16.mxu1 %v3788_v36  ;;  %920 = vmatpush1.bf16.msra.mxu0 %v3807_v37 }
  0xe3   : > { %3543 = vmatmul.mubr.msk.bf16.vlgmr.msra.gmra.mrb[8].mxu1 %vm580_vm0, %v458_v17 }
  0xe4   : > { %987 = vmatpush1.bf16.msra.mxu1 %v3786_v40  ;;  %708 = vmatprep.mubr.bf16.mxu1 %v5850_v0 }
  0xe5   : > { %988 = vmatprep.subr.bf16.mxu1 %v3791_v41  ;;  %3563 = vmatmul.mubr.msk.bf16.vlgmr.msra.gmra.mrb[8].mxu0 %vm580_vm0, %v779_v42 }
  0xe6   : > { %955 = vmatprep.mubr.bf16.mxu0 %v5850_v0 }
  0xe8   : > { %989 = vmatpush1.bf16.msra.mxu1 %v3789_v43 }
  0xe9   : > { %990 = vmatprep.subr.bf16.mxu1 %v3797_v44 }
  0xeb   : > { %3544 = vmatmul.mubr.msk.bf16.gmra.mrb[12].mxu1 %vm580_vm0, %v459_v31 }
  0xec   : > { %718 = vmatprep.mubr.bf16.mxu1 %v5850_v0  ;;  %991 = vmatpush1.bf16.msra.mxu1 %v3795_v47 }
  0xed   : > { %992 = vmatprep.subr.bf16.mxu1 %v3806_v48  ;;  %3564 = vmatmul.mubr.msk.bf16.gmra.mrb[12].mxu0 %vm580_vm0, %v780_v49 }
  0xee   : > { %965 = vmatprep.mubr.bf16.mxu0 %v5850_v0 }
  0xf0   : > { %993 = vmatpush1.bf16.msra.mxu1 %v3804_v50 }
  0xf3   : > { %3545 = vmatmul.mubr.msk.bf16.gmra.mrb[16].mxu1 %vm580_vm0, %v4634_v14 }
  0xf4   : > { %728 = vmatprep.mubr.bf16.mxu1 %v5850_v0 }
  0xf5   : > { %3565 = vmatmul.mubr.msk.bf16.gmra.mrb[16].mxu0 %vm580_vm0, %v781_v53 }
  0xf6   : > { %975 = vmatprep.mubr.bf16.mxu0 %v5850_v0 }
  0xfb   : > { %3546 = vmatmul.mubr.msk.bf16.gmra.mrb[20].mxu1 %vm580_vm0, %v4645_v28 }
  0xfc   : > { %1018 = vmatprep.mubr.bf16.mxu1 %v5850_v0 }
  0xfd   : > { %3566 = vmatmul.mubr.msk.bf16.gmra.mrb[20].mxu0 %vm580_vm0, %v782_v56 }
 0x103   : > { %3567 = vmatmul.mubr.msk.bf16.vlgmr.msra.gmra.mrb[24].mxu1 %vm580_vm0, %v779_v42 }
 0x104   : > { %1028 = vmatprep.mubr.bf16.mxu1 %v5850_v0 }
 0x10b   : > { %3568 = vmatmul.mubr.msk.bf16.gmra.mrb[28].mxu1 %vm580_vm0, %v780_v49 }
 0x10c   : > { %1038 = vmatprep.mubr.bf16.mxu1 %v5850_v0 }
 0x113   : > { %3569 = vmatmul.mubr.msk.bf16.gmra.mrb[32].mxu1 %vm580_vm0, %v781_v53 }
 0x114   : > { %1048 = vmatprep.mubr.bf16.mxu1 %v5850_v0 }
 0x11b   : > { %3570 = vmatmul.mubr.msk.bf16.gmra.mrb[36].mxu1 %vm580_vm0, %v782_v56 }
 0x11c   : > { %4195 = shalt.err (!%p4192_p11)  }
 0x11d   : > { %s4196_s0 = scalar_lea.vmem %s447_s14, 1024  ;;  %p4201_p6 = scmp.lt.s32.totalorder %s447_s14, %s447_s14 }
 0x11e   : > { %p4197_p12 = scmp.ne.s32.totalorder %s447_s14, %s4196_s0  ;;  %p4202_p13 = scmp.lt.s32.totalorder %s4196_s0, %s4196_s0 }
 0x120   : > { %p4203_p9 = por %p4202_p13, %p4201_p6 }
 0x122   : > { %p4204_p10 = pnand %p4203_p9, %p4197_p12 }
 0x124   : > { %4207 = shalt.err (!%p4204_p10)  }
 0x125   : > { %449 = dma.hbm_to_vmem [thread:$0]  %s5834_s8, 1024, %s447_s14, [#allocation8 + $0x2]  ;;  %v480_v57 = vlaneseq  ;;  %v478_v60 = vld [vmem:[%s5830_s4] sm:$0xf] }
 0x126   : > { %v4740_v35 = vld [vmem:[%s5833_s7] sm:$0xf]  ;;  %s4871_s13 = scalar_lea.vmem [#allocation17], %s4592_s30 }
 0x127   : > { %v4696_v58 = vshrl.u32 %v480_v57, 7 }
 0x129   : > { %v482_v59 = vsub.s32 0, %v4696_v58  ;;  %v486_v61 = vsub.s32 1, %v4696_v58  ;;  %v490_v21 = vsub.s32 2, %v4696_v58  ;;  %v494_v26 = vsub.s32 3, %v4696_v58 }
 0x12b   : > { %v483_v62 = vrot.slane %v478_v60, %v482_v59  ;;  %v487_v63 = vrot.slane %v478_v60, %v486_v61  ;;  %v491_v36 = vrot.slane %v478_v60, %v490_v21  ;;  %v495_v37 = vrot.slane %v478_v60, %v494_v26 }
 0x12c   : > { %v4747_v38 = vrot.slane %v4740_v35, %v482_v59  ;;  %v4750_v40 = vrot.slane %v4740_v35, %v486_v61 }
 0x1a6   : > { %v647_v1 = vpop.f32.mrb[0].mxu1  ;;  %v627_v2 = vpop.f32.mrb[0].mxu0 }
 0x1a7   : > { %v4703_v3 = vadd.f32 %v647_v1, %v483_v62  ;;  %v649_v4 = vpop.f32.mrb[1].mxu1  ;;  %v4705_v5 = vadd.f32 %v627_v2, %v483_v62  ;;  %v629_v6 = vpop.f32.mrb[1].mxu0 }
 0x1a8   : > { %v4707_v7 = vadd.f32 %v649_v4, %v487_v63  ;;  %v651_v8 = vpop.f32.mrb[2].mxu1  ;;  %v4709_v9 = vadd.f32 %v629_v6, %v487_v63  ;;  %v631_v10 = vpop.f32.mrb[2].mxu0 }
 0x1a9   : > { %5884 = vst [vmem:[#allocation40_spill] sm:$0xff] %v4703_v3  ;;  %v4711_v11 = vadd.f32 %v651_v8, %v483_v62  ;;  %v653_v12 = vpop.f32.mrb[3].mxu1  ;;  %v4713_v13 = vadd.f32 %v631_v10, %v483_v62  ;;  %v633_v14 = vpop.f32.mrb[3].mxu0 }
 0x1aa   : > { %5885 = vst [vmem:[#allocation41_spill] sm:$0xff] %v4707_v7  ;;  %v4715_v15 = vadd.f32 %v653_v12, %v487_v63  ;;  %v4717_v16 = vadd.f32 %v633_v14, %v487_v63 }
 0x1ab   : > { %5886 = vst [vmem:[#allocation42_spill] sm:$0xff] %v4711_v11 }
 0x1ac   : > { %5887 = vst [vmem:[#allocation43_spill] sm:$0xff] %v4715_v15 }
 0x1ae   : > { %v657_v17 = vpop.f32.mrb[4].mxu1  ;;  %v637_v18 = vpop.f32.mrb[4].mxu0 }
 0x1af   : > { %v4719_v19 = vadd.f32 %v657_v17, %v483_v62  ;;  %v659_v20 = vpop.f32.mrb[5].mxu1  ;;  %v4722_v22 = vadd.f32 %v637_v18, %v483_v62  ;;  %v639_v23 = vpop.f32.mrb[5].mxu0 }
 0x1b0   : > { %v4724_v24 = vadd.f32 %v659_v20, %v487_v63  ;;  %v661_v25 = vpop.f32.mrb[6].mxu1  ;;  %v4727_v27 = vadd.f32 %v639_v23, %v487_v63  ;;  %v641_v28 = vpop.f32.mrb[6].mxu0 }
 0x1b1   : > { %5888 = vst [vmem:[#allocation44_spill] sm:$0xff] %v4719_v19  ;;  %v4729_v29 = vadd.f32 %v661_v25, %v483_v62  ;;  %v663_v30 = vpop.f32.mrb[7].mxu1  ;;  %v4731_v31 = vadd.f32 %v641_v28, %v483_v62  ;;  %v643_v32 = vpop.f32.mrb[7].mxu0 }
 0x1b2   : > { %5889 = vst [vmem:[#allocation45_spill] sm:$0xff] %v4724_v24  ;;  %v4733_v33 = vadd.f32 %v663_v30, %v487_v63  ;;  %v4735_v34 = vadd.f32 %v643_v32, %v487_v63 }
 0x1b3   : > { %5890 = vst [vmem:[#allocation46_spill] sm:$0xff] %v4729_v29 }
 0x1b4   : > { %5891 = vst [vmem:[#allocation47_spill] sm:$0xff] %v4733_v33 }
 0x1b6   : > { %v700_v39 = vpop.f32.mrb[8].mxu1 }
 0x1b7   : > { %v4752_v41 = vadd.f32 %v700_v39, %v491_v36  ;;  %v702_v42 = vpop.f32.mrb[9].mxu1 }
 0x1b8   : > { %v4754_v43 = vadd.f32 %v702_v42, %v495_v37  ;;  %v704_v44 = vpop.f32.mrb[10].mxu1  ;;  %v947_v45 = vpop.f32.mrb[8].mxu0 }
 0x1b9   : > { %v4756_v46 = vadd.f32 %v704_v44, %v491_v36  ;;  %v706_v47 = vpop.f32.mrb[11].mxu1  ;;  %v4759_v48 = vadd.f32 %v947_v45, %v4747_v38  ;;  %v949_v49 = vpop.f32.mrb[9].mxu0 }
 0x1ba   : > { %v4761_v50 = vadd.f32 %v706_v47, %v495_v37  ;;  %v4764_v51 = vadd.f32 %v949_v49, %v4750_v40  ;;  %v951_v52 = vpop.f32.mrb[10].mxu0 }
 0x1bb   : > { %5892 = vst [vmem:[#allocation48_spill] sm:$0xff] %v4759_v48  ;;  %v4767_v53 = vadd.f32 %v951_v52, %v4747_v38  ;;  %v953_v54 = vpop.f32.mrb[11].mxu0 }
 0x1bc   : > { %5893 = vst [vmem:[#allocation49_spill] sm:$0xff] %v4764_v51  ;;  %v4770_v55 = vadd.f32 %v953_v54, %v4750_v40 }
 0x1bd   : > { %5894 = vst [vmem:[#allocation50_spill] sm:$0xff] %v4767_v53 }
 0x1be   : > { %5895 = vst [vmem:[#allocation51_spill] sm:$0xff] %v4770_v55  ;;  %v710_v56 = vpop.f32.mrb[12].mxu1 }
 0x1bf   : > { %v4772_v57 = vadd.f32 %v710_v56, %v491_v36  ;;  %v712_v59 = vpop.f32.mrb[13].mxu1 }
 0x1c0   : > { %v4774_v60 = vadd.f32 %v712_v59, %v495_v37  ;;  %v714_v61 = vpop.f32.mrb[14].mxu1  ;;  %v957_v62 = vpop.f32.mrb[12].mxu0 }
 0x1c1   : > { %v4776_v63 = vadd.f32 %v714_v61, %v491_v36  ;;  %v716_v1 = vpop.f32.mrb[15].mxu1  ;;  %v4779_v2 = vadd.f32 %v957_v62, %v4747_v38  ;;  %v959_v4 = vpop.f32.mrb[13].mxu0 }
 0x1c2   : > { %v4781_v6 = vadd.f32 %v716_v1, %v495_v37  ;;  %v4784_v8 = vadd.f32 %v959_v4, %v4750_v40  ;;  %v961_v10 = vpop.f32.mrb[14].mxu0 }
 0x1c3   : > { %5896 = vst [vmem:[#allocation52_spill] sm:$0xff] %v4776_v63  ;;  %5897 = vst [vmem:[#allocation53_spill] sm:$0xff] %v4779_v2  ;;  %v4787_v12 = vadd.f32 %v961_v10, %v4747_v38  ;;  %v963_v14 = vpop.f32.mrb[15].mxu0 }
 0x1c4   : > { %5898 = vst [vmem:[#allocation54_spill] sm:$0xff] %v4784_v8  ;;  %v4790_v17 = vadd.f32 %v963_v14, %v4750_v40 }
 0x1c5   : > { %5899 = vst [vmem:[#allocation55_spill] sm:$0xff] %v4787_v12 }
 0x1c6   : > { %5900 = vst [vmem:[#allocation56_spill] sm:$0xff] %v4790_v17  ;;  %v720_v18 = vpop.f32.mrb[16].mxu1 }
 0x1c7   : > { %v4792_v20 = vadd.f32 %v720_v18, %v491_v36  ;;  %v722_v23 = vpop.f32.mrb[17].mxu1 }
 0x1c8   : > { %v4794_v25 = vadd.f32 %v722_v23, %v495_v37  ;;  %v724_v28 = vpop.f32.mrb[18].mxu1  ;;  %v967_v30 = vpop.f32.mrb[16].mxu0 }
 0x1c9   : > { %5901 = vst [vmem:[#allocation57_spill] sm:$0xff] %v4792_v20  ;;  %v4796_v32 = vadd.f32 %v724_v28, %v491_v36  ;;  %v726_v39 = vpop.f32.mrb[19].mxu1  ;;  %v4799_v42 = vadd.f32 %v967_v30, %v4747_v38  ;;  %v969_v44 = vpop.f32.mrb[17].mxu0 }
 0x1ca   : > { %5902 = vst [vmem:[#allocation58_spill] sm:$0xff] %v4794_v25  ;;  %v4801_v45 = vadd.f32 %v726_v39, %v495_v37  ;;  %v4804_v47 = vadd.f32 %v969_v44, %v4750_v40  ;;  %v971_v49 = vpop.f32.mrb[18].mxu0 }
 0x1cb   : > { %5903 = vst [vmem:[#allocation59_spill] sm:$0xff] %v4796_v32  ;;  %5904 = vst [vmem:[#allocation60_spill] sm:$0xff] %v4799_v42  ;;  %v4807_v52 = vadd.f32 %v971_v49, %v4747_v38  ;;  %v973_v54 = vpop.f32.mrb[19].mxu0  ;;  %v812_v49 = vrot.slane %v4740_v35, %v490_v21 }
 0x1cc   : > { %5905 = vst [vmem:[#allocation61_spill] sm:$0xff] %v4801_v45  ;;  %5906 = vst [vmem:[#allocation62_spill] sm:$0xff] %v4804_v47  ;;  %v4810_v56 = vadd.f32 %v973_v54, %v4750_v40 }
 0x1cd   : > { %5907 = vst [vmem:[#allocation63_spill] sm:$0xff] %v4807_v52 }
 0x1ce   : > { %5908 = vst [vmem:[#allocation64_spill] sm:$0xff] %v4810_v56  ;;  %v730_v59 = vpop.f32.mrb[20].mxu1 }
 0x1cf   : > { %v4812_v61 = vadd.f32 %v730_v59, %v491_v36  ;;  %v732_v62 = vpop.f32.mrb[21].mxu1  ;;  %v816_v59 = vrot.slane %v4740_v35, %v494_v26 }
 0x1d0   : > { %v4814_v1 = vadd.f32 %v732_v62, %v495_v37  ;;  %v734_v4 = vpop.f32.mrb[22].mxu1  ;;  %v977_v10 = vpop.f32.mrb[20].mxu0 }
 0x1d1   : > { %5909 = vst [vmem:[#allocation65_spill] sm:$0xff] %v4812_v61  ;;  %v4816_v14 = vadd.f32 %v734_v4, %v491_v36  ;;  %v736_v18 = vpop.f32.mrb[23].mxu1  ;;  %v4819_v23 = vadd.f32 %v977_v10, %v4747_v38  ;;  %v979_v28 = vpop.f32.mrb[21].mxu0 }
 0x1d2   : > { %5910 = vst [vmem:[#allocation66_spill] sm:$0xff] %v4814_v1  ;;  %v4821_v30 = vadd.f32 %v736_v18, %v495_v37  ;;  %v4824_v39 = vadd.f32 %v979_v28, %v4750_v40  ;;  %v981_v44 = vpop.f32.mrb[22].mxu0 }
 0x1d3   : > { %5911 = vst [vmem:[#allocation67_spill] sm:$0xff] %v4816_v14  ;;  %5912 = vst [vmem:[#allocation68_spill] sm:$0xff] %v4819_v23  ;;  %v4830_v54 = vadd.f32 %v981_v44, %v4747_v38  ;;  %v983_v36 = vpop.f32.mrb[23].mxu0 }
 0x1d4   : > { %5913 = vst [vmem:[#allocation69_spill] sm:$0xff] %v4821_v30  ;;  %5914 = vst [vmem:[#allocation70_spill] sm:$0xff] %v4824_v39  ;;  %v4836_v62 = vadd.f32 %v983_v36, %v4750_v40 }
 0x1d5   : > { %5915 = vst [vmem:[#allocation71_spill] sm:$0xff] %v4830_v54 }
 0x1d6   : > { %5916 = vst [vmem:[#allocation72_spill] sm:$0xff] %v4836_v62  ;;  %v1020_v37 = vpop.f32.mrb[24].mxu1 }
 0x1d7   : > { %v4838_v4 = vadd.f32 %v1020_v37, %v812_v49  ;;  %v1022_v10 = vpop.f32.mrb[25].mxu1 }
 0x1d8   : > { %v4840_v18 = vadd.f32 %v1022_v10, %v816_v59  ;;  %v1024_v28 = vpop.f32.mrb[26].mxu1 }
 0x1d9   : > { %5917 = vst [vmem:[#allocation73_spill] sm:$0xff] %v4838_v4  ;;  %v4842_v0 = vadd.f32 %v1024_v28, %v812_v49  ;;  %v1026_v21 = vpop.f32.mrb[27].mxu1 }
 0x1da   : > { %5918 = vst [vmem:[#allocation74_spill] sm:$0xff] %v4840_v18  ;;  %v4844_v38 = vadd.f32 %v1026_v21, %v816_v59 }
 0x1db   : > { %5919 = vst [vmem:[#allocation75_spill] sm:$0xff] %v4842_v0 }
 0x1dc   : > { %5920 = vst [vmem:[#allocation76_spill] sm:$0xff] %v4844_v38 }
 0x1de   : > { %v1030_v44 = vpop.f32.mrb[28].mxu1 }
 0x1df   : > { %v4846_v54 = vadd.f32 %v1030_v44, %v812_v49  ;;  %v1032_v58 = vpop.f32.mrb[29].mxu1 }
 0x1e0   : > { %v4848_v26 = vadd.f32 %v1032_v58, %v816_v59  ;;  %v1034_v35 = vpop.f32.mrb[30].mxu1 }
 0x1e1   : > { %5921 = vst [vmem:[#allocation77_spill] sm:$0xff] %v4846_v54  ;;  %v4850_v40 = vadd.f32 %v1034_v35, %v812_v49  ;;  %v1036_v36 = vpop.f32.mrb[31].mxu1 }
 0x1e2   : > { %5922 = vst [vmem:[#allocation78_spill] sm:$0xff] %v4848_v26  ;;  %v4852_v37 = vadd.f32 %v1036_v36, %v816_v59 }
 0x1e3   : > { %5923 = vst [vmem:[#allocation79_spill] sm:$0xff] %v4850_v40 }
 0x1e4   : > { %5924 = vst [vmem:[#allocation80_spill] sm:$0xff] %v4852_v37 }
 0x1e6   : > { %v1040_v10 = vpop.f32.mrb[32].mxu1 }
 0x1e7   : > { %v4854_v62 = vadd.f32 %v1040_v10, %v812_v49  ;;  %v1042_v28 = vpop.f32.mrb[33].mxu1 }
 0x1e8   : > { %v4856_v39 = vadd.f32 %v1042_v28, %v816_v59  ;;  %v1044_v21 = vpop.f32.mrb[34].mxu1 }
 0x1e9   : > { %5925 = vst [vmem:[#allocation81_spill] sm:$0xff] %v4854_v62  ;;  %v4858_v23 = vadd.f32 %v1044_v21, %v812_v49  ;;  %v1046_v44 = vpop.f32.mrb[35].mxu1 }
 0x1ea   : > { %5926 = vst [vmem:[#allocation82_spill] sm:$0xff] %v4856_v39  ;;  %v4860_v56 = vadd.f32 %v1046_v44, %v816_v59 }
 0x1eb   : > { %5927 = vst [vmem:[#allocation83_spill] sm:$0xff] %v4858_v23 }
 0x1ec   : > { %5928 = vst [vmem:[#allocation84_spill] sm:$0xff] %v4860_v56 }
 0x1ee   : > { %v1050_v58 = vpop.f32.mrb[36].mxu1 }
 0x1ef   : > { %v4862_v52 = vadd.f32 %v1050_v58, %v812_v49  ;;  %v1052_v35 = vpop.f32.mrb[37].mxu1 }
 0x1f0   : > { %v4864_v47 = vadd.f32 %v1052_v35, %v816_v59  ;;  %v1054_v36 = vpop.f32.mrb[38].mxu1 }
 0x1f1   : > { %5929 = vst [vmem:[#allocation85_spill] sm:$0xff] %v4862_v52  ;;  %v4866_v42 = vadd.f32 %v1054_v36, %v812_v49  ;;  %v1056_v10 = vpop.f32.mrb[39].mxu1 }
 0x1f2   : > { %5930 = vst [vmem:[#allocation86_spill] sm:$0xff] %v4864_v47  ;;  %v4868_v62 = vadd.f32 %v1056_v10, %v816_v59 }
 0x1f3   : > { %5931 = vst [vmem:[#allocation87_spill] sm:$0xff] %v4866_v42 }
 0x1f4   : > { %5932 = vst [vmem:[#allocation88_spill] sm:$0xff] %v4868_v62 }
 0x1f5   : > { %4268 = dma.done.wait [#allocation8], 4096 }
 0x1f6   : > { %4269 = vsyncadd [#allocation8], 4294963200  ;;  %v5933_v28 = vmov 0   ;;  %v4875_v21 = vld [vmem:[#allocation5 + $0x8] sm:$0xff]  ;;  %v4877_v44 = vld [vmem:[#allocation5] sm:$0xff] }
 0x1f7   : > { %1163 = vmatprep.mubr.bf16.mxu0 %v5933_v28  ;;  %1204 = vmatprep.mubr.bf16.mxu1 %v5933_v28  ;;  %v4879_v58 = vld [vmem:[#allocation5 + $0x28] sm:$0xff]  ;;  %v4883_v49 = vld [vmem:[#allocation5 + $0x18] sm:$0xff]  ;;  %v4886_v59 = vld [vmem:[#allocation5 + $0x20] sm:$0xff] }
 0x1f8   : > { %1131 = vmatprep.subr.bf16.mxu0 %v4875_v21  ;;  %1172 = vmatprep.subr.bf16.mxu1 %v4883_v49  ;;  %v4889_v35 = vld [vmem:[#allocation5 + $0x10] sm:$0xff]  ;;  %v4891_v36 = vld [vmem:[#allocation5 + $0x38] sm:$0xff]  ;;  %v4893_v10 = vld [vmem:[#allocation5 + $0x48] sm:$0xff] }
 0x1f9   : > { %1132 = vmatpush1.bf16.msra.mxu0 %v4877_v44  ;;  %1173 = vmatpush1.bf16.msra.mxu1 %v4889_v35  ;;  %v4897_v42 = vld [vmem:[#allocation5 + $0x30] sm:$0xff]  ;;  %v4900_v62 = vld [vmem:[#allocation5 + $0x58] sm:$0xff]  ;;  %v4903_v52 = vld [vmem:[#allocation5 + $0x40] sm:$0xff] }
 0x1fa   : > { %1133 = vmatprep.subr.bf16.mxu0 %v4879_v58  ;;  %1174 = vmatprep.subr.bf16.mxu1 %v4891_v36  ;;  %v4905_v47 = vld [vmem:[#allocation5 + $0x68] sm:$0xff]  ;;  %v4909_v23 = vld [vmem:[#allocation5 + $0x50] sm:$0xff]  ;;  %v4912_v56 = vld [vmem:[#allocation5 + $0x78] sm:$0xff] }
 0x1fb   : > { %v4915_v39 = vld [vmem:[#allocation5 + $0x60] sm:$0xff]  ;;  %v4917_v40 = vld [vmem:[#allocation5 + $0x88] sm:$0xff]  ;;  %v4921_v37 = vld [vmem:[#allocation5 + $0x70] sm:$0xff] }
 0x1fc   : > { %v4924_v17 = vld [vmem:[#allocation5 + $0x98] sm:$0xff]  ;;  %v4927_v12 = vld [vmem:[#allocation5 + $0x80] sm:$0xff]  ;;  %v4929_v54 = vld [vmem:[#allocation5 + $0xa8] sm:$0xff] }
 0x1fd   : > { %1134 = vmatpush1.bf16.msra.mxu0 %v4886_v59  ;;  %1175 = vmatpush1.bf16.msra.mxu1 %v4897_v42  ;;  %v4933_v26 = vld [vmem:[#allocation5 + $0x90] sm:$0xff]  ;;  %v4936_v8 = vld [vmem:[#allocation5 + $0xb8] sm:$0xff]  ;;  %v4939_v2 = vld [vmem:[#allocation5 + $0xa0] sm:$0xff] }
 0x1fe   : > { %1135 = vmatprep.subr.bf16.mxu0 %v4893_v10  ;;  %1176 = vmatprep.subr.bf16.mxu1 %v4900_v62  ;;  %v4941_v0 = vld [vmem:[#allocation5 + $0xc8] sm:$0xff]  ;;  %v4945_v38 = vld [vmem:[#allocation5 + $0xb0] sm:$0xff]  ;;  %v4948_v55 = vld [vmem:[#allocation5 + $0xd8] sm:$0xff] }
 0x1ff   : > { %v4951_v53 = vld [vmem:[#allocation5 + $0xc0] sm:$0xff]  ;;  %v4953_v4 = vld [vmem:[#allocation5 + $0xe8] sm:$0xff]  ;;  %v4957_v18 = vld [vmem:[#allocation5 + $0xd0] sm:$0xff] }
 0x200   : > { %v4960_v51 = vld [vmem:[#allocation5 + $0xf8] sm:$0xff]  ;;  %v4963_v48 = vld [vmem:[#allocation5 + $0xe0] sm:$0xff]  ;;  %v4967_v14 = vld [vmem:[#allocation5 + $0xf0] sm:$0xff] }
 0x201   : > { %1136 = vmatpush1.bf16.msra.mxu0 %v4903_v52  ;;  %1177 = vmatpush1.bf16.msra.mxu1 %v4909_v23 }
 0x202   : > { %1137 = vmatprep.subr.bf16.mxu0 %v4905_v47  ;;  %1178 = vmatprep.subr.bf16.mxu1 %v4912_v56 }
 0x205   : > { %1138 = vmatpush1.bf16.msra.mxu0 %v4915_v39  ;;  %1179 = vmatpush1.bf16.msra.mxu1 %v4921_v37 }
 0x206   : > { %1139 = vmatprep.subr.bf16.mxu0 %v4917_v40  ;;  %1180 = vmatprep.subr.bf16.mxu1 %v4924_v17 }
 0x209   : > { %1140 = vmatpush1.bf16.msra.mxu0 %v4927_v12  ;;  %1181 = vmatpush1.bf16.msra.mxu1 %v4933_v26 }
 0x20a   : > { %1141 = vmatprep.subr.bf16.mxu0 %v4929_v54  ;;  %1182 = vmatprep.subr.bf16.mxu1 %v4936_v8 }
 0x20d   : > { %1142 = vmatpush1.bf16.msra.mxu0 %v4939_v2  ;;  %1183 = vmatpush1.bf16.msra.mxu1 %v4945_v38 }
 0x20e   : > { %1143 = vmatprep.subr.bf16.mxu0 %v4941_v0  ;;  %1184 = vmatprep.subr.bf16.mxu1 %v4948_v55 }
 0x211   : > { %1144 = vmatpush1.bf16.msra.mxu0 %v4951_v53  ;;  %1185 = vmatpush1.bf16.msra.mxu1 %v4957_v18 }
 0x212   : > { %1145 = vmatprep.subr.bf16.mxu0 %v4953_v4  ;;  %1186 = vmatprep.subr.bf16.mxu1 %v4960_v51 }
 0x215   : > { %1146 = vmatpush1.bf16.msra.mxu0 %v4963_v48  ;;  %1187 = vmatpush1.bf16.msra.mxu1 %v4967_v14 }
 0x216   : > { %1247 = vmatprep.subr.bf16.mxu0 %v4875_v21  ;;  %1288 = vmatprep.subr.bf16.mxu1 %v4883_v49 }
 0x218   : > { %1164 = vmatmul.mubr.bf16.vlgmr.msra.gmra.mrb[24].mxu0 %v5933_v28  ;;  %1205 = vmatmul.mubr.bf16.vlgmr.msra.gmra.mrb[40].mxu1 %v5933_v28 }
 0x219   : > { %1248 = vmatpush1.bf16.msra.mxu0 %v4877_v44  ;;  %1279 = vmatprep.mubr.bf16.mxu0 %v5933_v28 }
 0x21a   : > { %1249 = vmatprep.subr.bf16.mxu0 %v4879_v58  ;;  %1289 = vmatpush1.bf16.msra.mxu1 %v4889_v35 }
 0x21b   : > { %1320 = vmatprep.mubr.bf16.mxu1 %v5933_v28  ;;  %1290 = vmatprep.subr.bf16.mxu1 %v4891_v36 }
 0x21d   : > { %1250 = vmatpush1.bf16.msra.mxu0 %v4886_v59 }
 0x21e   : > { %1251 = vmatprep.subr.bf16.mxu0 %v4893_v10  ;;  %1291 = vmatpush1.bf16.msra.mxu1 %v4897_v42 }
 0x21f   : > { %1292 = vmatprep.subr.bf16.mxu1 %v4900_v62 }
 0x221   : > { %1252 = vmatpush1.bf16.msra.mxu0 %v4903_v52 }
 0x222   : > { %1253 = vmatprep.subr.bf16.mxu0 %v4905_v47  ;;  %1293 = vmatpush1.bf16.msra.mxu1 %v4909_v23 }
 0x223   : > { %1294 = vmatprep.subr.bf16.mxu1 %v4912_v56 }
 0x225   : > { %1254 = vmatpush1.bf16.msra.mxu0 %v4915_v39 }
 0x226   : > { %1255 = vmatprep.subr.bf16.mxu0 %v4917_v40  ;;  %1295 = vmatpush1.bf16.msra.mxu1 %v4921_v37 }
 0x227   : > { %1296 = vmatprep.subr.bf16.mxu1 %v4924_v17 }
 0x229   : > { %1256 = vmatpush1.bf16.msra.mxu0 %v4927_v12 }
 0x22a   : > { %1257 = vmatprep.subr.bf16.mxu0 %v4929_v54  ;;  %1297 = vmatpush1.bf16.msra.mxu1 %v4933_v26 }
 0x22b   : > { %1298 = vmatprep.subr.bf16.mxu1 %v4936_v8 }
 0x22d   : > { %1258 = vmatpush1.bf16.msra.mxu0 %v4939_v2 }
 0x22e   : > { %1259 = vmatprep.subr.bf16.mxu0 %v4941_v0  ;;  %1299 = vmatpush1.bf16.msra.mxu1 %v4945_v38 }
 0x22f   : > { %1300 = vmatprep.subr.bf16.mxu1 %v4948_v55 }
 0x231   : > { %1260 = vmatpush1.bf16.msra.mxu0 %v4951_v53 }
 0x232   : > { %1261 = vmatprep.subr.bf16.mxu0 %v4953_v4  ;;  %1301 = vmatpush1.bf16.msra.mxu1 %v4957_v18 }
 0x233   : > { %1302 = vmatprep.subr.bf16.mxu1 %v4960_v51 }
 0x235   : > { %1262 = vmatpush1.bf16.msra.mxu0 %v4963_v48 }
 0x236   : > { %1363 = vmatprep.subr.bf16.mxu0 %v4875_v21  ;;  %1303 = vmatpush1.bf16.msra.mxu1 %v4967_v14 }
 0x237   : > { %1404 = vmatprep.subr.bf16.mxu1 %v4883_v49 }
 0x2eb   : > { %v1165_v30 = vpop.f32.mrb[24].mxu0  ;;  %v1206_v24 = vpop.f32.mrb[40].mxu1 }
 0x2ec   : > { %v1213_v33 = vadd.f32 %v1165_v30, %v4705_v5  ;;  %v1167_v29 = vpop.f32.mrb[25].mxu0  ;;  %v1208_v45 = vpop.f32.mrb[41].mxu1  ;;  %v1215_v3 = vadd.f32 %v1206_v24, %v4752_v41 }
 0x2ed   : > { %v1214_v61 = vadd.f32 %v1167_v29, %v4709_v9  ;;  %v1169_v1 = vpop.f32.mrb[26].mxu0  ;;  %v1210_v11 = vpop.f32.mrb[42].mxu1  ;;  %v1216_v25 = vadd.f32 %v1208_v45, %v4754_v43 }
 0x2ee   : > { %v3571_v19 = vmul.f32 -1.442695, %v1213_v33  ;;  %v1170_v32 = vpop.f32.mrb[27].mxu0  ;;  %v1211_v20 = vpop.f32.mrb[43].mxu1 }
 0x2ef   : > { %v3572_v15 = vmul.f32 -1.442695, %v1214_v61  ;;  %v3573_v7 = vmul.f32 -1.442695, %v1216_v25 }
 0x2f0   : > { %3810 = vpow2.f32 %v3571_v19 }
 0x2f1   : > { %3812 = vpow2.f32 %v3572_v15 }
 0x2f2   : > { %3814 = vpow2.f32 %v3573_v7 }
 0x2f3   : > { %3816 = vtanh.f32 %v1215_v3 }
 0x2fa   : > { %v3811_v63 = vpop.eup %3810 }
 0x2fb   : > { %v3813_v5 = vpop.eup %3812  ;;  %v1220_v30 = vadd.f32 1.0, %v3811_v63 }
 0x2fc   : > { %v1226_v9 = vadd.f32 1.0, %v3813_v5  ;;  %v3815_v29 = vpop.eup %3814 }
 0x2fd   : > { %3818 = vrcp.f32 %v1220_v30  ;;  %v3817_v33 = vpop.eup %3816  ;;  %v1233_v11 = vadd.f32 1.0, %v3815_v29 }
 0x2fe   : > { %3820 = vrcp.f32 %v1226_v9 }
 0x2ff   : > { %3822 = vrcp.f32 %v1233_v11 }
 0x307   : > { %v3819_v32 = vpop.eup %3818 }
 0x308   : > { %v3821_v19 = vpop.eup %3820  ;;  %v1237_v20 = vmul.f32 %v3819_v32, %v3817_v33 }
 0x309   : > { %v1236_v15 = vmul.f32 0.0, %v3821_v19  ;;  %v3823_v24 = vpop.eup %3822 }
 0x30b   : > { %v5013_v61 = vadd.f32 %v1237_v20, %v1236_v15 }
 0x30d   : > { %3824 = vtanh.f32 %v5013_v61 }
 0x317   : > { %v3825_v7 = vpop.eup %3824 }
 0x318   : > { %v1240_v41 = vmul.f32 %v3825_v7, %v3823_v24 }
 0x31a   : > { %v1241_v43 = vpack.c.bf16 %v1240_v41, %v1240_v41 }
 0x31c   : > { %1280 = vmatmul.mubr.bf16.vlgmr.msra.gmra.mrb[28].mxu0 %v1241_v43  ;;  %1321 = vmatmul.mubr.bf16.vlgmr.msra.gmra.mrb[44].mxu1 %v1241_v43 }
 0x31d   : > { %1364 = vmatpush1.bf16.msra.mxu0 %v4877_v44  ;;  %1405 = vmatpush1.bf16.msra.mxu1 %v4889_v35 }
 0x31e   : > { %1365 = vmatprep.subr.bf16.mxu0 %v4879_v58  ;;  %1406 = vmatprep.subr.bf16.mxu1 %v4891_v36 }
 0x31f   : > { %1395 = vmatprep.mubr.bf16.mxu0 %v5933_v28  ;;  %1436 = vmatprep.mubr.bf16.mxu1 %v5933_v28 }
 0x321   : > { %1366 = vmatpush1.bf16.msra.mxu0 %v4886_v59  ;;  %1407 = vmatpush1.bf16.msra.mxu1 %v4897_v42 }
 0x322   : > { %1367 = vmatprep.subr.bf16.mxu0 %v4893_v10  ;;  %1408 = vmatprep.subr.bf16.mxu1 %v4900_v62 }
 0x325   : > { %1368 = vmatpush1.bf16.msra.mxu0 %v4903_v52  ;;  %1409 = vmatpush1.bf16.msra.mxu1 %v4909_v23 }
 0x326   : > { %1369 = vmatprep.subr.bf16.mxu0 %v4905_v47  ;;  %1410 = vmatprep.subr.bf16.mxu1 %v4912_v56 }
 0x329   : > { %1370 = vmatpush1.bf16.msra.mxu0 %v4915_v39  ;;  %1411 = vmatpush1.bf16.msra.mxu1 %v4921_v37 }
 0x32a   : > { %1371 = vmatprep.subr.bf16.mxu0 %v4917_v40  ;;  %1412 = vmatprep.subr.bf16.mxu1 %v4924_v17 }
 0x32d   : > { %1372 = vmatpush1.bf16.msra.mxu0 %v4927_v12  ;;  %1413 = vmatpush1.bf16.msra.mxu1 %v4933_v26 }
 0x32e   : > { %1373 = vmatprep.subr.bf16.mxu0 %v4929_v54  ;;  %1414 = vmatprep.subr.bf16.mxu1 %v4936_v8 }
 0x331   : > { %1374 = vmatpush1.bf16.msra.mxu0 %v4939_v2  ;;  %1415 = vmatpush1.bf16.msra.mxu1 %v4945_v38 }
 0x332   : > { %1375 = vmatprep.subr.bf16.mxu0 %v4941_v0  ;;  %1416 = vmatprep.subr.bf16.mxu1 %v4948_v55 }
 0x335   : > { %1376 = vmatpush1.bf16.msra.mxu0 %v4951_v53  ;;  %1417 = vmatpush1.bf16.msra.mxu1 %v4957_v18 }
 0x336   : > { %1377 = vmatprep.subr.bf16.mxu0 %v4953_v4  ;;  %1418 = vmatprep.subr.bf16.mxu1 %v4960_v51 }
 0x339   : > { %1378 = vmatpush1.bf16.msra.mxu0 %v4963_v48  ;;  %1419 = vmatpush1.bf16.msra.mxu1 %v4967_v14 }
 0x33a   : > { %1479 = vmatprep.subr.bf16.mxu0 %v4875_v21  ;;  %1520 = vmatprep.subr.bf16.mxu1 %v4883_v49 }
 0x3ef   : > { %v1281_v3 = vpop.f32.mrb[28].mxu0  ;;  %v1322_v63 = vpop.f32.mrb[44].mxu1 }
 0x3f0   : > { %v1329_v25 = vadd.f32 %v1281_v3, %v4713_v13  ;;  %v1283_v45 = vpop.f32.mrb[29].mxu0  ;;  %v1324_v1 = vpop.f32.mrb[45].mxu1  ;;  %v1331_v15 = vadd.f32 %v1322_v63, %v4756_v46 }
 0x3f1   : > { %v1330_v5 = vadd.f32 %v1283_v45, %v4717_v16  ;;  %v1285_v30 = vpop.f32.mrb[30].mxu0  ;;  %v1326_v9 = vpop.f32.mrb[46].mxu1  ;;  %v1332_v19 = vadd.f32 %v1324_v1, %v4761_v50 }
 0x3f2   : > { %v3574_v29 = vmul.f32 -1.442695, %v1329_v25  ;;  %v1286_v33 = vpop.f32.mrb[31].mxu0  ;;  %v1327_v32 = vpop.f32.mrb[47].mxu1 }
 0x3f3   : > { %v3575_v11 = vmul.f32 -1.442695, %v1330_v5  ;;  %v3576_v20 = vmul.f32 -1.442695, %v1332_v19 }
 0x3f4   : > { %3826 = vpow2.f32 %v3574_v29 }
 0x3f5   : > { %3828 = vpow2.f32 %v3575_v11 }
 0x3f6   : > { %3830 = vpow2.f32 %v3576_v20 }
 0x3f7   : > { %3832 = vtanh.f32 %v1331_v15 }
 0x3fe   : > { %v3827_v24 = vpop.eup %3826 }
 0x3ff   : > { %v3829_v7 = vpop.eup %3828  ;;  %v1336_v13 = vadd.f32 1.0, %v3827_v24 }
 0x400   : > { %v1342_v41 = vadd.f32 1.0, %v3829_v7  ;;  %v3831_v16 = vpop.eup %3830 }
 0x401   : > { %3834 = vrcp.f32 %v1336_v13  ;;  %v3833_v43 = vpop.eup %3832  ;;  %v1349_v5 = vadd.f32 1.0, %v3831_v16 }
 0x402   : > { %3836 = vrcp.f32 %v1342_v41 }
 0x403   : > { %3838 = vrcp.f32 %v1349_v5 }
 0x40b   : > { %v3835_v3 = vpop.eup %3834 }
 0x40c   : > { %v3837_v25 = vpop.eup %3836  ;;  %v1353_v45 = vmul.f32 %v3835_v3, %v3833_v43 }
 0x40d   : > { %v1352_v30 = vmul.f32 %v3837_v25, %v5013_v61  ;;  %v3839_v46 = vpop.eup %3838 }
 0x40f   : > { %v5055_v50 = vadd.f32 %v1353_v45, %v1352_v30 }
 0x411   : > { %3840 = vtanh.f32 %v5055_v50 }
 0x41b   : > { %v3841_v63 = vpop.eup %3840 }
 0x41c   : > { %v1356_v1 = vmul.f32 %v3841_v63, %v3839_v46 }
 0x41e   : > { %v1357_v9 = vpack.c.bf16 %v1356_v1, %v1356_v1 }
 0x420   : > { %1396 = vmatmul.mubr.bf16.vlgmr.msra.gmra.mrb[32].mxu0 %v1357_v9  ;;  %1437 = vmatmul.mubr.bf16.vlgmr.msra.gmra.mrb[48].mxu1 %v1357_v9 }
 0x421   : > { %1480 = vmatpush1.bf16.msra.mxu0 %v4877_v44  ;;  %1521 = vmatpush1.bf16.msra.mxu1 %v4889_v35 }
 0x422   : > { %1481 = vmatprep.subr.bf16.mxu0 %v4879_v58  ;;  %1522 = vmatprep.subr.bf16.mxu1 %v4891_v36 }
 0x423   : > { %1511 = vmatprep.mubr.bf16.mxu0 %v5933_v28  ;;  %1552 = vmatprep.mubr.bf16.mxu1 %v5933_v28 }
 0x425   : > { %1482 = vmatpush1.bf16.msra.mxu0 %v4886_v59  ;;  %1523 = vmatpush1.bf16.msra.mxu1 %v4897_v42 }
 0x426   : > { %1483 = vmatprep.subr.bf16.mxu0 %v4893_v10  ;;  %1524 = vmatprep.subr.bf16.mxu1 %v4900_v62 }
 0x429   : > { %1484 = vmatpush1.bf16.msra.mxu0 %v4903_v52  ;;  %1525 = vmatpush1.bf16.msra.mxu1 %v4909_v23 }
 0x42a   : > { %1485 = vmatprep.subr.bf16.mxu0 %v4905_v47  ;;  %1526 = vmatprep.subr.bf16.mxu1 %v4912_v56 }
 0x42d   : > { %1486 = vmatpush1.bf16.msra.mxu0 %v4915_v39  ;;  %1527 = vmatpush1.bf16.msra.mxu1 %v4921_v37 }
 0x42e   : > { %1487 = vmatprep.subr.bf16.mxu0 %v4917_v40  ;;  %1528 = vmatprep.subr.bf16.mxu1 %v4924_v17 }
 0x431   : > { %1488 = vmatpush1.bf16.msra.mxu0 %v4927_v12  ;;  %1529 = vmatpush1.bf16.msra.mxu1 %v4933_v26 }
 0x432   : > { %1489 = vmatprep.subr.bf16.mxu0 %v4929_v54  ;;  %1530 = vmatprep.subr.bf16.mxu1 %v4936_v8 }
 0x435   : > { %1490 = vmatpush1.bf16.msra.mxu0 %v4939_v2  ;;  %1531 = vmatpush1.bf16.msra.mxu1 %v4945_v38 }
 0x436   : > { %1491 = vmatprep.subr.bf16.mxu0 %v4941_v0  ;;  %1532 = vmatprep.subr.bf16.mxu1 %v4948_v55 }
 0x439   : > { %1492 = vmatpush1.bf16.msra.mxu0 %v4951_v53  ;;  %1533 = vmatpush1.bf16.msra.mxu1 %v4957_v18 }
 0x43a   : > { %1493 = vmatprep.subr.bf16.mxu0 %v4953_v4  ;;  %1534 = vmatprep.subr.bf16.mxu1 %v4960_v51 }
 0x43d   : > { %1494 = vmatpush1.bf16.msra.mxu0 %v4963_v48  ;;  %1535 = vmatpush1.bf16.msra.mxu1 %v4967_v14 }
 0x43e   : > { %1595 = vmatprep.subr.bf16.mxu0 %v4875_v21  ;;  %1636 = vmatprep.subr.bf16.mxu1 %v4883_v49 }
 0x4f3   : > { %v1397_v61 = vpop.f32.mrb[32].mxu0  ;;  %v1438_v29 = vpop.f32.mrb[48].mxu1 }
 0x4f4   : > { %v1445_v33 = vadd.f32 %v1397_v61, %v4722_v22  ;;  %v1399_v32 = vpop.f32.mrb[33].mxu0  ;;  %v1440_v11 = vpop.f32.mrb[49].mxu1  ;;  %v1447_v3 = vadd.f32 %v1438_v29, %v4772_v57 }
 0x4f5   : > { %v1446_v19 = vadd.f32 %v1399_v32, %v4727_v27  ;;  %v1401_v20 = vpop.f32.mrb[34].mxu0  ;;  %v1442_v15 = vpop.f32.mrb[50].mxu1  ;;  %v1448_v16 = vadd.f32 %v1440_v11, %v4774_v60 }
 0x4f6   : > { %v3577_v24 = vmul.f32 -1.442695, %v1445_v33  ;;  %v1402_v7 = vpop.f32.mrb[35].mxu0  ;;  %v1443_v13 = vpop.f32.mrb[51].mxu1 }
 0x4f7   : > { %v3578_v41 = vmul.f32 -1.442695, %v1446_v19  ;;  %v3579_v43 = vmul.f32 -1.442695, %v1448_v16 }
 0x4f8   : > { %3842 = vpow2.f32 %v3577_v24 }
 0x4f9   : > { %3844 = vpow2.f32 %v3578_v41 }
 0x4fa   : > { %3846 = vpow2.f32 %v3579_v43 }
 0x4fb   : > { %3848 = vtanh.f32 %v1447_v3 }
 0x502   : > { %v3843_v25 = vpop.eup %3842 }
 0x503   : > { %v3845_v45 = vpop.eup %3844  ;;  %v1452_v22 = vadd.f32 1.0, %v3843_v25 }
 0x504   : > { %v1458_v5 = vadd.f32 1.0, %v3845_v45  ;;  %v3847_v27 = vpop.eup %3846 }
 0x505   : > { %3850 = vrcp.f32 %v1452_v22  ;;  %v3849_v30 = vpop.eup %3848  ;;  %v1465_v9 = vadd.f32 1.0, %v3847_v27  ;;  %v5934_v22 = vld [vmem:[#allocation52_spill] sm:$0xff] }
 0x506   : > { %3852 = vrcp.f32 %v1458_v5 }
 0x507   : > { %3854 = vrcp.f32 %v1465_v9 }
 0x50f   : > { %v3851_v46 = vpop.eup %3850 }
 0x510   : > { %v3853_v63 = vpop.eup %3852  ;;  %v1469_v1 = vmul.f32 %v3851_v46, %v3849_v30 }
 0x511   : > { %v1468_v61 = vmul.f32 %v3853_v63, %v5055_v50  ;;  %v3855_v57 = vpop.eup %3854 }
 0x513   : > { %v5097_v60 = vadd.f32 %v1469_v1, %v1468_v61 }
 0x515   : > { %3856 = vtanh.f32 %v5097_v60 }
 0x51f   : > { %v3857_v29 = vpop.eup %3856 }
 0x520   : > { %v1472_v33 = vmul.f32 %v3857_v29, %v3855_v57 }
 0x522   : > { %v1473_v32 = vpack.c.bf16 %v1472_v33, %v1472_v33 }
 0x524   : > { %1512 = vmatmul.mubr.bf16.vlgmr.msra.gmra.mrb[36].mxu0 %v1473_v32  ;;  %1553 = vmatmul.mubr.bf16.vlgmr.msra.gmra.mrb[52].mxu1 %v1473_v32 }
 0x525   : > { %1596 = vmatpush1.bf16.msra.mxu0 %v4877_v44  ;;  %1637 = vmatpush1.bf16.msra.mxu1 %v4889_v35 }
 0x526   : > { %1597 = vmatprep.subr.bf16.mxu0 %v4879_v58  ;;  %1638 = vmatprep.subr.bf16.mxu1 %v4891_v36 }
 0x527   : > { %1627 = vmatprep.mubr.bf16.mxu0 %v5933_v28  ;;  %1668 = vmatprep.mubr.bf16.mxu1 %v5933_v28 }
 0x529   : > { %1598 = vmatpush1.bf16.msra.mxu0 %v4886_v59  ;;  %1639 = vmatpush1.bf16.msra.mxu1 %v4897_v42 }
 0x52a   : > { %1599 = vmatprep.subr.bf16.mxu0 %v4893_v10  ;;  %1640 = vmatprep.subr.bf16.mxu1 %v4900_v62 }
 0x52d   : > { %1600 = vmatpush1.bf16.msra.mxu0 %v4903_v52  ;;  %1641 = vmatpush1.bf16.msra.mxu1 %v4909_v23 }
 0x52e   : > { %1601 = vmatprep.subr.bf16.mxu0 %v4905_v47  ;;  %1642 = vmatprep.subr.bf16.mxu1 %v4912_v56 }
 0x531   : > { %1602 = vmatpush1.bf16.msra.mxu0 %v4915_v39  ;;  %1643 = vmatpush1.bf16.msra.mxu1 %v4921_v37 }
 0x532   : > { %1603 = vmatprep.subr.bf16.mxu0 %v4917_v40  ;;  %1644 = vmatprep.subr.bf16.mxu1 %v4924_v17 }
 0x535   : > { %1604 = vmatpush1.bf16.msra.mxu0 %v4927_v12  ;;  %1645 = vmatpush1.bf16.msra.mxu1 %v4933_v26 }
 0x536   : > { %1605 = vmatprep.subr.bf16.mxu0 %v4929_v54  ;;  %1646 = vmatprep.subr.bf16.mxu1 %v4936_v8 }
 0x539   : > { %1606 = vmatpush1.bf16.msra.mxu0 %v4939_v2  ;;  %1647 = vmatpush1.bf16.msra.mxu1 %v4945_v38 }
 0x53a   : > { %1607 = vmatprep.subr.bf16.mxu0 %v4941_v0  ;;  %1648 = vmatprep.subr.bf16.mxu1 %v4948_v55 }
 0x53d   : > { %1608 = vmatpush1.bf16.msra.mxu0 %v4951_v53  ;;  %1649 = vmatpush1.bf16.msra.mxu1 %v4957_v18 }
 0x53e   : > { %1609 = vmatprep.subr.bf16.mxu0 %v4953_v4  ;;  %1650 = vmatprep.subr.bf16.mxu1 %v4960_v51 }
 0x541   : > { %1610 = vmatpush1.bf16.msra.mxu0 %v4963_v48  ;;  %1651 = vmatpush1.bf16.msra.mxu1 %v4967_v14 }
 0x542   : > { %1711 = vmatprep.subr.bf16.mxu0 %v4875_v21  ;;  %1752 = vmatprep.subr.bf16.mxu1 %v4883_v49 }
 0x5f7   : > { %v1513_v50 = vpop.f32.mrb[36].mxu0  ;;  %v1554_v11 = vpop.f32.mrb[52].mxu1 }
 0x5f8   : > { %v1561_v19 = vadd.f32 %v1513_v50, %v4731_v31  ;;  %v1515_v20 = vpop.f32.mrb[37].mxu0  ;;  %v1556_v15 = vpop.f32.mrb[53].mxu1  ;;  %v1563_v5 = vadd.f32 %v1554_v11, %v5934_v22 }
 0x5f9   : > { %v1562_v24 = vadd.f32 %v1515_v20, %v4735_v34  ;;  %v1517_v7 = vpop.f32.mrb[38].mxu0  ;;  %v1558_v13 = vpop.f32.mrb[54].mxu1  ;;  %v1564_v25 = vadd.f32 %v1556_v15, %v4781_v6  ;;  %v5935_v20 = vld [vmem:[#allocation40_spill] sm:$0xff] }
 0x5fa   : > { %v3580_v41 = vmul.f32 -1.442695, %v1561_v19  ;;  %v1518_v16 = vpop.f32.mrb[39].mxu0  ;;  %v1559_v43 = vpop.f32.mrb[55].mxu1  ;;  %v5936_v13 = vld [vmem:[#allocation41_spill] sm:$0xff] }
 0x5fb   : > { %v3581_v3 = vmul.f32 -1.442695, %v1562_v24  ;;  %v3582_v45 = vmul.f32 -1.442695, %v1564_v25 }
 0x5fc   : > { %3858 = vpow2.f32 %v3580_v41 }
 0x5fd   : > { %3860 = vpow2.f32 %v3581_v3 }
 0x5fe   : > { %3862 = vpow2.f32 %v3582_v45 }
 0x5ff   : > { %3864 = vtanh.f32 %v1563_v5  ;;  %v5937_v5 = vld [vmem:[#allocation58_spill] sm:$0xff] }
 0x606   : > { %v3859_v27 = vpop.eup %3858 }
 0x607   : > { %v3861_v30 = vpop.eup %3860  ;;  %v1568_v31 = vadd.f32 1.0, %v3859_v27 }
 0x608   : > { %v1574_v46 = vadd.f32 1.0, %v3861_v30  ;;  %v3863_v34 = vpop.eup %3862 }
 0x609   : > { %3866 = vrcp.f32 %v1568_v31  ;;  %v3865_v63 = vpop.eup %3864  ;;  %v1581_v57 = vadd.f32 1.0, %v3863_v34  ;;  %v5938_v31 = vld [vmem:[#allocation57_spill] sm:$0xff] }
 0x60a   : > { %3868 = vrcp.f32 %v1574_v46 }
 0x60b   : > { %3870 = vrcp.f32 %v1581_v57 }
 0x613   : > { %v3867_v1 = vpop.eup %3866 }
 0x614   : > { %v3869_v9 = vpop.eup %3868  ;;  %v1585_v61 = vmul.f32 %v3867_v1, %v3865_v63 }
 0x615   : > { %v1584_v29 = vmul.f32 %v3869_v9, %v5097_v60  ;;  %v3871_v33 = vpop.eup %3870 }
 0x617   : > { %v5139_v6 = vadd.f32 %v1585_v61, %v1584_v29 }
 0x619   : > { %3872 = vtanh.f32 %v5139_v6 }
 0x623   : > { %v3873_v32 = vpop.eup %3872 }
 0x624   : > { %v1588_v50 = vmul.f32 %v3873_v32, %v3871_v33 }
 0x626   : > { %v1589_v11 = vpack.c.bf16 %v1588_v50, %v1588_v50 }
 0x628   : > { %1628 = vmatmul.mubr.bf16.vlgmr.msra.gmra.mrb[40].mxu0 %v1589_v11  ;;  %1669 = vmatmul.mubr.bf16.vlgmr.msra.gmra.mrb[56].mxu1 %v1589_v11 }
 0x629   : > { %1712 = vmatpush1.bf16.msra.mxu0 %v4877_v44  ;;  %1753 = vmatpush1.bf16.msra.mxu1 %v4889_v35 }
 0x62a   : > { %1713 = vmatprep.subr.bf16.mxu0 %v4879_v58  ;;  %1754 = vmatprep.subr.bf16.mxu1 %v4891_v36 }
 0x62b   : > { %1743 = vmatprep.mubr.bf16.mxu0 %v5933_v28  ;;  %1784 = vmatprep.mubr.bf16.mxu1 %v5933_v28 }
 0x62d   : > { %1714 = vmatpush1.bf16.msra.mxu0 %v4886_v59  ;;  %1755 = vmatpush1.bf16.msra.mxu1 %v4897_v42 }
 0x62e   : > { %1715 = vmatprep.subr.bf16.mxu0 %v4893_v10  ;;  %1756 = vmatprep.subr.bf16.mxu1 %v4900_v62 }
 0x631   : > { %1716 = vmatpush1.bf16.msra.mxu0 %v4903_v52  ;;  %1757 = vmatpush1.bf16.msra.mxu1 %v4909_v23 }
 0x632   : > { %1717 = vmatprep.subr.bf16.mxu0 %v4905_v47  ;;  %1758 = vmatprep.subr.bf16.mxu1 %v4912_v56 }
 0x635   : > { %1718 = vmatpush1.bf16.msra.mxu0 %v4915_v39  ;;  %1759 = vmatpush1.bf16.msra.mxu1 %v4921_v37 }
 0x636   : > { %1719 = vmatprep.subr.bf16.mxu0 %v4917_v40  ;;  %1760 = vmatprep.subr.bf16.mxu1 %v4924_v17 }
 0x639   : > { %1720 = vmatpush1.bf16.msra.mxu0 %v4927_v12  ;;  %1761 = vmatpush1.bf16.msra.mxu1 %v4933_v26 }
 0x63a   : > { %1721 = vmatprep.subr.bf16.mxu0 %v4929_v54  ;;  %1762 = vmatprep.subr.bf16.mxu1 %v4936_v8 }
 0x63d   : > { %1722 = vmatpush1.bf16.msra.mxu0 %v4939_v2  ;;  %1763 = vmatpush1.bf16.msra.mxu1 %v4945_v38 }
 0x63e   : > { %1723 = vmatprep.subr.bf16.mxu0 %v4941_v0  ;;  %1764 = vmatprep.subr.bf16.mxu1 %v4948_v55 }
 0x641   : > { %1724 = vmatpush1.bf16.msra.mxu0 %v4951_v53  ;;  %1765 = vmatpush1.bf16.msra.mxu1 %v4957_v18 }
 0x642   : > { %1725 = vmatprep.subr.bf16.mxu0 %v4953_v4  ;;  %1766 = vmatprep.subr.bf16.mxu1 %v4960_v51 }
 0x645   : > { %1726 = vmatpush1.bf16.msra.mxu0 %v4963_v48  ;;  %1767 = vmatpush1.bf16.msra.mxu1 %v4967_v14 }
 0x646   : > { %1827 = vmatprep.subr.bf16.mxu0 %v4875_v21  ;;  %1868 = vmatprep.subr.bf16.mxu1 %v4883_v49 }
 0x6fb   : > { %v1629_v60 = vpop.f32.mrb[40].mxu0  ;;  %v1670_v19 = vpop.f32.mrb[56].mxu1 }
 0x6fc   : > { %v1677_v15 = vadd.f32 %v1629_v60, %v5935_v20  ;;  %v1631_v24 = vpop.f32.mrb[41].mxu0  ;;  %v1672_v7 = vpop.f32.mrb[57].mxu1  ;;  %v1679_v46 = vadd.f32 %v1670_v19, %v5938_v31 }
 0x6fd   : > { %v1678_v41 = vadd.f32 %v1631_v24, %v5936_v13  ;;  %v1633_v16 = vpop.f32.mrb[42].mxu0  ;;  %v1674_v43 = vpop.f32.mrb[58].mxu1  ;;  %v1680_v27 = vadd.f32 %v1672_v7, %v5937_v5  ;;  %v5940_v13 = vld [vmem:[#allocation43_spill] sm:$0xff]  ;;  %v5941_v5 = vld [vmem:[#allocation61_spill] sm:$0xff] }
 0x6fe   : > { %v3583_v3 = vmul.f32 -1.442695, %v1677_v15  ;;  %v1634_v25 = vpop.f32.mrb[43].mxu0  ;;  %v1675_v45 = vpop.f32.mrb[59].mxu1 }
 0x6ff   : > { %v3584_v22 = vmul.f32 -1.442695, %v1678_v41  ;;  %v3585_v30 = vmul.f32 -1.442695, %v1680_v27 }
 0x700   : > { %3874 = vpow2.f32 %v3583_v3 }
 0x701   : > { %3876 = vpow2.f32 %v3584_v22 }
 0x702   : > { %3878 = vpow2.f32 %v3585_v30 }
 0x703   : > { %3880 = vtanh.f32 %v1679_v46 }
 0x70a   : > { %v3875_v34 = vpop.eup %3874 }
 0x70b   : > { %v3877_v63 = vpop.eup %3876  ;;  %v1684_v1 = vadd.f32 1.0, %v3875_v34 }
 0x70c   : > { %v1690_v9 = vadd.f32 1.0, %v3877_v63  ;;  %v3879_v61 = vpop.eup %3878 }
 0x70d   : > { %3882 = vrcp.f32 %v1684_v1  ;;  %v3881_v57 = vpop.eup %3880  ;;  %v1697_v50 = vadd.f32 1.0, %v3879_v61 }
 0x70e   : > { %3884 = vrcp.f32 %v1690_v9 }
 0x70f   : > { %3886 = vrcp.f32 %v1697_v50 }
 0x717   : > { %v3883_v29 = vpop.eup %3882 }
 0x718   : > { %v3885_v33 = vpop.eup %3884  ;;  %v1701_v32 = vmul.f32 %v3883_v29, %v3881_v57 }
 0x719   : > { %v1700_v11 = vmul.f32 %v3885_v33, %v5139_v6  ;;  %v3887_v19 = vpop.eup %3886 }
 0x71b   : > { %v5181_v60 = vadd.f32 %v1701_v32, %v1700_v11 }
 0x71d   : > { %3888 = vtanh.f32 %v5181_v60 }
 0x727   : > { %v3889_v20 = vpop.eup %3888 }
 0x728   : > { %v1704_v15 = vmul.f32 %v3889_v20, %v3887_v19 }
 0x72a   : > { %v1705_v24 = vpack.c.bf16 %v1704_v15, %v1704_v15 }
 0x72c   : > { %1744 = vmatmul.mubr.bf16.vlgmr.msra.gmra.mrb[44].mxu0 %v1705_v24  ;;  %1785 = vmatmul.mubr.bf16.vlgmr.msra.gmra.mrb[60].mxu1 %v1705_v24  ;;  %v3938_v24 = vld [vmem:[#allocation5] sm:$0xff] }
 0x72d   : > { %1828 = vmatpush1.bf16.msra.mxu0 %v4877_v44  ;;  %1869 = vmatpush1.bf16.msra.mxu1 %v4889_v35 }
 0x72e   : > { %1829 = vmatprep.subr.bf16.mxu0 %v4879_v58  ;;  %1870 = vmatprep.subr.bf16.mxu1 %v4891_v36 }
 0x72f   : > { %1859 = vmatprep.mubr.bf16.mxu0 %v5933_v28  ;;  %1900 = vmatprep.mubr.bf16.mxu1 %v5933_v28 }
 0x731   : > { %1830 = vmatpush1.bf16.msra.mxu0 %v4886_v59  ;;  %1871 = vmatpush1.bf16.msra.mxu1 %v4897_v42  ;;  %v5939_v59 = vld [vmem:[#allocation42_spill] sm:$0xff] }
 0x732   : > { %1831 = vmatprep.subr.bf16.mxu0 %v4893_v10  ;;  %1872 = vmatprep.subr.bf16.mxu1 %v4900_v62 }
 0x735   : > { %1832 = vmatpush1.bf16.msra.mxu0 %v4903_v52  ;;  %1873 = vmatpush1.bf16.msra.mxu1 %v4909_v23 }
 0x736   : > { %1833 = vmatprep.subr.bf16.mxu0 %v4905_v47  ;;  %1874 = vmatprep.subr.bf16.mxu1 %v4912_v56 }
 0x739   : > { %1834 = vmatpush1.bf16.msra.mxu0 %v4915_v39  ;;  %1875 = vmatpush1.bf16.msra.mxu1 %v4921_v37 }
 0x73a   : > { %1835 = vmatprep.subr.bf16.mxu0 %v4917_v40  ;;  %1876 = vmatprep.subr.bf16.mxu1 %v4924_v17 }
 0x73d   : > { %1836 = vmatpush1.bf16.msra.mxu0 %v4927_v12  ;;  %1877 = vmatpush1.bf16.msra.mxu1 %v4933_v26 }
 0x73e   : > { %1837 = vmatprep.subr.bf16.mxu0 %v4929_v54  ;;  %1878 = vmatprep.subr.bf16.mxu1 %v4936_v8 }
 0x741   : > { %1838 = vmatpush1.bf16.msra.mxu0 %v4939_v2  ;;  %1879 = vmatpush1.bf16.msra.mxu1 %v4945_v38 }
 0x742   : > { %1839 = vmatprep.subr.bf16.mxu0 %v4941_v0  ;;  %1880 = vmatprep.subr.bf16.mxu1 %v4948_v55 }
 0x745   : > { %1840 = vmatpush1.bf16.msra.mxu0 %v4951_v53  ;;  %1881 = vmatpush1.bf16.msra.mxu1 %v4957_v18 }
 0x746   : > { %1841 = vmatprep.subr.bf16.mxu0 %v4953_v4  ;;  %1882 = vmatprep.subr.bf16.mxu1 %v4960_v51 }
 0x749   : > { %1842 = vmatpush1.bf16.msra.mxu0 %v4963_v48  ;;  %1883 = vmatpush1.bf16.msra.mxu1 %v4967_v14 }
 0x74a   : > { %1943 = vmatprep.subr.bf16.mxu0 %v4875_v21  ;;  %1984 = vmatprep.subr.bf16.mxu1 %v4883_v49  ;;  %v5942_v49 = vld [vmem:[#allocation59_spill] sm:$0xff] }
 0x7ff   : > { %v1745_v44 = vpop.f32.mrb[44].mxu0  ;;  %v1786_v58 = vpop.f32.mrb[60].mxu1 }
 0x800   : > { %v1793_v10 = vadd.f32 %v1745_v44, %v5939_v59  ;;  %v1747_v6 = vpop.f32.mrb[45].mxu0  ;;  %v1788_v7 = vpop.f32.mrb[61].mxu1  ;;  %v1795_v30 = vadd.f32 %v1786_v58, %v5942_v49  ;;  %v3939_v44 = vld [vmem:[#allocation5 + $0x28] sm:$0xff]  ;;  %v5948_v49 = vld [vmem:[#allocation47_spill] sm:$0xff] }
 0x801   : > { %v1794_v41 = vadd.f32 %v1747_v6, %v5940_v13  ;;  %v1749_v16 = vpop.f32.mrb[46].mxu0  ;;  %v1790_v43 = vpop.f32.mrb[62].mxu1  ;;  %v1796_v21 = vadd.f32 %v1788_v7, %v5941_v5  ;;  %v3941_v58 = vld [vmem:[#allocation5 + $0x48] sm:$0xff] }
 0x802   : > { %v3586_v3 = vmul.f32 -1.442695, %v1793_v10  ;;  %v1750_v25 = vpop.f32.mrb[47].mxu0  ;;  %v1791_v45 = vpop.f32.mrb[63].mxu1 }
 0x803   : > { %v3587_v22 = vmul.f32 -1.442695, %v1794_v41  ;;  %v3588_v27 = vmul.f32 -1.442695, %v1796_v21 }
 0x804   : > { %3890 = vpow2.f32 %v3586_v3 }
 0x805   : > { %3892 = vpow2.f32 %v3587_v22  ;;  %v5947_v22 = vld [vmem:[#allocation46_spill] sm:$0xff] }
 0x806   : > { %3894 = vpow2.f32 %v3588_v27 }
 0x807   : > { %3896 = vtanh.f32 %v1795_v30 }
 0x80e   : > { %v3891_v31 = vpop.eup %3890 }
 0x80f   : > { %v3893_v46 = vpop.eup %3892  ;;  %v1800_v34 = vadd.f32 1.0, %v3891_v31 }
 0x810   : > { %v1806_v63 = vadd.f32 1.0, %v3893_v46  ;;  %v3895_v1 = vpop.eup %3894 }
 0x811   : > { %3898 = vrcp.f32 %v1800_v34  ;;  %v3897_v9 = vpop.eup %3896  ;;  %v1813_v33 = vadd.f32 1.0, %v3895_v1 }
 0x812   : > { %3900 = vrcp.f32 %v1806_v63 }
 0x813   : > { %3902 = vrcp.f32 %v1813_v33  ;;  %v5950_v33 = vld [vmem:[#allocation67_spill] sm:$0xff] }
 0x81b   : > { %v3899_v61 = vpop.eup %3898 }
 0x81c   : > { %v3901_v57 = vpop.eup %3900  ;;  %v1817_v29 = vmul.f32 %v3899_v61, %v3897_v9  ;;  %v5949_v61 = vld [vmem:[#allocation69_spill] sm:$0xff] }
 0x81d   : > { %v1816_v32 = vmul.f32 %v3901_v57, %v5181_v60  ;;  %v3903_v11 = vpop.eup %3902  ;;  %v3940_v60 = vld [vmem:[#allocation5 + $0x20] sm:$0xff] }
 0x81f   : > { %v5223_v50 = vadd.f32 %v1817_v29, %v1816_v32 }
 0x821   : > { %3904 = vtanh.f32 %v5223_v50 }
 0x82b   : > { %v3905_v19 = vpop.eup %3904 }
 0x82c   : > { %v1820_v20 = vmul.f32 %v3905_v19, %v3903_v11 }
 0x82e   : > { %v1821_v15 = vpack.c.bf16 %v1820_v20, %v1820_v20 }
 0x830   : > { %1860 = vmatmul.mubr.bf16.vlgmr.msra.gmra.mrb[48].mxu0 %v1821_v15  ;;  %1901 = vmatmul.mubr.bf16.vlgmr.msra.gmra.mrb[64].mxu1 %v1821_v15 }
 0x831   : > { %1944 = vmatpush1.bf16.msra.mxu0 %v3938_v24  ;;  %1985 = vmatpush1.bf16.msra.mxu1 %v4889_v35 }
 0x832   : > { %1945 = vmatprep.subr.bf16.mxu0 %v3939_v44  ;;  %1986 = vmatprep.subr.bf16.mxu1 %v4891_v36 }
 0x833   : > { %1975 = vmatprep.mubr.bf16.mxu0 %v5933_v28  ;;  %2016 = vmatprep.mubr.bf16.mxu1 %v5933_v28 }
 0x835   : > { %1946 = vmatpush1.bf16.msra.mxu0 %v3940_v60  ;;  %1987 = vmatpush1.bf16.msra.mxu1 %v4897_v42 }
 0x836   : > { %1947 = vmatprep.subr.bf16.mxu0 %v3941_v58  ;;  %1988 = vmatprep.subr.bf16.mxu1 %v4900_v62 }
 0x839   : > { %1948 = vmatpush1.bf16.msra.mxu0 %v4903_v52  ;;  %1989 = vmatpush1.bf16.msra.mxu1 %v4909_v23 }
 0x83a   : > { %1949 = vmatprep.subr.bf16.mxu0 %v4905_v47  ;;  %1990 = vmatprep.subr.bf16.mxu1 %v4912_v56  ;;  %v5944_v47 = vld [vmem:[#allocation45_spill] sm:$0xff] }
 0x83d   : > { %1950 = vmatpush1.bf16.msra.mxu0 %v4915_v39  ;;  %1991 = vmatpush1.bf16.msra.mxu1 %v4921_v37 }
 0x83e   : > { %1951 = vmatprep.subr.bf16.mxu0 %v4917_v40  ;;  %1992 = vmatprep.subr.bf16.mxu1 %v4924_v17 }
 0x841   : > { %1952 = vmatpush1.bf16.msra.mxu0 %v4927_v12  ;;  %1993 = vmatpush1.bf16.msra.mxu1 %v4933_v26  ;;  %v5943_v12 = vld [vmem:[#allocation44_spill] sm:$0xff] }
 0x842   : > { %1953 = vmatprep.subr.bf16.mxu0 %v4929_v54  ;;  %1994 = vmatprep.subr.bf16.mxu1 %v4936_v8 }
 0x845   : > { %1954 = vmatpush1.bf16.msra.mxu0 %v4939_v2  ;;  %1995 = vmatpush1.bf16.msra.mxu1 %v4945_v38 }
 0x846   : > { %1955 = vmatprep.subr.bf16.mxu0 %v4941_v0  ;;  %1996 = vmatprep.subr.bf16.mxu1 %v4948_v55 }
 0x849   : > { %1956 = vmatpush1.bf16.msra.mxu0 %v4951_v53  ;;  %1997 = vmatpush1.bf16.msra.mxu1 %v4957_v18 }
 0x84a   : > { %1957 = vmatprep.subr.bf16.mxu0 %v4953_v4  ;;  %1998 = vmatprep.subr.bf16.mxu1 %v4960_v51  ;;  %v5945_v51 = vld [vmem:[#allocation66_spill] sm:$0xff] }
 0x84d   : > { %1958 = vmatpush1.bf16.msra.mxu0 %v4963_v48  ;;  %1999 = vmatpush1.bf16.msra.mxu1 %v4967_v14  ;;  %v5946_v14 = vld [vmem:[#allocation65_spill] sm:$0xff] }
 0x903   : > { %v1861_v8 = vpop.f32.mrb[48].mxu0  ;;  %v1902_v2 = vpop.f32.mrb[64].mxu1 }
 0x904   : > { %v1909_v17 = vadd.f32 %v1861_v8, %v5943_v12  ;;  %v1863_v42 = vpop.f32.mrb[49].mxu0  ;;  %v1904_v0 = vpop.f32.mrb[65].mxu1  ;;  %v1911_v4 = vadd.f32 %v1902_v2, %v5946_v14 }
 0x905   : > { %v1910_v55 = vadd.f32 %v1863_v42, %v5944_v47  ;;  %v1865_v52 = vpop.f32.mrb[50].mxu0  ;;  %v1906_v53 = vpop.f32.mrb[66].mxu1  ;;  %v1912_v48 = vadd.f32 %v1904_v0, %v5945_v51 }
 0x906   : > { %v3589_v56 = vmul.f32 -1.442695, %v1909_v17  ;;  %v1866_v23 = vpop.f32.mrb[51].mxu0  ;;  %v1907_v39 = vpop.f32.mrb[67].mxu1 }
 0x907   : > { %v3590_v54 = vmul.f32 -1.442695, %v1910_v55  ;;  %v3591_v62 = vmul.f32 -1.442695, %v1912_v48 }
 0x908   : > { %3906 = vpow2.f32 %v3589_v56 }
 0x909   : > { %3908 = vpow2.f32 %v3590_v54 }
 0x90a   : > { %3910 = vpow2.f32 %v3591_v62 }
 0x90b   : > { %3912 = vtanh.f32 %v1911_v4 }
 0x912   : > { %v3907_v18 = vpop.eup %3906 }
 0x913   : > { %v3909_v38 = vpop.eup %3908  ;;  %v1916_v26 = vadd.f32 1.0, %v3907_v18 }
 0x914   : > { %v1922_v40 = vadd.f32 1.0, %v3909_v38  ;;  %v3911_v37 = vpop.eup %3910 }
 0x915   : > { %3914 = vrcp.f32 %v1916_v26  ;;  %v3913_v35 = vpop.eup %3912  ;;  %v1929_v6 = vadd.f32 1.0, %v3911_v37 }
 0x916   : > { %3916 = vrcp.f32 %v1922_v40 }
 0x917   : > { %3918 = vrcp.f32 %v1929_v6 }
 0x91f   : > { %v3915_v36 = vpop.eup %3914 }
 0x920   : > { %v3917_v59 = vpop.eup %3916  ;;  %v1933_v10 = vmul.f32 %v3915_v36, %v3913_v35 }
 0x921   : > { %v1932_v7 = vmul.f32 %v3917_v59, %v5223_v50  ;;  %v3919_v41 = vpop.eup %3918 }
 0x923   : > { %v1934_v13 = vadd.f32 %v1933_v10, %v1932_v7 }
 0x925   : > { %3920 = vtanh.f32 %v1934_v13 }
 0x92f   : > { %v3921_v16 = vpop.eup %3920 }
 0x930   : > { %v1936_v43 = vmul.f32 %v3921_v16, %v3919_v41 }
 0x932   : > { %v1937_v3 = vpack.c.bf16 %v1936_v43, %v1936_v43 }
 0x934   : > { %1976 = vmatmul.mubr.bf16.vlgmr.msra.gmra.mrb[52].mxu0 %v1937_v3  ;;  %2017 = vmatmul.mubr.bf16.vlgmr.msra.gmra.mrb[68].mxu1 %v1937_v3 }
 0xa07   : > { %v1977_v25 = vpop.f32.mrb[52].mxu0  ;;  %v2018_v45 = vpop.f32.mrb[68].mxu1 }
 0xa08   : > { %v2025_v5 = vadd.f32 %v1977_v25, %v5947_v22  ;;  %v1979_v21 = vpop.f32.mrb[53].mxu0  ;;  %v2020_v27 = vpop.f32.mrb[69].mxu1  ;;  %v2027_v32 = vadd.f32 %v2018_v45, %v5950_v33 }
 0xa09   : > { %v2026_v30 = vadd.f32 %v1979_v21, %v5948_v49  ;;  %v1981_v31 = vpop.f32.mrb[54].mxu0  ;;  %v2022_v46 = vpop.f32.mrb[70].mxu1  ;;  %v2028_v57 = vadd.f32 %v2020_v27, %v5949_v61 }
 0xa0a   : > { %v3592_v34 = vmul.f32 -1.442695, %v2025_v5  ;;  %v1982_v63 = vpop.f32.mrb[55].mxu0  ;;  %v2023_v1 = vpop.f32.mrb[71].mxu1 }
 0xa0b   : > { %v3593_v9 = vmul.f32 -1.442695, %v2026_v30  ;;  %v3594_v29 = vmul.f32 -1.442695, %v2028_v57 }
 0xa0c   : > { %3922 = vpow2.f32 %v3592_v34 }
 0xa0d   : > { %3924 = vpow2.f32 %v3593_v9 }
 0xa0e   : > { %3926 = vpow2.f32 %v3594_v29 }
 0xa0f   : > { %3928 = vtanh.f32 %v2027_v32 }
 0xa16   : > { %v3923_v50 = vpop.eup %3922 }
 0xa17   : > { %v3925_v11 = vpop.eup %3924  ;;  %v2032_v19 = vadd.f32 1.0, %v3923_v50 }
 0xa18   : > { %v2038_v20 = vadd.f32 1.0, %v3925_v11  ;;  %v3927_v15 = vpop.eup %3926 }
 0xa19   : > { %3930 = vrcp.f32 %v2032_v19  ;;  %v3929_v24 = vpop.eup %3928  ;;  %v2045_v8 = vadd.f32 1.0, %v3927_v15 }
 0xa1a   : > { %3932 = vrcp.f32 %v2038_v20 }
 0xa1b   : > { %3934 = vrcp.f32 %v2045_v8 }
 0xa23   : > { %v3931_v44 = vpop.eup %3930 }
 0xa24   : > { %v3933_v60 = vpop.eup %3932  ;;  %v2049_v58 = vmul.f32 %v3931_v44, %v3929_v24 }
 0xa25   : > { %v2048_v2 = vmul.f32 %v3933_v60, %v1934_v13  ;;  %v3935_v17 = vpop.eup %3934 }
 0xa27   : > { %v5263_v12 = vadd.f32 %v2049_v58, %v2048_v2 }
 0xa29   : > { %3936 = vtanh.f32 %v5263_v12 }
 0xa33   : > { %v3937_v42 = vpop.eup %3936 }
 0xa34   : > { %v2052_v0 = vmul.f32 %v3937_v42, %v3935_v17 }
 0xa36   : > { %v5266_v47 = vpack.c.bf16 %v2052_v0, %v2052_v0 }
 0xa37   : > { %4270 = dma.done.wait [#allocation8 + $0x1], 4096 }
 0xa38   : > { %4271 = vsyncadd [#allocation8 + $0x1], 4294963200  ;;  %2124 = vmatprep.mubr.bf16.mxu0 %v5933_v28  ;;  %2165 = vmatprep.mubr.bf16.mxu1 %v5933_v28  ;;  %v5270_v55 = vld [vmem:[#allocation6 + $0x8] sm:$0xff]  ;;  %v5272_v52 = vld [vmem:[#allocation6] sm:$0xff] }
 0xa39   : > { %v5274_v53 = vld [vmem:[#allocation6 + $0x28] sm:$0xff]  ;;  %2092 = vmatprep.subr.bf16.mxu0 %v5270_v55  ;;  %v5278_v56 = vld [vmem:[#allocation6 + $0x18] sm:$0xff]  ;;  %v5281_v23 = vld [vmem:[#allocation6 + $0x20] sm:$0xff] }
 0xa3a   : > { %2093 = vmatpush1.bf16.msra.mxu0 %v5272_v52  ;;  %2133 = vmatprep.subr.bf16.mxu1 %v5278_v56  ;;  %v5284_v39 = vld [vmem:[#allocation6 + $0x10] sm:$0xff]  ;;  %v5286_v54 = vld [vmem:[#allocation6 + $0x38] sm:$0xff]  ;;  %v5288_v51 = vld [vmem:[#allocation6 + $0x48] sm:$0xff] }
 0xa3b   : > { %2094 = vmatprep.subr.bf16.mxu0 %v5274_v53  ;;  %2134 = vmatpush1.bf16.msra.mxu1 %v5284_v39  ;;  %v5292_v48 = vld [vmem:[#allocation6 + $0x30] sm:$0xff]  ;;  %v5295_v62 = vld [vmem:[#allocation6 + $0x58] sm:$0xff]  ;;  %v5298_v14 = vld [vmem:[#allocation6 + $0x40] sm:$0xff] }
 0xa3c   : > { %2135 = vmatprep.subr.bf16.mxu1 %v5286_v54  ;;  %v5300_v4 = vld [vmem:[#allocation6 + $0x68] sm:$0xff]  ;;  %v5304_v18 = vld [vmem:[#allocation6 + $0x50] sm:$0xff]  ;;  %v5307_v38 = vld [vmem:[#allocation6 + $0x78] sm:$0xff] }
 0xa3d   : > { %v5310_v26 = vld [vmem:[#allocation6 + $0x60] sm:$0xff]  ;;  %v5312_v40 = vld [vmem:[#allocation6 + $0x88] sm:$0xff]  ;;  %v5316_v37 = vld [vmem:[#allocation6 + $0x70] sm:$0xff] }
 0xa3e   : > { %2095 = vmatpush1.bf16.msra.mxu0 %v5281_v23  ;;  %v5319_v35 = vld [vmem:[#allocation6 + $0x98] sm:$0xff]  ;;  %v5322_v36 = vld [vmem:[#allocation6 + $0x80] sm:$0xff]  ;;  %v5324_v59 = vld [vmem:[#allocation6 + $0xa8] sm:$0xff] }
 0xa3f   : > { %2096 = vmatprep.subr.bf16.mxu0 %v5288_v51  ;;  %2136 = vmatpush1.bf16.msra.mxu1 %v5292_v48  ;;  %v5328_v10 = vld [vmem:[#allocation6 + $0x90] sm:$0xff]  ;;  %v5331_v6 = vld [vmem:[#allocation6 + $0xb8] sm:$0xff]  ;;  %v5334_v7 = vld [vmem:[#allocation6 + $0xa0] sm:$0xff] }
 0xa40   : > { %2137 = vmatprep.subr.bf16.mxu1 %v5295_v62  ;;  %v5336_v13 = vld [vmem:[#allocation6 + $0xc8] sm:$0xff]  ;;  %v5340_v41 = vld [vmem:[#allocation6 + $0xb0] sm:$0xff]  ;;  %v5343_v16 = vld [vmem:[#allocation6 + $0xd8] sm:$0xff] }
 0xa41   : > { %v5346_v43 = vld [vmem:[#allocation6 + $0xc0] sm:$0xff]  ;;  %v5348_v3 = vld [vmem:[#allocation6 + $0xe8] sm:$0xff]  ;;  %v5352_v25 = vld [vmem:[#allocation6 + $0xd0] sm:$0xff] }
 0xa42   : > { %2097 = vmatpush1.bf16.msra.mxu0 %v5298_v14  ;;  %v5355_v45 = vld [vmem:[#allocation6 + $0xf8] sm:$0xff]  ;;  %v5358_v22 = vld [vmem:[#allocation6 + $0xe0] sm:$0xff]  ;;  %v5362_v5 = vld [vmem:[#allocation6 + $0xf0] sm:$0xff] }
 0xa43   : > { %2098 = vmatprep.subr.bf16.mxu0 %v5300_v4  ;;  %2138 = vmatpush1.bf16.msra.mxu1 %v5304_v18  ;;  %v5951_v27 = vld [vmem:[#allocation48_spill] sm:$0xff]  ;;  %v5952_v31 = vld [vmem:[#allocation49_spill] sm:$0xff]  ;;  %v5953_v32 = vld [vmem:[#allocation74_spill] sm:$0xff] }
 0xa44   : > { %2139 = vmatprep.subr.bf16.mxu1 %v5307_v38  ;;  %v5954_v19 = vld [vmem:[#allocation73_spill] sm:$0xff] }
 0xa46   : > { %2099 = vmatpush1.bf16.msra.mxu0 %v5310_v26 }
 0xa47   : > { %2100 = vmatprep.subr.bf16.mxu0 %v5312_v40  ;;  %2140 = vmatpush1.bf16.msra.mxu1 %v5316_v37 }
 0xa48   : > { %2141 = vmatprep.subr.bf16.mxu1 %v5319_v35 }
 0xa4a   : > { %2101 = vmatpush1.bf16.msra.mxu0 %v5322_v36 }
 0xa4b   : > { %2102 = vmatprep.subr.bf16.mxu0 %v5324_v59  ;;  %2142 = vmatpush1.bf16.msra.mxu1 %v5328_v10 }
 0xa4c   : > { %2143 = vmatprep.subr.bf16.mxu1 %v5331_v6 }
 0xa4e   : > { %2103 = vmatpush1.bf16.msra.mxu0 %v5334_v7 }
 0xa4f   : > { %2104 = vmatprep.subr.bf16.mxu0 %v5336_v13  ;;  %2144 = vmatpush1.bf16.msra.mxu1 %v5340_v41 }
 0xa50   : > { %2145 = vmatprep.subr.bf16.mxu1 %v5343_v16 }
 0xa52   : > { %2105 = vmatpush1.bf16.msra.mxu0 %v5346_v43 }
 0xa53   : > { %2106 = vmatprep.subr.bf16.mxu0 %v5348_v3  ;;  %2146 = vmatpush1.bf16.msra.mxu1 %v5352_v25 }
 0xa54   : > { %2147 = vmatprep.subr.bf16.mxu1 %v5355_v45 }
 0xa56   : > { %2107 = vmatpush1.bf16.msra.mxu0 %v5358_v22 }
 0xa57   : > { %2241 = vmatprep.subr.bf16.mxu0 %v5270_v55  ;;  %2148 = vmatpush1.bf16.msra.mxu1 %v5362_v5 }
 0xa58   : > { %2282 = vmatprep.subr.bf16.mxu1 %v5278_v56 }
 0xa59   : > { %2125 = vmatmul.mubr.bf16.vlgmr.msra.gmra.mrb[56].mxu0 %v5266_v47 }
 0xa5a   : > { %2242 = vmatpush1.bf16.msra.mxu0 %v5272_v52  ;;  %2273 = vmatprep.mubr.bf16.mxu0 %v5933_v28 }
 0xa5b   : > { %2166 = vmatmul.mubr.bf16.vlgmr.msra.gmra.mrb[72].mxu1 %v5266_v47  ;;  %2243 = vmatprep.subr.bf16.mxu0 %v5274_v53 }
 0xa5c   : > { %2283 = vmatpush1.bf16.msra.mxu1 %v5284_v39  ;;  %2314 = vmatprep.mubr.bf16.mxu1 %v5933_v28 }
 0xa5d   : > { %2284 = vmatprep.subr.bf16.mxu1 %v5286_v54 }
 0xa5e   : > { %2244 = vmatpush1.bf16.msra.mxu0 %v5281_v23 }
 0xa5f   : > { %2245 = vmatprep.subr.bf16.mxu0 %v5288_v51 }
 0xa60   : > { %2285 = vmatpush1.bf16.msra.mxu1 %v5292_v48 }
 0xa61   : > { %2286 = vmatprep.subr.bf16.mxu1 %v5295_v62 }
 0xa62   : > { %2246 = vmatpush1.bf16.msra.mxu0 %v5298_v14 }
 0xa63   : > { %2247 = vmatprep.subr.bf16.mxu0 %v5300_v4 }
 0xa64   : > { %2287 = vmatpush1.bf16.msra.mxu1 %v5304_v18 }
 0xa65   : > { %2288 = vmatprep.subr.bf16.mxu1 %v5307_v38 }
 0xa66   : > { %2248 = vmatpush1.bf16.msra.mxu0 %v5310_v26 }
 0xa67   : > { %2249 = vmatprep.subr.bf16.mxu0 %v5312_v40 }
 0xa68   : > { %2289 = vmatpush1.bf16.msra.mxu1 %v5316_v37 }
 0xa69   : > { %2290 = vmatprep.subr.bf16.mxu1 %v5319_v35 }
 0xa6a   : > { %2250 = vmatpush1.bf16.msra.mxu0 %v5322_v36 }
 0xa6b   : > { %2251 = vmatprep.subr.bf16.mxu0 %v5324_v59 }
 0xa6c   : > { %2291 = vmatpush1.bf16.msra.mxu1 %v5328_v10 }
 0xa6d   : > { %2292 = vmatprep.subr.bf16.mxu1 %v5331_v6 }
 0xa6e   : > { %2252 = vmatpush1.bf16.msra.mxu0 %v5334_v7 }
 0xa6f   : > { %2253 = vmatprep.subr.bf16.mxu0 %v5336_v13 }
 0xa70   : > { %2293 = vmatpush1.bf16.msra.mxu1 %v5340_v41 }
 0xa71   : > { %2294 = vmatprep.subr.bf16.mxu1 %v5343_v16 }
 0xa72   : > { %2254 = vmatpush1.bf16.msra.mxu0 %v5346_v43 }
 0xa73   : > { %2255 = vmatprep.subr.bf16.mxu0 %v5348_v3 }
 0xa74   : > { %2295 = vmatpush1.bf16.msra.mxu1 %v5352_v25 }
 0xa75   : > { %2296 = vmatprep.subr.bf16.mxu1 %v5355_v45 }
 0xa76   : > { %2256 = vmatpush1.bf16.msra.mxu0 %v5358_v22 }
 0xa77   : > { %2391 = vmatprep.subr.bf16.mxu0 %v5270_v55 }
 0xa78   : > { %2297 = vmatpush1.bf16.msra.mxu1 %v5362_v5 }
 0xa79   : > { %2432 = vmatprep.subr.bf16.mxu1 %v5278_v56 }
 0xb2c   : > { %v2126_v21 = vpop.f32.mrb[56].mxu0 }
 0xb2d   : > { %v2174_v49 = vadd.f32 %v2126_v21, %v5951_v27  ;;  %v2128_v30 = vpop.f32.mrb[57].mxu0 }
 0xb2e   : > { %v2175_v46 = vadd.f32 %v2128_v30, %v5952_v31  ;;  %v2130_v34 = vpop.f32.mrb[58].mxu0  ;;  %v2167_v63 = vpop.f32.mrb[72].mxu1 }
 0xb2f   : > { %v3595_v1 = vmul.f32 -1.442695, %v2174_v49  ;;  %v2131_v9 = vpop.f32.mrb[59].mxu0  ;;  %v2169_v61 = vpop.f32.mrb[73].mxu1  ;;  %v2176_v20 = vadd.f32 %v2167_v63, %v5954_v19  ;;  %v5955_v34 = vld [vmem:[#allocation50_spill] sm:$0xff] }
 0xb30   : > { %v3596_v57 = vmul.f32 -1.442695, %v2175_v46  ;;  %v2171_v29 = vpop.f32.mrb[74].mxu1  ;;  %v2177_v50 = vadd.f32 %v2169_v61, %v5953_v32  ;;  %v5956_v61 = vld [vmem:[#allocation51_spill] sm:$0xff] }
 0xb31   : > { %3942 = vpow2.f32 %v3595_v1  ;;  %v2172_v33 = vpop.f32.mrb[75].mxu1 }
 0xb32   : > { %3944 = vpow2.f32 %v3596_v57  ;;  %v3597_v11 = vmul.f32 -1.442695, %v2177_v50 }
 0xb34   : > { %3946 = vpow2.f32 %v3597_v11 }
 0xb35   : > { %3948 = vtanh.f32 %v2176_v20  ;;  %v5957_v20 = vld [vmem:[#allocation76_spill] sm:$0xff] }
 0xb3b   : > { %v3943_v15 = vpop.eup %3942 }
 0xb3c   : > { %v3945_v24 = vpop.eup %3944  ;;  %v2181_v44 = vadd.f32 1.0, %v3943_v15 }
 0xb3d   : > { %v2187_v60 = vadd.f32 1.0, %v3945_v24 }
 0xb3e   : > { %3950 = vrcp.f32 %v2181_v44  ;;  %v3947_v58 = vpop.eup %3946  ;;  %v5958_v44 = vld [vmem:[#allocation75_spill] sm:$0xff] }
 0xb3f   : > { %3952 = vrcp.f32 %v2187_v60  ;;  %v3949_v8 = vpop.eup %3948  ;;  %v2194_v17 = vadd.f32 1.0, %v3947_v58 }
 0xb41   : > { %3954 = vrcp.f32 %v2194_v17 }
 0xb48   : > { %v3951_v2 = vpop.eup %3950 }
 0xb49   : > { %v3953_v42 = vpop.eup %3952  ;;  %v2198_v0 = vmul.f32 %v3951_v2, %v3949_v8 }
 0xb4a   : > { %v2197_v47 = vmul.f32 %v3953_v42, %v5263_v12 }
 0xb4b   : > { %v3955_v27 = vpop.eup %3954 }
 0xb4c   : > { %v5409_v21 = vadd.f32 %v2198_v0, %v2197_v47 }
 0xb4e   : > { %3956 = vtanh.f32 %v5409_v21 }
 0xb58   : > { %v3957_v49 = vpop.eup %3956 }
 0xb59   : > { %v5412_v30 = vmul.f32 %v3957_v49, %v3955_v27 }
 0xb5b   : > { %v2203_v31 = vpack.c.bf16 %v5412_v30, %v5412_v30 }
 0xb5d   : > { %2274 = vmatmul.mubr.bf16.vlgmr.msra.gmra.mrb[60].mxu0 %v2203_v31  ;;  %2315 = vmatmul.mubr.bf16.vlgmr.msra.gmra.mrb[76].mxu1 %v2203_v31 }
 0xb5e   : > { %2392 = vmatpush1.bf16.msra.mxu0 %v5272_v52  ;;  %2433 = vmatpush1.bf16.msra.mxu1 %v5284_v39 }
 0xb5f   : > { %2393 = vmatprep.subr.bf16.mxu0 %v5274_v53  ;;  %2434 = vmatprep.subr.bf16.mxu1 %v5286_v54 }
 0xb60   : > { %2423 = vmatprep.mubr.bf16.mxu0 %v5933_v28  ;;  %2464 = vmatprep.mubr.bf16.mxu1 %v5933_v28 }
 0xb62   : > { %2394 = vmatpush1.bf16.msra.mxu0 %v5281_v23  ;;  %2435 = vmatpush1.bf16.msra.mxu1 %v5292_v48 }
 0xb63   : > { %2395 = vmatprep.subr.bf16.mxu0 %v5288_v51  ;;  %2436 = vmatprep.subr.bf16.mxu1 %v5295_v62 }
 0xb66   : > { %2396 = vmatpush1.bf16.msra.mxu0 %v5298_v14  ;;  %2437 = vmatpush1.bf16.msra.mxu1 %v5304_v18 }
 0xb67   : > { %2397 = vmatprep.subr.bf16.mxu0 %v5300_v4  ;;  %2438 = vmatprep.subr.bf16.mxu1 %v5307_v38 }
 0xb6a   : > { %2398 = vmatpush1.bf16.msra.mxu0 %v5310_v26  ;;  %2439 = vmatpush1.bf16.msra.mxu1 %v5316_v37 }
 0xb6b   : > { %2399 = vmatprep.subr.bf16.mxu0 %v5312_v40  ;;  %2440 = vmatprep.subr.bf16.mxu1 %v5319_v35 }
 0xb6e   : > { %2400 = vmatpush1.bf16.msra.mxu0 %v5322_v36  ;;  %2441 = vmatpush1.bf16.msra.mxu1 %v5328_v10 }
 0xb6f   : > { %2401 = vmatprep.subr.bf16.mxu0 %v5324_v59  ;;  %2442 = vmatprep.subr.bf16.mxu1 %v5331_v6 }
 0xb72   : > { %2402 = vmatpush1.bf16.msra.mxu0 %v5334_v7  ;;  %2443 = vmatpush1.bf16.msra.mxu1 %v5340_v41 }
 0xb73   : > { %2403 = vmatprep.subr.bf16.mxu0 %v5336_v13  ;;  %2444 = vmatprep.subr.bf16.mxu1 %v5343_v16 }
 0xb76   : > { %2404 = vmatpush1.bf16.msra.mxu0 %v5346_v43  ;;  %2445 = vmatpush1.bf16.msra.mxu1 %v5352_v25 }
 0xb77   : > { %2405 = vmatprep.subr.bf16.mxu0 %v5348_v3  ;;  %2446 = vmatprep.subr.bf16.mxu1 %v5355_v45 }
 0xb7a   : > { %2406 = vmatpush1.bf16.msra.mxu0 %v5358_v22  ;;  %2447 = vmatpush1.bf16.msra.mxu1 %v5362_v5 }
 0xb7b   : > { %2541 = vmatprep.subr.bf16.mxu0 %v5270_v55  ;;  %2582 = vmatprep.subr.bf16.mxu1 %v5278_v56 }
 0xc30   : > { %v2275_v12 = vpop.f32.mrb[60].mxu0  ;;  %v2316_v46 = vpop.f32.mrb[76].mxu1 }
 0xc31   : > { %v2323_v63 = vadd.f32 %v2275_v12, %v5955_v34  ;;  %v2277_v1 = vpop.f32.mrb[61].mxu0  ;;  %v2318_v9 = vpop.f32.mrb[77].mxu1  ;;  %v2325_v60 = vadd.f32 %v2316_v46, %v5958_v44 }
 0xc32   : > { %v2324_v57 = vadd.f32 %v2277_v1, %v5956_v61  ;;  %v2279_v29 = vpop.f32.mrb[62].mxu0  ;;  %v2320_v33 = vpop.f32.mrb[78].mxu1  ;;  %v2326_v15 = vadd.f32 %v2318_v9, %v5957_v20 }
 0xc33   : > { %v3598_v32 = vmul.f32 -1.442695, %v2323_v63  ;;  %v2280_v50 = vpop.f32.mrb[63].mxu0  ;;  %v2321_v11 = vpop.f32.mrb[79].mxu1 }
 0xc34   : > { %v3599_v19 = vmul.f32 -1.442695, %v2324_v57  ;;  %v3600_v24 = vmul.f32 -1.442695, %v2326_v15  ;;  %v5959_v57 = vld [vmem:[#allocation53_spill] sm:$0xff]  ;;  %v5960_v50 = vld [vmem:[#allocation54_spill] sm:$0xff] }
 0xc35   : > { %3958 = vpow2.f32 %v3598_v32 }
 0xc36   : > { %3960 = vpow2.f32 %v3599_v19 }
 0xc37   : > { %3962 = vpow2.f32 %v3600_v24 }
 0xc38   : > { %3964 = vtanh.f32 %v2325_v60 }
 0xc3f   : > { %v3959_v58 = vpop.eup %3958 }
 0xc40   : > { %v3961_v8 = vpop.eup %3960  ;;  %v2330_v2 = vadd.f32 1.0, %v3959_v58  ;;  %v5961_v58 = vld [vmem:[#allocation78_spill] sm:$0xff] }
 0xc41   : > { %v2336_v17 = vadd.f32 1.0, %v3961_v8  ;;  %v3963_v42 = vpop.eup %3962 }
 0xc42   : > { %3966 = vrcp.f32 %v2330_v2  ;;  %v3965_v0 = vpop.eup %3964  ;;  %v2343_v31 = vadd.f32 1.0, %v3963_v42 }
 0xc43   : > { %3968 = vrcp.f32 %v2336_v17  ;;  %v5962_v17 = vld [vmem:[#allocation77_spill] sm:$0xff] }
 0xc44   : > { %3970 = vrcp.f32 %v2343_v31 }
 0xc4c   : > { %v3967_v47 = vpop.eup %3966 }
 0xc4d   : > { %v3969_v27 = vpop.eup %3968  ;;  %v2347_v49 = vmul.f32 %v3967_v47, %v3965_v0 }
 0xc4e   : > { %v2346_v12 = vmul.f32 %v3969_v27, %v5409_v21  ;;  %v3971_v46 = vpop.eup %3970 }
 0xc50   : > { %v5455_v34 = vadd.f32 %v2347_v49, %v2346_v12 }
 0xc52   : > { %3972 = vtanh.f32 %v5455_v34 }
 0xc5c   : > { %v3973_v63 = vpop.eup %3972 }
 0xc5d   : > { %v5458_v1 = vmul.f32 %v3973_v63, %v3971_v46 }
 0xc5f   : > { %v2353_v9 = vpack.c.bf16 %v5458_v1, %v5458_v1 }
 0xc61   : > { %2424 = vmatmul.mubr.bf16.vlgmr.msra.gmra.mrb[64].mxu0 %v2353_v9  ;;  %2465 = vmatmul.mubr.bf16.vlgmr.msra.gmra.mrb[80].mxu1 %v2353_v9 }
 0xc62   : > { %2542 = vmatpush1.bf16.msra.mxu0 %v5272_v52  ;;  %2583 = vmatpush1.bf16.msra.mxu1 %v5284_v39 }
 0xc63   : > { %2543 = vmatprep.subr.bf16.mxu0 %v5274_v53  ;;  %2584 = vmatprep.subr.bf16.mxu1 %v5286_v54 }
 0xc64   : > { %2573 = vmatprep.mubr.bf16.mxu0 %v5933_v28  ;;  %2614 = vmatprep.mubr.bf16.mxu1 %v5933_v28 }
 0xc66   : > { %2544 = vmatpush1.bf16.msra.mxu0 %v5281_v23  ;;  %2585 = vmatpush1.bf16.msra.mxu1 %v5292_v48 }
 0xc67   : > { %2545 = vmatprep.subr.bf16.mxu0 %v5288_v51  ;;  %2586 = vmatprep.subr.bf16.mxu1 %v5295_v62 }
 0xc6a   : > { %2546 = vmatpush1.bf16.msra.mxu0 %v5298_v14  ;;  %2587 = vmatpush1.bf16.msra.mxu1 %v5304_v18 }
 0xc6b   : > { %2547 = vmatprep.subr.bf16.mxu0 %v5300_v4  ;;  %2588 = vmatprep.subr.bf16.mxu1 %v5307_v38 }
 0xc6e   : > { %2548 = vmatpush1.bf16.msra.mxu0 %v5310_v26  ;;  %2589 = vmatpush1.bf16.msra.mxu1 %v5316_v37 }
 0xc6f   : > { %2549 = vmatprep.subr.bf16.mxu0 %v5312_v40  ;;  %2590 = vmatprep.subr.bf16.mxu1 %v5319_v35 }
 0xc72   : > { %2550 = vmatpush1.bf16.msra.mxu0 %v5322_v36  ;;  %2591 = vmatpush1.bf16.msra.mxu1 %v5328_v10 }
 0xc73   : > { %2551 = vmatprep.subr.bf16.mxu0 %v5324_v59  ;;  %2592 = vmatprep.subr.bf16.mxu1 %v5331_v6 }
 0xc76   : > { %2552 = vmatpush1.bf16.msra.mxu0 %v5334_v7  ;;  %2593 = vmatpush1.bf16.msra.mxu1 %v5340_v41 }
 0xc77   : > { %2553 = vmatprep.subr.bf16.mxu0 %v5336_v13  ;;  %2594 = vmatprep.subr.bf16.mxu1 %v5343_v16 }
 0xc7a   : > { %2554 = vmatpush1.bf16.msra.mxu0 %v5346_v43  ;;  %2595 = vmatpush1.bf16.msra.mxu1 %v5352_v25 }
 0xc7b   : > { %2555 = vmatprep.subr.bf16.mxu0 %v5348_v3  ;;  %2596 = vmatprep.subr.bf16.mxu1 %v5355_v45 }
 0xc7e   : > { %2556 = vmatpush1.bf16.msra.mxu0 %v5358_v22  ;;  %2597 = vmatpush1.bf16.msra.mxu1 %v5362_v5 }
 0xc7f   : > { %2691 = vmatprep.subr.bf16.mxu0 %v5270_v55  ;;  %2732 = vmatprep.subr.bf16.mxu1 %v5278_v56 }
 0xd34   : > { %v2425_v21 = vpop.f32.mrb[64].mxu0  ;;  %v2466_v61 = vpop.f32.mrb[80].mxu1 }
 0xd35   : > { %v2473_v29 = vadd.f32 %v2425_v21, %v5959_v57  ;;  %v2427_v33 = vpop.f32.mrb[65].mxu0  ;;  %v2468_v32 = vpop.f32.mrb[81].mxu1  ;;  %v2475_v42 = vadd.f32 %v2466_v61, %v5962_v17 }
 0xd36   : > { %v2474_v11 = vadd.f32 %v2427_v33, %v5960_v50  ;;  %v2429_v19 = vpop.f32.mrb[66].mxu0  ;;  %v2470_v20 = vpop.f32.mrb[82].mxu1  ;;  %v2476_v8 = vadd.f32 %v2468_v32, %v5961_v58 }
 0xd37   : > { %v3601_v15 = vmul.f32 -1.442695, %v2473_v29  ;;  %v2430_v24 = vpop.f32.mrb[67].mxu0  ;;  %v2471_v44 = vpop.f32.mrb[83].mxu1  ;;  %v5963_v19 = vld [vmem:[#allocation55_spill] sm:$0xff] }
 0xd38   : > { %v3602_v60 = vmul.f32 -1.442695, %v2474_v11  ;;  %v3603_v2 = vmul.f32 -1.442695, %v2476_v8  ;;  %v5964_v44 = vld [vmem:[#allocation56_spill] sm:$0xff] }
 0xd39   : > { %3974 = vpow2.f32 %v3601_v15 }
 0xd3a   : > { %3976 = vpow2.f32 %v3602_v60 }
 0xd3b   : > { %3978 = vpow2.f32 %v3603_v2 }
 0xd3c   : > { %3980 = vtanh.f32 %v2475_v42 }
 0xd43   : > { %v3975_v0 = vpop.eup %3974 }
 0xd44   : > { %v3977_v47 = vpop.eup %3976  ;;  %v2480_v27 = vadd.f32 1.0, %v3975_v0 }
 0xd45   : > { %v2486_v49 = vadd.f32 1.0, %v3977_v47  ;;  %v3979_v31 = vpop.eup %3978  ;;  %v5965_v47 = vld [vmem:[#allocation80_spill] sm:$0xff] }
 0xd46   : > { %3982 = vrcp.f32 %v2480_v27  ;;  %v3981_v12 = vpop.eup %3980  ;;  %v2493_v21 = vadd.f32 1.0, %v3979_v31 }
 0xd47   : > { %3984 = vrcp.f32 %v2486_v49 }
 0xd48   : > { %3986 = vrcp.f32 %v2493_v21 }
 0xd50   : > { %v3983_v46 = vpop.eup %3982 }
 0xd51   : > { %v3985_v63 = vpop.eup %3984  ;;  %v2497_v9 = vmul.f32 %v3983_v46, %v3981_v12 }
 0xd52   : > { %v2496_v57 = vmul.f32 %v3985_v63, %v5455_v34  ;;  %v3987_v61 = vpop.eup %3986 }
 0xd54   : > { %v5501_v29 = vadd.f32 %v2497_v9, %v2496_v57 }
 0xd56   : > { %3988 = vtanh.f32 %v5501_v29 }
 0xd60   : > { %v3989_v33 = vpop.eup %3988 }
 0xd61   : > { %v5504_v32 = vmul.f32 %v3989_v33, %v3987_v61 }
 0xd63   : > { %v2503_v50 = vpack.c.bf16 %v5504_v32, %v5504_v32 }
 0xd65   : > { %2574 = vmatmul.mubr.bf16.vlgmr.msra.gmra.mrb[68].mxu0 %v2503_v50  ;;  %2615 = vmatmul.mubr.bf16.vlgmr.msra.gmra.mrb[84].mxu1 %v2503_v50 }
 0xd66   : > { %2692 = vmatpush1.bf16.msra.mxu0 %v5272_v52  ;;  %2733 = vmatpush1.bf16.msra.mxu1 %v5284_v39 }
 0xd67   : > { %2693 = vmatprep.subr.bf16.mxu0 %v5274_v53  ;;  %2734 = vmatprep.subr.bf16.mxu1 %v5286_v54 }
 0xd68   : > { %2723 = vmatprep.mubr.bf16.mxu0 %v5933_v28  ;;  %2764 = vmatprep.mubr.bf16.mxu1 %v5933_v28 }
 0xd6a   : > { %2694 = vmatpush1.bf16.msra.mxu0 %v5281_v23  ;;  %2735 = vmatpush1.bf16.msra.mxu1 %v5292_v48 }
 0xd6b   : > { %2695 = vmatprep.subr.bf16.mxu0 %v5288_v51  ;;  %2736 = vmatprep.subr.bf16.mxu1 %v5295_v62 }
 0xd6e   : > { %2696 = vmatpush1.bf16.msra.mxu0 %v5298_v14  ;;  %2737 = vmatpush1.bf16.msra.mxu1 %v5304_v18 }
 0xd6f   : > { %2697 = vmatprep.subr.bf16.mxu0 %v5300_v4  ;;  %2738 = vmatprep.subr.bf16.mxu1 %v5307_v38 }
 0xd72   : > { %2698 = vmatpush1.bf16.msra.mxu0 %v5310_v26  ;;  %2739 = vmatpush1.bf16.msra.mxu1 %v5316_v37 }
 0xd73   : > { %2699 = vmatprep.subr.bf16.mxu0 %v5312_v40  ;;  %2740 = vmatprep.subr.bf16.mxu1 %v5319_v35 }
 0xd76   : > { %2700 = vmatpush1.bf16.msra.mxu0 %v5322_v36  ;;  %2741 = vmatpush1.bf16.msra.mxu1 %v5328_v10 }
 0xd77   : > { %2701 = vmatprep.subr.bf16.mxu0 %v5324_v59  ;;  %2742 = vmatprep.subr.bf16.mxu1 %v5331_v6 }
 0xd7a   : > { %2702 = vmatpush1.bf16.msra.mxu0 %v5334_v7  ;;  %2743 = vmatpush1.bf16.msra.mxu1 %v5340_v41 }
 0xd7b   : > { %2703 = vmatprep.subr.bf16.mxu0 %v5336_v13  ;;  %2744 = vmatprep.subr.bf16.mxu1 %v5343_v16 }
 0xd7e   : > { %2704 = vmatpush1.bf16.msra.mxu0 %v5346_v43  ;;  %2745 = vmatpush1.bf16.msra.mxu1 %v5352_v25 }
 0xd7f   : > { %2705 = vmatprep.subr.bf16.mxu0 %v5348_v3  ;;  %2746 = vmatprep.subr.bf16.mxu1 %v5355_v45 }
 0xd82   : > { %2706 = vmatpush1.bf16.msra.mxu0 %v5358_v22  ;;  %2747 = vmatpush1.bf16.msra.mxu1 %v5362_v5 }
 0xd83   : > { %2841 = vmatprep.subr.bf16.mxu0 %v5270_v55  ;;  %2882 = vmatprep.subr.bf16.mxu1 %v5278_v56  ;;  %v5966_v56 = vld [vmem:[#allocation79_spill] sm:$0xff] }
 0xe38   : > { %v2575_v34 = vpop.f32.mrb[68].mxu0  ;;  %v2616_v11 = vpop.f32.mrb[84].mxu1 }
 0xe39   : > { %v2623_v20 = vadd.f32 %v2575_v34, %v5963_v19  ;;  %v2577_v15 = vpop.f32.mrb[69].mxu0  ;;  %v2618_v24 = vpop.f32.mrb[85].mxu1  ;;  %v2625_v49 = vadd.f32 %v2616_v11, %v5966_v56  ;;  %v5620_v56 = vld [vmem:[#allocation6 + $0x30] sm:$0xff] }
 0xe3a   : > { %v2624_v60 = vadd.f32 %v2577_v15, %v5964_v44  ;;  %v2579_v58 = vpop.f32.mrb[70].mxu0  ;;  %v2620_v8 = vpop.f32.mrb[86].mxu1  ;;  %v2626_v55 = vadd.f32 %v2618_v24, %v5965_v47  ;;  %v5612_v47 = vld [vmem:[#allocation6 + $0x28] sm:$0xff] }
 0xe3b   : > { %v3604_v2 = vmul.f32 -1.442695, %v2623_v20  ;;  %v2580_v17 = vpop.f32.mrb[71].mxu0  ;;  %v2621_v42 = vpop.f32.mrb[87].mxu1 }
 0xe3c   : > { %v3605_v0 = vmul.f32 -1.442695, %v2624_v60  ;;  %v3606_v27 = vmul.f32 -1.442695, %v2626_v55  ;;  %v5602_v17 = vld [vmem:[#allocation6 + $0x18] sm:$0xff]  ;;  %v5606_v42 = vld [vmem:[#allocation6] sm:$0xff] }
 0xe3d   : > { %3990 = vpow2.f32 %v3604_v2  ;;  %v5600_v2 = vld [vmem:[#allocation6 + $0x8] sm:$0xff]  ;;  %v5614_v55 = vld [vmem:[#allocation6 + $0x38] sm:$0xff] }
 0xe3e   : > { %3992 = vpow2.f32 %v3605_v0  ;;  %v5608_v0 = vld [vmem:[#allocation6 + $0x10] sm:$0xff] }
 0xe3f   : > { %3994 = vpow2.f32 %v3606_v27  ;;  %v5618_v27 = vld [vmem:[#allocation6 + $0x20] sm:$0xff] }
 0xe40   : > { %3996 = vtanh.f32 %v2625_v49  ;;  %v5624_v49 = vld [vmem:[#allocation6 + $0x48] sm:$0xff] }
 0xe47   : > { %v3991_v31 = vpop.eup %3990 }
 0xe48   : > { %v3993_v12 = vpop.eup %3992  ;;  %v2630_v46 = vadd.f32 1.0, %v3991_v31  ;;  %v5626_v31 = vld [vmem:[#allocation6 + $0x58] sm:$0xff] }
 0xe49   : > { %v2636_v63 = vadd.f32 1.0, %v3993_v12  ;;  %v3995_v9 = vpop.eup %3994  ;;  %v5630_v12 = vld [vmem:[#allocation6 + $0x40] sm:$0xff] }
 0xe4a   : > { %3998 = vrcp.f32 %v2630_v46  ;;  %v3997_v21 = vpop.eup %3996  ;;  %v2643_v50 = vadd.f32 1.0, %v3995_v9  ;;  %v5632_v46 = vld [vmem:[#allocation6 + $0x50] sm:$0xff]  ;;  %v5638_v9 = vld [vmem:[#allocation6 + $0x78] sm:$0xff] }
 0xe4b   : > { %4000 = vrcp.f32 %v2636_v63  ;;  %v5636_v63 = vld [vmem:[#allocation6 + $0x68] sm:$0xff] }
 0xe4c   : > { %4002 = vrcp.f32 %v2643_v50  ;;  %v5652_v50 = vld [vmem:[#allocation6 + $0x80] sm:$0xff] }
 0xe54   : > { %v3999_v57 = vpop.eup %3998 }
 0xe55   : > { %v4001_v61 = vpop.eup %4000  ;;  %v2647_v33 = vmul.f32 %v3999_v57, %v3997_v21  ;;  %v5642_v21 = vld [vmem:[#allocation6 + $0x60] sm:$0xff]  ;;  %v5644_v57 = vld [vmem:[#allocation6 + $0x70] sm:$0xff] }
 0xe56   : > { %v2646_v34 = vmul.f32 %v4001_v61, %v5501_v29  ;;  %v4003_v11 = vpop.eup %4002  ;;  %v5648_v61 = vld [vmem:[#allocation6 + $0x88] sm:$0xff] }
 0xe58   : > { %v5547_v19 = vadd.f32 %v2647_v33, %v2646_v34  ;;  %v5650_v33 = vld [vmem:[#allocation6 + $0x98] sm:$0xff]  ;;  %v5656_v34 = vld [vmem:[#allocation6 + $0x90] sm:$0xff] }
 0xe5a   : > { %4004 = vtanh.f32 %v5547_v19 }
 0xe64   : > { %v4005_v20 = vpop.eup %4004 }
 0xe65   : > { %v5550_v15 = vmul.f32 %v4005_v20, %v4003_v11  ;;  %v5660_v11 = vld [vmem:[#allocation6 + $0xb8] sm:$0xff]  ;;  %v5666_v20 = vld [vmem:[#allocation6 + $0xa0] sm:$0xff] }
 0xe67   : > { %v2653_v24 = vpack.c.bf16 %v5550_v15, %v5550_v15 }
 0xe69   : > { %2724 = vmatmul.mubr.bf16.vlgmr.msra.gmra.mrb[72].mxu0 %v2653_v24  ;;  %2765 = vmatmul.mubr.bf16.vlgmr.msra.gmra.mrb[88].mxu1 %v2653_v24  ;;  %v5668_v24 = vld [vmem:[#allocation6 + $0xb0] sm:$0xff] }
 0xe6a   : > { %2842 = vmatpush1.bf16.msra.mxu0 %v5272_v52  ;;  %2883 = vmatpush1.bf16.msra.mxu1 %v5284_v39 }
 0xe6b   : > { %2843 = vmatprep.subr.bf16.mxu0 %v5274_v53  ;;  %2884 = vmatprep.subr.bf16.mxu1 %v5286_v54 }
 0xe6c   : > { %2873 = vmatprep.mubr.bf16.mxu0 %v5933_v28  ;;  %2914 = vmatprep.mubr.bf16.mxu1 %v5933_v28 }
 0xe6e   : > { %2844 = vmatpush1.bf16.msra.mxu0 %v5281_v23  ;;  %2885 = vmatpush1.bf16.msra.mxu1 %v5292_v48  ;;  %v5967_v23 = vld [vmem:[#allocation60_spill] sm:$0xff]  ;;  %v5968_v48 = vld [vmem:[#allocation62_spill] sm:$0xff] }
 0xe6f   : > { %2845 = vmatprep.subr.bf16.mxu0 %v5288_v51  ;;  %2886 = vmatprep.subr.bf16.mxu1 %v5295_v62 }
 0xe72   : > { %2846 = vmatpush1.bf16.msra.mxu0 %v5298_v14  ;;  %2887 = vmatpush1.bf16.msra.mxu1 %v5304_v18 }
 0xe73   : > { %2847 = vmatprep.subr.bf16.mxu0 %v5300_v4  ;;  %2888 = vmatprep.subr.bf16.mxu1 %v5307_v38 }
 0xe76   : > { %2848 = vmatpush1.bf16.msra.mxu0 %v5310_v26  ;;  %2889 = vmatpush1.bf16.msra.mxu1 %v5316_v37  ;;  %v5969_v37 = vld [vmem:[#allocation82_spill] sm:$0xff] }
 0xe77   : > { %2849 = vmatprep.subr.bf16.mxu0 %v5312_v40  ;;  %2890 = vmatprep.subr.bf16.mxu1 %v5319_v35 }
 0xe7a   : > { %2850 = vmatpush1.bf16.msra.mxu0 %v5322_v36  ;;  %2891 = vmatpush1.bf16.msra.mxu1 %v5328_v10 }
 0xe7b   : > { %2851 = vmatprep.subr.bf16.mxu0 %v5324_v59  ;;  %2892 = vmatprep.subr.bf16.mxu1 %v5331_v6  ;;  %v5970_v59 = vld [vmem:[#allocation81_spill] sm:$0xff] }
 0xe7e   : > { %2852 = vmatpush1.bf16.msra.mxu0 %v5334_v7  ;;  %2893 = vmatpush1.bf16.msra.mxu1 %v5340_v41 }
 0xe7f   : > { %2853 = vmatprep.subr.bf16.mxu0 %v5336_v13  ;;  %2894 = vmatprep.subr.bf16.mxu1 %v5343_v16 }
 0xe82   : > { %2854 = vmatpush1.bf16.msra.mxu0 %v5346_v43  ;;  %2895 = vmatpush1.bf16.msra.mxu1 %v5352_v25 }
 0xe83   : > { %2855 = vmatprep.subr.bf16.mxu0 %v5348_v3  ;;  %2896 = vmatprep.subr.bf16.mxu1 %v5355_v45 }
 0xe86   : > { %2856 = vmatpush1.bf16.msra.mxu0 %v5358_v22  ;;  %2897 = vmatpush1.bf16.msra.mxu1 %v5362_v5 }
 0xe87   : > { %2991 = vmatprep.subr.bf16.mxu0 %v5600_v2  ;;  %3032 = vmatprep.subr.bf16.mxu1 %v5602_v17 }
 0xf3c   : > { %v2725_v52 = vpop.f32.mrb[72].mxu0  ;;  %v2766_v53 = vpop.f32.mrb[88].mxu1 }
 0xf3d   : > { %v2773_v39 = vadd.f32 %v2725_v52, %v5967_v23  ;;  %v2727_v54 = vpop.f32.mrb[73].mxu0  ;;  %v2768_v51 = vpop.f32.mrb[89].mxu1  ;;  %v2775_v10 = vadd.f32 %v2766_v53, %v5970_v59  ;;  %v5670_v52 = vld [vmem:[#allocation6 + $0xc8] sm:$0xff]  ;;  %v5672_v53 = vld [vmem:[#allocation6 + $0xd8] sm:$0xff]  ;;  %v5678_v23 = vld [vmem:[#allocation6 + $0xc0] sm:$0xff] }
 0xf3e   : > { %v2774_v62 = vadd.f32 %v2727_v54, %v5968_v48  ;;  %v2729_v14 = vpop.f32.mrb[74].mxu0  ;;  %v2770_v4 = vpop.f32.mrb[90].mxu1  ;;  %v2776_v35 = vadd.f32 %v2768_v51, %v5969_v37  ;;  %v5682_v54 = vld [vmem:[#allocation6 + $0xe8] sm:$0xff]  ;;  %v5684_v51 = vld [vmem:[#allocation6 + $0xf8] sm:$0xff]  ;;  %v5690_v48 = vld [vmem:[#allocation6 + $0xe0] sm:$0xff] }
 0xf3f   : > { %v3607_v18 = vmul.f32 -1.442695, %v2773_v39  ;;  %v2730_v38 = vpop.f32.mrb[75].mxu0  ;;  %v2771_v26 = vpop.f32.mrb[91].mxu1  ;;  %v5680_v39 = vld [vmem:[#allocation6 + $0xd0] sm:$0xff]  ;;  %v5972_v37 = vld [vmem:[#allocation64_spill] sm:$0xff] }
 0xf40   : > { %v3608_v40 = vmul.f32 -1.442695, %v2774_v62  ;;  %v3609_v36 = vmul.f32 -1.442695, %v2776_v35  ;;  %v5692_v62 = vld [vmem:[#allocation6 + $0xf0] sm:$0xff] }
 0xf41   : > { %4006 = vpow2.f32 %v3607_v18  ;;  %v5971_v18 = vld [vmem:[#allocation63_spill] sm:$0xff] }
 0xf42   : > { %4008 = vpow2.f32 %v3608_v40 }
 0xf43   : > { %4010 = vpow2.f32 %v3609_v36 }
 0xf44   : > { %4012 = vtanh.f32 %v2775_v10 }
 0xf4b   : > { %v4007_v6 = vpop.eup %4006 }
 0xf4c   : > { %v4009_v7 = vpop.eup %4008  ;;  %v2780_v13 = vadd.f32 1.0, %v4007_v6 }
 0xf4d   : > { %v2786_v41 = vadd.f32 1.0, %v4009_v7  ;;  %v4011_v16 = vpop.eup %4010 }
 0xf4e   : > { %4014 = vrcp.f32 %v2780_v13  ;;  %v4013_v43 = vpop.eup %4012  ;;  %v2793_v22 = vadd.f32 1.0, %v4011_v16 }
 0xf4f   : > { %4016 = vrcp.f32 %v2786_v41  ;;  %v5973_v41 = vld [vmem:[#allocation84_spill] sm:$0xff] }
 0xf50   : > { %4018 = vrcp.f32 %v2793_v22 }
 0xf58   : > { %v4015_v3 = vpop.eup %4014 }
 0xf59   : > { %v4017_v25 = vpop.eup %4016  ;;  %v2797_v45 = vmul.f32 %v4015_v3, %v4013_v43  ;;  %v5974_v3 = vld [vmem:[#allocation83_spill] sm:$0xff] }
 0xf5a   : > { %v2796_v5 = vmul.f32 %v4017_v25, %v5547_v19  ;;  %v4019_v44 = vpop.eup %4018  ;;  %v5658_v19 = vld [vmem:[#allocation6 + $0xa8] sm:$0xff] }
 0xf5c   : > { %v5591_v29 = vadd.f32 %v2797_v45, %v2796_v5 }
 0xf5e   : > { %4020 = vtanh.f32 %v5591_v29 }
 0xf68   : > { %v4021_v60 = vpop.eup %4020 }
 0xf69   : > { %v5594_v58 = vmul.f32 %v4021_v60, %v4019_v44 }
 0xf6b   : > { %v2803_v8 = vpack.c.bf16 %v5594_v58, %v5594_v58 }
 0xf6d   : > { %2874 = vmatmul.mubr.bf16.vlgmr.msra.gmra.mrb[76].mxu0 %v2803_v8  ;;  %2915 = vmatmul.mubr.bf16.vlgmr.msra.gmra.mrb[92].mxu1 %v2803_v8 }
 0xf6e   : > { %3023 = vmatprep.mubr.bf16.mxu0 %v5933_v28  ;;  %3064 = vmatprep.mubr.bf16.mxu1 %v5933_v28 }
 0xf6f   : > { %2992 = vmatpush1.bf16.msra.mxu0 %v5606_v42  ;;  %3033 = vmatpush1.bf16.msra.mxu1 %v5608_v0 }
 0xf70   : > { %2993 = vmatprep.subr.bf16.mxu0 %v5612_v47  ;;  %3034 = vmatprep.subr.bf16.mxu1 %v5614_v55 }
 0xf73   : > { %2994 = vmatpush1.bf16.msra.mxu0 %v5618_v27  ;;  %3035 = vmatpush1.bf16.msra.mxu1 %v5620_v56 }
 0xf74   : > { %2995 = vmatprep.subr.bf16.mxu0 %v5624_v49  ;;  %3036 = vmatprep.subr.bf16.mxu1 %v5626_v31 }
 0xf77   : > { %2996 = vmatpush1.bf16.msra.mxu0 %v5630_v12  ;;  %3037 = vmatpush1.bf16.msra.mxu1 %v5632_v46 }
 0xf78   : > { %2997 = vmatprep.subr.bf16.mxu0 %v5636_v63  ;;  %3038 = vmatprep.subr.bf16.mxu1 %v5638_v9 }
 0xf7b   : > { %2998 = vmatpush1.bf16.msra.mxu0 %v5642_v21  ;;  %3039 = vmatpush1.bf16.msra.mxu1 %v5644_v57 }
 0xf7c   : > { %2999 = vmatprep.subr.bf16.mxu0 %v5648_v61  ;;  %3040 = vmatprep.subr.bf16.mxu1 %v5650_v33 }
 0xf7f   : > { %3000 = vmatpush1.bf16.msra.mxu0 %v5652_v50  ;;  %3041 = vmatpush1.bf16.msra.mxu1 %v5656_v34 }
 0xf80   : > { %3001 = vmatprep.subr.bf16.mxu0 %v5658_v19  ;;  %3042 = vmatprep.subr.bf16.mxu1 %v5660_v11 }
 0xf83   : > { %3002 = vmatpush1.bf16.msra.mxu0 %v5666_v20  ;;  %3043 = vmatpush1.bf16.msra.mxu1 %v5668_v24 }
 0xf84   : > { %3003 = vmatprep.subr.bf16.mxu0 %v5670_v52  ;;  %3044 = vmatprep.subr.bf16.mxu1 %v5672_v53 }
 0xf87   : > { %3004 = vmatpush1.bf16.msra.mxu0 %v5678_v23  ;;  %3045 = vmatpush1.bf16.msra.mxu1 %v5680_v39 }
 0xf88   : > { %3005 = vmatprep.subr.bf16.mxu0 %v5682_v54  ;;  %3046 = vmatprep.subr.bf16.mxu1 %v5684_v51 }
 0xf8b   : > { %3006 = vmatpush1.bf16.msra.mxu0 %v5690_v48  ;;  %3047 = vmatpush1.bf16.msra.mxu1 %v5692_v62 }
 0xf8c   : > { %3141 = vmatprep.subr.bf16.mxu0 %v5600_v2  ;;  %3182 = vmatprep.subr.bf16.mxu1 %v5602_v17 }
0x1040   : > { %v2875_v14 = vpop.f32.mrb[76].mxu0  ;;  %v2916_v4 = vpop.f32.mrb[92].mxu1 }
0x1041   : > { %v2923_v38 = vadd.f32 %v2875_v14, %v5971_v18  ;;  %v2877_v26 = vpop.f32.mrb[77].mxu0  ;;  %v2918_v40 = vpop.f32.mrb[93].mxu1  ;;  %v2925_v25 = vadd.f32 %v2916_v4, %v5974_v3  ;;  %v5980_v3 = vld [vmem:[#allocation72_spill] sm:$0xff] }
0x1042   : > { %v2924_v35 = vadd.f32 %v2877_v26, %v5972_v37  ;;  %v2879_v36 = vpop.f32.mrb[78].mxu0  ;;  %v2920_v59 = vpop.f32.mrb[94].mxu1  ;;  %v2926_v16 = vadd.f32 %v2918_v40, %v5973_v41 }
0x1043   : > { %v3610_v10 = vmul.f32 -1.442695, %v2923_v38  ;;  %v2880_v6 = vpop.f32.mrb[79].mxu0  ;;  %v2921_v7 = vpop.f32.mrb[95].mxu1 }
0x1044   : > { %v3611_v13 = vmul.f32 -1.442695, %v2924_v35  ;;  %v3612_v43 = vmul.f32 -1.442695, %v2926_v16 }
0x1045   : > { %4022 = vpow2.f32 %v3610_v10 }
0x1046   : > { %4024 = vpow2.f32 %v3611_v13  ;;  %v5979_v13 = vld [vmem:[#allocation71_spill] sm:$0xff] }
0x1047   : > { %4026 = vpow2.f32 %v3612_v43 }
0x1048   : > { %4028 = vtanh.f32 %v2925_v25 }
0x104f   : > { %v4023_v45 = vpop.eup %4022 }
0x1050   : > { %v4025_v22 = vpop.eup %4024  ;;  %v2930_v5 = vadd.f32 1.0, %v4023_v45 }
0x1051   : > { %v2936_v44 = vadd.f32 1.0, %v4025_v22  ;;  %v4027_v60 = vpop.eup %4026 }
0x1052   : > { %4030 = vrcp.f32 %v2930_v5  ;;  %v4029_v8 = vpop.eup %4028  ;;  %v2943_v18 = vadd.f32 1.0, %v4027_v60 }
0x1053   : > { %4032 = vrcp.f32 %v2936_v44 }
0x1054   : > { %4034 = vrcp.f32 %v2943_v18  ;;  %v5982_v18 = vld [vmem:[#allocation87_spill] sm:$0xff] }
0x105c   : > { %v4031_v2 = vpop.eup %4030 }
0x105d   : > { %v4033_v17 = vpop.eup %4032  ;;  %v2947_v14 = vmul.f32 %v4031_v2, %v4029_v8  ;;  %v5981_v2 = vld [vmem:[#allocation88_spill] sm:$0xff] }
0x105e   : > { %v2946_v38 = vmul.f32 %v4033_v17, %v5591_v29  ;;  %v4035_v4 = vpop.eup %4034 }
0x1060   : > { %v5703_v26 = vadd.f32 %v2947_v14, %v2946_v38 }
0x1062   : > { %4036 = vtanh.f32 %v5703_v26 }
0x106c   : > { %v4037_v40 = vpop.eup %4036 }
0x106d   : > { %v5706_v37 = vmul.f32 %v4037_v40, %v4035_v4 }
0x106f   : > { %v2953_v35 = vpack.c.bf16 %v5706_v37, %v5706_v37 }
0x1071   : > { %3024 = vmatmul.mubr.bf16.vlgmr.msra.gmra.mrb[80].mxu0 %v2953_v35  ;;  %3065 = vmatmul.mubr.bf16.vlgmr.msra.gmra.mrb[96].mxu1 %v2953_v35 }
0x1072   : > { %3142 = vmatpush1.bf16.msra.mxu0 %v5606_v42  ;;  %3183 = vmatpush1.bf16.msra.mxu1 %v5608_v0  ;;  %v5975_v42 = vld [vmem:[#allocation68_spill] sm:$0xff] }
0x1073   : > { %3143 = vmatprep.subr.bf16.mxu0 %v5612_v47  ;;  %3184 = vmatprep.subr.bf16.mxu1 %v5614_v55 }
0x1074   : > { %3173 = vmatprep.mubr.bf16.mxu0 %v5933_v28  ;;  %3214 = vmatprep.mubr.bf16.mxu1 %v5933_v28 }
0x1076   : > { %3144 = vmatpush1.bf16.msra.mxu0 %v5618_v27  ;;  %3185 = vmatpush1.bf16.msra.mxu1 %v5620_v56  ;;  %v5976_v27 = vld [vmem:[#allocation70_spill] sm:$0xff] }
0x1077   : > { %3145 = vmatprep.subr.bf16.mxu0 %v5624_v49  ;;  %3186 = vmatprep.subr.bf16.mxu1 %v5626_v31 }
0x107a   : > { %3146 = vmatpush1.bf16.msra.mxu0 %v5630_v12  ;;  %3187 = vmatpush1.bf16.msra.mxu1 %v5632_v46 }
0x107b   : > { %3147 = vmatprep.subr.bf16.mxu0 %v5636_v63  ;;  %3188 = vmatprep.subr.bf16.mxu1 %v5638_v9 }
0x107e   : > { %3148 = vmatpush1.bf16.msra.mxu0 %v5642_v21  ;;  %3189 = vmatpush1.bf16.msra.mxu1 %v5644_v57  ;;  %v5977_v21 = vld [vmem:[#allocation86_spill] sm:$0xff] }
0x107f   : > { %3149 = vmatprep.subr.bf16.mxu0 %v5648_v61  ;;  %3190 = vmatprep.subr.bf16.mxu1 %v5650_v33  ;;  %v5978_v33 = vld [vmem:[#allocation85_spill] sm:$0xff] }
0x1082   : > { %3150 = vmatpush1.bf16.msra.mxu0 %v5652_v50  ;;  %3191 = vmatpush1.bf16.msra.mxu1 %v5656_v34 }
0x1083   : > { %3151 = vmatprep.subr.bf16.mxu0 %v5658_v19  ;;  %3192 = vmatprep.subr.bf16.mxu1 %v5660_v11 }
0x1086   : > { %3152 = vmatpush1.bf16.msra.mxu0 %v5666_v20  ;;  %3193 = vmatpush1.bf16.msra.mxu1 %v5668_v24 }
0x1087   : > { %3153 = vmatprep.subr.bf16.mxu0 %v5670_v52  ;;  %3194 = vmatprep.subr.bf16.mxu1 %v5672_v53 }
0x108a   : > { %3154 = vmatpush1.bf16.msra.mxu0 %v5678_v23  ;;  %3195 = vmatpush1.bf16.msra.mxu1 %v5680_v39 }
0x108b   : > { %3155 = vmatprep.subr.bf16.mxu0 %v5682_v54  ;;  %3196 = vmatprep.subr.bf16.mxu1 %v5684_v51 }
0x108e   : > { %3156 = vmatpush1.bf16.msra.mxu0 %v5690_v48  ;;  %3197 = vmatpush1.bf16.msra.mxu1 %v5692_v62 }
0x1144   : > { %v3025_v28 = vpop.f32.mrb[80].mxu0  ;;  %v3066_v29 = vpop.f32.mrb[96].mxu1 }
0x1145   : > { %v3073_v0 = vadd.f32 %v3025_v28, %v5975_v42  ;;  %v3027_v47 = vpop.f32.mrb[81].mxu0  ;;  %v3068_v55 = vpop.f32.mrb[97].mxu1  ;;  %v3075_v50 = vadd.f32 %v3066_v29, %v5978_v33 }
0x1146   : > { %v3074_v56 = vadd.f32 %v3027_v47, %v5976_v27  ;;  %v3029_v49 = vpop.f32.mrb[82].mxu0  ;;  %v3070_v31 = vpop.f32.mrb[98].mxu1  ;;  %v3076_v57 = vadd.f32 %v3068_v55, %v5977_v21 }
0x1147   : > { %v3613_v12 = vmul.f32 -1.442695, %v3073_v0  ;;  %v3030_v46 = vpop.f32.mrb[83].mxu0  ;;  %v3071_v63 = vpop.f32.mrb[99].mxu1 }
0x1148   : > { %v3614_v9 = vmul.f32 -1.442695, %v3074_v56  ;;  %v3615_v61 = vmul.f32 -1.442695, %v3076_v57 }
0x1149   : > { %4038 = vpow2.f32 %v3613_v12 }
0x114a   : > { %4040 = vpow2.f32 %v3614_v9 }
0x114b   : > { %4042 = vpow2.f32 %v3615_v61 }
0x114c   : > { %4044 = vtanh.f32 %v3075_v50 }
0x1153   : > { %v4039_v34 = vpop.eup %4038 }
0x1154   : > { %v4041_v19 = vpop.eup %4040  ;;  %v3080_v11 = vadd.f32 1.0, %v4039_v34 }
0x1155   : > { %v3086_v20 = vadd.f32 1.0, %v4041_v19  ;;  %v4043_v24 = vpop.eup %4042 }
0x1156   : > { %4046 = vrcp.f32 %v3080_v11  ;;  %v4045_v52 = vpop.eup %4044  ;;  %v3093_v54 = vadd.f32 1.0, %v4043_v24 }
0x1157   : > { %4048 = vrcp.f32 %v3086_v20 }
0x1158   : > { %4050 = vrcp.f32 %v3093_v54 }
0x1160   : > { %v4047_v53 = vpop.eup %4046 }
0x1161   : > { %v4049_v23 = vpop.eup %4048  ;;  %v3097_v39 = vmul.f32 %v4047_v53, %v4045_v52 }
0x1162   : > { %v3096_v51 = vmul.f32 %v4049_v23, %v5703_v26  ;;  %v4051_v62 = vpop.eup %4050 }
0x1164   : > { %v3098_v48 = vadd.f32 %v3097_v39, %v3096_v51 }
0x1166   : > { %4052 = vtanh.f32 %v3098_v48 }
0x1170   : > { %v4053_v36 = vpop.eup %4052 }
0x1171   : > { %v5747_v59 = vmul.f32 %v4053_v36, %v4051_v62 }
0x1173   : > { %v3103_v10 = vpack.c.bf16 %v5747_v59, %v5747_v59 }
0x1175   : > { %3174 = vmatmul.mubr.bf16.vlgmr.msra.gmra.mrb[84].mxu0 %v3103_v10  ;;  %3215 = vmatmul.mubr.bf16.vlgmr.msra.gmra.mrb[100].mxu1 %v3103_v10 }
0x1248   : > { %v3175_v6 = vpop.f32.mrb[84].mxu0  ;;  %v3216_v7 = vpop.f32.mrb[100].mxu1 }
0x1249   : > { %v3223_v41 = vadd.f32 %v3175_v6, %v5979_v13  ;;  %v3177_v16 = vpop.f32.mrb[85].mxu0  ;;  %v3218_v43 = vpop.f32.mrb[101].mxu1  ;;  %v3225_v38 = vadd.f32 %v3216_v7, %v5982_v18 }
0x124a   : > { %v3224_v25 = vadd.f32 %v3177_v16, %v5980_v3  ;;  %v3179_v45 = vpop.f32.mrb[86].mxu0  ;;  %v3220_v22 = vpop.f32.mrb[102].mxu1  ;;  %v3226_v17 = vadd.f32 %v3218_v43, %v5981_v2 }
0x124b   : > { %v3616_v5 = vmul.f32 -1.442695, %v3223_v41  ;;  %v3180_v44 = vpop.f32.mrb[87].mxu0  ;;  %v3221_v60 = vpop.f32.mrb[103].mxu1 }
0x124c   : > { %v3617_v8 = vmul.f32 -1.442695, %v3224_v25  ;;  %v3618_v14 = vmul.f32 -1.442695, %v3226_v17 }
0x124d   : > { %4054 = vpow2.f32 %v3616_v5 }
0x124e   : > { %4056 = vpow2.f32 %v3617_v8 }
0x124f   : > { %4058 = vpow2.f32 %v3618_v14 }
0x1250   : > { %4060 = vtanh.f32 %v3225_v38 }
0x1257   : > { %v4055_v26 = vpop.eup %4054 }
0x1258   : > { %v4057_v4 = vpop.eup %4056  ;;  %v3230_v40 = vadd.f32 1.0, %v4055_v26 }
0x1259   : > { %v3236_v35 = vadd.f32 1.0, %v4057_v4  ;;  %v4059_v28 = vpop.eup %4058 }
0x125a   : > { %4062 = vrcp.f32 %v3230_v40  ;;  %v4061_v29 = vpop.eup %4060  ;;  %v3243_v55 = vadd.f32 1.0, %v4059_v28 }
0x125b   : > { %4064 = vrcp.f32 %v3236_v35 }
0x125c   : > { %4066 = vrcp.f32 %v3243_v55 }
0x1264   : > { %v4063_v42 = vpop.eup %4062 }
0x1265   : > { %v4065_v0 = vpop.eup %4064  ;;  %v3247_v47 = vmul.f32 %v4063_v42, %v4061_v29 }
0x1266   : > { %v3246_v27 = vmul.f32 %v4065_v0, %v3098_v48  ;;  %v4067_v49 = vpop.eup %4066 }
0x1268   : > { %v3248_v56 = vadd.f32 %v3247_v47, %v3246_v27 }
0x126a   : > { %4068 = vtanh.f32 %v3248_v56 }
0x1274   : > { %v4069_v31 = vpop.eup %4068 }
0x1275   : > { %v3250_v12 = vmul.f32 %v4069_v31, %v4067_v49 }
0x1276   : > { %4272 = dma.done.wait [#allocation8 + $0x2], 1024 }
0x1277   : > { %4273 = vsyncadd [#allocation8 + $0x2], 4294966272  ;;  %v3264_v46 = vpack.c.bf16 %v5458_v1, %v5412_v30  ;;  %v3268_v63 = vld [vmem:[#allocation7] sm:$0xff]  ;;  %v3269_v9 = vld [vmem:[#allocation7 + $0x8] sm:$0xff]  ;;  %v3265_v1 = vpack.c.bf16 %v5550_v15, %v5504_v32  ;;  %v3266_v34 = vpack.c.bf16 %v5706_v37, %v5594_v58  ;;  %v3267_v19 = vpack.c.bf16 %v3250_v12, %v5747_v59  ;;  %s3621_s1 = sshll.u32 %s4394_s17, 7  ;;  %s3369_s14 = sshll.u32 %s4871_s13, 4  ;;  %s5778_s14 = int_to_ptr.vmem [resolvable:$true] %s3369_s14 }
0x1278   : > { %3639 = vmatprep.subr.bf16.mxu0 %v3268_v63  ;;  %v3270_v21 = vld [vmem:[#allocation7 + $0x10] sm:$0xff]  ;;  %v3271_v57 = vld [vmem:[#allocation7 + $0x18] sm:$0xff]  ;;  %v3272_v61 = vld [vmem:[#allocation7 + $0x20] sm:$0xff]  ;;  %s5983_s19 = sld [smem:[#allocation93_spill]]  ;;  %s3357_s17 = scalar_lea.sflag [#allocation11], %s4589_s5 }
0x1279   : > { %3655 = vmatprep.mubr.bf16.mxu0 %v3264_v46  ;;  %3640 = vmatpush3.bf16.msra.mxu0 %v3268_v63  ;;  %v3273_v33 = vld [vmem:[#allocation7 + $0x28] sm:$0xff]  ;;  %v3274_v50 = vld [vmem:[#allocation7 + $0x30] sm:$0xff]  ;;  %v3275_v30 = vld [vmem:[#allocation7 + $0x38] sm:$0xff]  ;;  %s4208_s24 = scalar_lea.vmem %s5778_s14, 1024  ;;  %p5984_p7 = scmp.ne.s32.totalorder %s5864_s25, 0 }
0x127a   : > { %3641 = vmatprep.subr.bf16.mxu0 %v3269_v9  ;;  %v3619_v11 = vld [vmem:[%s5835_s9] ss:$0 sm:$0xff]  ;;  %p4209_p3 = scmp.ne.s32.totalorder %s5778_s14, %s4208_s24  ;;  %s4316_s28 = smov [#allocation17]  }
0x127b   : > { %s4212_s12 = sshll.u32 %s4316_s28, 4  ;;  %s4213_s12 = int_to_ptr.vmem [resolvable:$false] %s4212_s12 }
0x127c   : > { %p4210_p8 = pnand %p4209_p3, %p5984_p7  ;;  %s4214_s0 = scalar_lea.vmem %s4213_s12, 2048 }
0x127d   : > { %3642 = vmatpush3.bf16.msra.mxu0 %v3269_v9  ;;  %p4215_p4 = scmp.lt.s32.totalorder %s5778_s14, %s4213_s12  ;;  %p4216_p0 = scmp.lt.s32.totalorder %s4214_s0, %s4208_s24 }
0x127e   : > { %3643 = vmatprep.subr.bf16.mxu0 %v3270_v21  ;;  %s5775_s23 = scalar_lea.hbm %s5983_s19, %s3621_s1  ;;  %p4211_p1 = pneg %p4210_p8 }
0x127f   : > { %p4217_p2 = por %p4216_p0, %p4215_p4 }
0x1281   : > { %3644 = vmatpush3.bf16.msra.mxu0 %v3270_v21  ;;  %p4218_p5 = pnand %p4217_p2, %p4211_p1 }
0x1282   : > { %3645 = vmatprep.subr.bf16.mxu0 %v3271_v57 }
0x1285   : > { %3646 = vmatpush3.bf16.msra.mxu0 %v3271_v57 }
0x1286   : > { %3647 = vmatprep.subr.bf16.mxu0 %v3272_v61 }
0x1289   : > { %3648 = vmatpush3.bf16.msra.mxu0 %v3272_v61 }
0x128a   : > { %3649 = vmatprep.subr.bf16.mxu0 %v3273_v33 }
0x128d   : > { %3650 = vmatpush3.bf16.msra.mxu0 %v3273_v33 }
0x128e   : > { %3651 = vmatprep.subr.bf16.mxu0 %v3274_v50 }
0x1291   : > { %3652 = vmatpush3.bf16.msra.mxu0 %v3274_v50 }
0x1292   : > { %3653 = vmatprep.subr.bf16.mxu0 %v3275_v30 }
0x1295   : > { %3654 = vmatpush3.bf16.msra.mxu0 %v3275_v30 }
0x1298   : > { %3656 = vmatmul.mubr.bf16.vlgmr.msra.gmra.mrb[88].mxu0 %v3265_v1 }
0x1299   : > { %3659 = vmatprep.mubr.bf16.mxu0 %v3266_v34 }
0x12a0   : > { %3660 = vmatmul.mubr.bf16.gmra.mrb[92].mxu0 %v3267_v19 }
0x136b   : > { %v3657_v20 = vpop.f32.mrb[88].mxu0 }
0x136c   : > { %v3326_v32 = vadd.f32 %v3657_v20, %v3619_v11  ;;  %v3317_v15 = vpop.f32.mrb[89].mxu0 }
0x136d   : > { %v3318_v24 = vadd.f32 %v3619_v11, %v3317_v15  ;;  %v3658_v52 = vpop.f32.mrb[90].mxu0 }
0x136e   : > { %3350 = vst [vmem:[%s4871_s13 + $0x10] sm:$0xff] %v3326_v32  ;;  %v3329_v58 = vadd.f32 %v3658_v52, %v3619_v11  ;;  %v3320_v37 = vpop.f32.mrb[91].mxu0 }
0x136f   : > { %3348 = vst [vmem:[%s4871_s13] sm:$0xff] %v3318_v24  ;;  %v3321_v53 = vadd.f32 %v3619_v11, %v3320_v37 }
0x1370   : > { %3351 = vst [vmem:[%s4871_s13 + $0x18] sm:$0xff] %v3329_v58 }
0x1371   : > { %3349 = vst [vmem:[%s4871_s13 + $0x8] sm:$0xff] %v3321_v53 }
0x1373   : > { %v3661_v23 = vpop.f32.mrb[92].mxu0 }
0x1374   : > { %v3342_v39 = vadd.f32 %v3661_v23, %v3619_v11  ;;  %v3333_v54 = vpop.f32.mrb[93].mxu0 }
0x1375   : > { %v3334_v51 = vadd.f32 %v3619_v11, %v3333_v54  ;;  %v3662_v48 = vpop.f32.mrb[94].mxu0 }
0x1376   : > { %3354 = vst [vmem:[%s4871_s13 + $0x30] sm:$0xff] %v3342_v39  ;;  %v3345_v62 = vadd.f32 %v3662_v48, %v3619_v11  ;;  %v3336_v36 = vpop.f32.mrb[95].mxu0 }
0x1377   : > { %3352 = vst [vmem:[%s4871_s13 + $0x20] sm:$0xff] %v3334_v51  ;;  %v3337_v59 = vadd.f32 %v3619_v11, %v3336_v36 }
0x1378   : > { %3355 = vst [vmem:[%s4871_s13 + $0x38] sm:$0xff] %v3345_v62 }
0x1379   : > { %3353 = vst [vmem:[%s4871_s13 + $0x28] sm:$0xff] %v3337_v59 }
0x137a   : > { %4221 = shalt.err (!%p4218_p5)
}
0x137b   : > { %s4222_s21 = scalar_lea.hbm %s5775_s23, 1024  ;;  %s4226_s2 = scalar_lea.hbm %s5983_s19, 2048 }
0x137c   : > { %p4223_p11 = scmp.ne.s32.totalorder %s5775_s23, %s4222_s21  ;;  %p4227_p13 = scmp.lt.u32.totalorder %s5775_s23, %s5983_s19 }
0x137d   : > { %p4228_p9 = scmp.lt.u32.totalorder %s4226_s2, %s4222_s21  ;;  %p4230_p3 = scmp.lt.u32.totalorder %s4222_s21, %s5775_s23 }
0x137e   : > { %p4224_p12 = pnand %p4223_p11, %p5984_p7 }
0x137f   : > { %p4229_p10 = por %p4228_p9, %p4227_p13 }
0x1380   : > { %p4225_p6 = pneg %p4224_p12 }
0x1381   : > { %p4231_p8 = por %p4230_p3, %p4229_p10 }
0x1383   : > { %p4232_p1 = pnand %p4231_p8, %p4225_p6 }
0x1385   : > { %4235 = shalt.err (!%p4232_p1)
}
0x1386   : > { %s4317_s13 = smov 8  }
0x1387   : > { %3683 = dma.vmem_to_hbm [thread:$0]  (%p5984_p7), %s5778_s14, 1024, %s5775_s23, %s3357_s17, %s4307_s29, %s4309_s18, %s4317_s13  }
0x1388 PF: > { %s5985_s30 = sld [smem:[#allocation34_spill]]  ;;  %s5986_s11 = sld [smem:[#allocation39_spill]] }
0x1389   : > { %p5988_p0 = scmp.ge.s32.totalorder %s4292_s16, 2 }
0x138e   : > { %s3384_s1 = sand.u32 1, %s5985_s30   ;;  %p5987_p4 = scmp.ne.s32.totalorder %s5986_s11, 0 }
0x138f   : > { %s3385_s15 = scalar_lea.sflag [#allocation11], %s3384_s1 }
0x1390   : > { %p3700_p2 = pnand %p5988_p0, %p5987_p4 }
0x1392   : > { %4275 = dma.done.wait (!%p3700_p2), %s3385_s15, 1024  }
0x1393   : > { %4277 = vsyncadd (!%p3700_p2), %s3385_s15, 4294966272  ;;  %s5989_s16 = sld [smem:[#allocation37_spill]]  ;;  %s5990_s13 = sld [smem:[#allocation35_spill]] }
0x1394   : > { %s5991_s14 = sld [smem:[#allocation36_spill]]  ;;  %s5992_s15 = sld [smem:[#allocation38_spill]] }
0x1399   : > { %p27_p5 = scmp.ge.s32.totalorder %s5989_s16, 4  }
0x139b   :  { %29 = sbr.rel (!%p27_p5) target bundleno = 14 (0xe), region = 159 }
0x13a2   :  { %3390 = vsyncpa [#allocation10], 1 }
0x13a3   :  { %3392 = vsyncpa [#allocation10 + $0x1], 1 }
0x13a4   :  { %3393 = vsyncpa [#allocation13], 1 }
0x13a5   :  { %3395 = vsyncpa [#allocation13 + $0x1], 1 }
0x13a6   :  { %3396 = vsyncpa [#allocation16], 1 }
0x13a7   :  { %3397 = vsyncpa [#allocation11], 1 }
0x13a8   :  { %3399 = vsyncpa [#allocation11 + $0x1], 1 }
0x13a9   :  { %3400 = vsyncmov [#allocation8] }
0x13ac   :  { %s3401_s25 = vpop.sfrf %3400 }
0x13ad   :  { %p3624_p7 = scmp.ne.s32.totalorder %s3401_s25, 0 }
0x13af   :  { %3405 = shalt.err (%p3624_p7)  }
0x13b0   :  { %3407 = vsyncmov [#allocation8 + $0x1] }
0x13b3   :  { %s3408_s5 = vpop.sfrf %3407 }
0x13b4   :  { %p3625_p11 = scmp.ne.s32.totalorder %s3408_s5, 0 }
0x13b6   :  { %3412 = shalt.err (%p3625_p11)  }
0x13b7   :  { %3414 = vsyncmov [#allocation8 + $0x2] }
0x13ba   :  { %s3415_s29 = vpop.sfrf %3414 }
0x13bb   :  { %p3626_p12 = scmp.ne.s32.totalorder %s3415_s29, 0 }
0x13bd   :  { %3419 = shalt.err (%p3626_p12)  }

</bundles_post_ra>
